<compile_context>
chip_gen: v5e
topology: v5e:2x2
jax: 0.10.0
libtpu: 0.0.40
codegen_flags: <defaults>
</compile_context>

<pallas_src>
import functools

import jax
import jax.numpy as jnp
from jax.experimental import pallas as pl
from jax.experimental.pallas import tpu as pltpu


# ----------------------------------------------------------------------------
# Shared: RMS-norm + Q/K/V projections (full-width matmuls feed the MXU).
# ----------------------------------------------------------------------------
def _rmsnorm_qkv(hid_ref, kv_ref, lnw_ref, wq_ref, wk_ref, wv_ref, eps):
    f32 = jnp.float32
    cdt = wq_ref.dtype                                   # compute dtype (weights pre-cast)
    x32 = hid_ref[0].astype(f32)                         # (TQ, D)
    var = jnp.mean(x32 * x32, axis=-1, keepdims=True)
    norm_x = (x32 * jax.lax.rsqrt(var + eps)).astype(cdt) * lnw_ref[0].astype(cdt)[None, :]
    kvx = kv_ref[0].astype(cdt)                          # (K, D)
    q = jnp.dot(norm_x, wq_ref[...], preferred_element_type=f32).astype(cdt)  # (TQ, H*dk)
    k = jnp.dot(kvx, wk_ref[...], preferred_element_type=f32).astype(cdt)     # (K,  H*dk)
    v = jnp.dot(kvx, wv_ref[...], preferred_element_type=f32).astype(cdt)     # (K,  H*dk)
    return x32, q, k, v


# ----------------------------------------------------------------------------
# Primary kernel: heads batched into single leading-batch dot_generals.
# ----------------------------------------------------------------------------
def _cross_attn_kernel_batched(hid_ref, kv_ref, bias_ref, lnw_ref,
                               wq_ref, wk_ref, wv_ref, wo_ref,
                               out_ref, scores_ref,
                               *, n_heads, d_kv, eps, use_einshape):
    f32 = jnp.float32
    cdt = wq_ref.dtype
    x32, q, k, v = _rmsnorm_qkv(hid_ref, kv_ref, lnw_ref, wq_ref, wk_ref, wv_ref, eps)

    def split_heads(t):                                   # (S, H*dk) -> (H, S, dk)
        t3 = t.reshape(t.shape[0], n_heads, d_kv)
        if use_einshape:
            return pltpu.einshape("shd->hsd", t3)         # lane-layout-aware permute
        return jnp.transpose(t3, (1, 0, 2))

    qh = split_heads(q)                                   # (H, TQ, dk)
    kh = split_heads(k)                                   # (H, K,  dk)
    vh = split_heads(v)                                   # (H, K,  dk)

    # One batched MXU matmul over all heads; MXU consumes the transposed RHS directly.
    s = jnp.einsum("hqd,hkd->hqk", qh, kh, preferred_element_type=f32)  # (H, TQ, K)
    s = s + bias_ref[0].astype(f32)
    scores_ref[0] = s.astype(scores_ref.dtype)            # single lane-dense store

    # Softmax in f32 over the key axis (one batched reduction instead of H small ones).
    m = jnp.max(s, axis=-1, keepdims=True)
    e = jnp.exp(s - m)
    w = (e * pl.reciprocal(jnp.sum(e, axis=-1, keepdims=True), approx=True)).astype(cdt)

    ctx = jnp.einsum("hqk,hkd->hqd", w, vh, preferred_element_type=f32)  # (H, TQ, dk)

    # Output projection accumulated per head (Wo pre-split as (H, dk, D)):
    # avoids re-packing heads along the lane axis.
    y = jnp.zeros_like(x32)
    for h in range(n_heads):
        y = y + jnp.dot(ctx[h].astype(cdt), wo_ref[h], preferred_element_type=f32)

    out_ref[0] = (x32 + y).astype(out_ref.dtype)          # residual (dropout = identity)


# ----------------------------------------------------------------------------
# Fallback kernel: per-head loop (constructs known to lower on all Pallas builds).
# Still uses compute-dtype matmuls, approx reciprocal and per-head Wo accumulation.
# ----------------------------------------------------------------------------
def _cross_attn_kernel_looped(hid_ref, kv_ref, bias_ref, lnw_ref,
                              wq_ref, wk_ref, wv_ref, wo_ref,
                              out_ref, scores_ref,
                              *, n_heads, d_kv, eps):
    f32 = jnp.float32
    cdt = wq_ref.dtype
    x32, q, k, v = _rmsnorm_qkv(hid_ref, kv_ref, lnw_ref, wq_ref, wk_ref, wv_ref, eps)

    y = jnp.zeros_like(x32)
    for h in range(n_heads):
        sl = slice(h * d_kv, (h + 1) * d_kv)
        q_h, k_h, v_h = q[:, sl], k[:, sl], v[:, sl]
        s_h = jnp.dot(q_h, k_h.T, preferred_element_type=f32) + bias_ref[0, h].astype(f32)
        scores_ref[0, h] = s_h.astype(scores_ref.dtype)
        m = jnp.max(s_h, axis=-1, keepdims=True)
        e = jnp.exp(s_h - m)
        w_h = (e * pl.reciprocal(jnp.sum(e, axis=-1, keepdims=True), approx=True)).astype(cdt)
        c_h = jnp.dot(w_h, v_h, preferred_element_type=f32).astype(cdt)      # (TQ, dk)
        y = y + jnp.dot(c_h, wo_ref[h], preferred_element_type=f32)
    out_ref[0] = (x32 + y).astype(out_ref.dtype)


def _choose_q_tile(q_len, max_tile):
    """Largest query tile <= max_tile that divides Q and satisfies the (8,128) rule."""
    if q_len <= max_tile:
        return q_len
    for t in range(min(max_tile, q_len), 7, -1):
        if t % 8 == 0 and q_len % t == 0:
            return t
    return q_len


def t5_layer_cross_attention(hidden_states, kv, position_bias, ln_weight,
                             wq, wk, wv, wo, *, n_heads, d_kv, eps=1e-6,
                             compute_dtype=None, q_tile=256,
                             vmem_limit_bytes=64 * 1024 * 1024):
    """Returns (layer_output, pre-softmax scores), matching the eval-mode forward."""
    B, Q, D = hidden_states.shape
    _, K, _ = kv.shape
    HD = n_heads * d_kv
    assert wq.shape == (D, HD) and wk.shape == (D, HD) and wv.shape == (D, HD)
    assert wo.shape == (HD, D)
    assert position_bias.shape == (1, n_heads, Q, K)

    # Compute dtype = activation dtype by default (torch runs matmuls in the module dtype).
    cdt = jnp.dtype(compute_dtype) if compute_dtype is not None else jnp.dtype(hidden_states.dtype)
    wq_c, wk_c, wv_c = wq.astype(cdt), wk.astype(cdt), wv.astype(cdt)
    wo_heads = wo.astype(cdt).reshape(n_heads, d_kv, D)   # per-head output-projection slabs
    lnw_2d = ln_weight.reshape(1, D)

    # Q-tiling bounds VMEM (bias/scores tiles) and adds parallel grid work.
    # Tune q_tile per generation: ~128-256 (v5e/v7x), up to 512 (v6e).
    tq = _choose_q_tile(Q, q_tile)
    nq = Q // tq

    out_shapes = (
        jax.ShapeDtypeStruct((B, Q, D), hidden_states.dtype),            # layer_output
        jax.ShapeDtypeStruct((B, n_heads, Q, K), hidden_states.dtype),   # pre-softmax scores
    )

    def build(kernel_body, single_buffer_invariants):
        def invariant_spec(shape):
            ndim = len(shape)
            kwargs = {}
            if single_buffer_invariants:
                # Grid-invariant operand: double-buffering only doubles its VMEM footprint.
                kwargs["pipeline_mode"] = pl.Buffered(1)
            return pl.BlockSpec(shape, lambda b, qi: (0,) * ndim, **kwargs)

        grid_spec = pltpu.PrefetchScalarGridSpec(
            num_scalar_prefetch=0,
            grid=(B, nq),
            in_specs=[
                pl.BlockSpec((1, tq, D), lambda b, qi: (b, qi, 0)),               # hidden tile
                pl.BlockSpec((1, K, D), lambda b, qi: (b, 0, 0)),                 # encoder kv
                pl.BlockSpec((1, n_heads, tq, K), lambda b, qi: (0, 0, qi, 0)),   # bias tile
                invariant_spec((1, D)),                                           # LN weight
                invariant_spec((D, HD)),                                          # Wq^T
                invariant_spec((D, HD)),                                          # Wk^T
                invariant_spec((D, HD)),                                          # Wv^T
                invariant_spec((n_heads, d_kv, D)),                               # Wo^T (per head)
            ],
            out_specs=[
                pl.BlockSpec((1, tq, D), lambda b, qi: (b, qi, 0)),
                pl.BlockSpec((1, n_heads, tq, K), lambda b, qi: (b, 0, qi, 0)),
            ],
        )
        return pl.pallas_call(
            kernel_body,
            out_shape=out_shapes,
            grid_spec=grid_spec,
            compiler_params=pltpu.CompilerParams(
                dimension_semantics=("parallel", "parallel"),
                vmem_limit_bytes=vmem_limit_bytes),
        )

    args = (hidden_states, kv, position_bias, lnw_2d, wq_c, wk_c, wv_c, wo_heads)

    batched = functools.partial(_cross_attn_kernel_batched,
                                n_heads=n_heads, d_kv=d_kv, eps=eps)
    looped = functools.partial(_cross_attn_kernel_looped,
                               n_heads=n_heads, d_kv=d_kv, eps=eps)
    # Fully-optimized build first; degrade if this Pallas build lacks einshape /
    # 3-D transpose / Buffered(1).  The last variant uses only constructs already
    # validated on this module.
    attempts = (
        (functools.partial(batched, use_einshape=True), True),
        (functools.partial(batched, use_einshape=True), False),
        (functools.partial(batched, use_einshape=False), False),
        (looped, False),
    )
    last_err = None
    for body, single_buf in attempts:
        try:
            out = build(body, single_buf)(*args)
            jax.block_until_ready(out)
            return out
        except Exception as err:  # graceful degradation across Pallas feature sets
            last_err = err
    raise last_err


# ----------------------------------------------------------------------------
# Pure-JAX reference (replica of the PyTorch eval-mode forward) for verification.
# ----------------------------------------------------------------------------
def _reference(hidden_states, kv, position_bias, ln_weight, wq, wk, wv, wo,
               *, n_heads, d_kv, eps=1e-6):
    B, Q, D = hidden_states.shape
    x = hidden_states.astype(jnp.float32)
    var = jnp.mean(x * x, axis=-1, keepdims=True)
    norm_x = x * jax.lax.rsqrt(var + eps) * ln_weight[None, None, :]

    def shape(t):
        return t.reshape(B, -1, n_heads, d_kv).transpose(0, 2, 1, 3)

    q = shape(norm_x @ wq)
    k = shape(kv.astype(jnp.float32) @ wk)
    v = shape(kv.astype(jnp.float32) @ wv)
    scores = jnp.einsum('bhqd,bhkd->bhqk', q, k) + position_bias
    weights = jax.nn.softmax(scores, axis=-1)
    ctx = jnp.einsum('bhqk,bhkd->bhqd', weights, v)
    ctx = ctx.transpose(0, 2, 1, 3).reshape(B, Q, n_heads * d_kv)
    y = ctx @ wo
    return hidden_states + y, scores


if __name__ == "__main__":
    # Small config consistent with T5Attention: d_model, n_heads, d_kv.
    B, Q, K = 2, 8, 16
    D, H, DK = 32, 4, 8          # d_model, num_heads, d_kv (inner_dim = 32)
    EPS = 1e-6

    key = jax.random.PRNGKey(0)
    k_hid, k_kv, k_ln, k_q, k_k, k_v, k_o = jax.random.split(key, 7)

    hidden = jax.random.normal(k_hid, (B, Q, D), dtype=jnp.float32)
    kv_enc = jax.random.normal(k_kv, (B, K, D), dtype=jnp.float32)
    ln_w = 1.0 + 0.1 * jax.random.normal(k_ln, (D,), dtype=jnp.float32)
    wq = 0.125 * jax.random.normal(k_q, (D, H * DK), dtype=jnp.float32)
    wk = 0.125 * jax.random.normal(k_k, (D, H * DK), dtype=jnp.float32)
    wv = 0.125 * jax.random.normal(k_v, (D, H * DK), dtype=jnp.float32)
    wo = 0.125 * jax.random.normal(k_o, (H * DK, D), dtype=jnp.float32)

    # position_bias = zeros (no relative-attention-bias weights) + extended attention
    # mask: mask out the last 2 encoder positions.
    att_mask = jnp.concatenate(
        [jnp.zeros((1, 1, 1, K - 2)), jnp.full((1, 1, 1, 2), -1e9)], axis=-1)
    position_bias = jnp.broadcast_to(att_mask, (1, H, Q, K)).astype(jnp.float32)

    # --- f32 path: matches the PyTorch module run in f32 ---
    layer_out, scores = t5_layer_cross_attention(
        hidden, kv_enc, position_bias, ln_w, wq, wk, wv, wo,
        n_heads=H, d_kv=DK, eps=EPS)
    jax.block_until_ready((layer_out, scores))

    ref_out, ref_scores = _reference(
        hidden, kv_enc, position_bias, ln_w, wq, wk, wv, wo,
        n_heads=H, d_kv=DK, eps=EPS)

    assert jnp.allclose(scores, ref_scores, atol=1e-3, rtol=1e-3), "scores mismatch"
    assert jnp.allclose(layer_out, ref_out, atol=5e-3, rtol=5e-3), "layer_output mismatch"

    # --- bf16 path: matmuls on the MXU in bf16 with f32 accumulation ---
    bf16 = jnp.bfloat16
    lo_bf, sc_bf = t5_layer_cross_attention(
        hidden.astype(bf16), kv_enc.astype(bf16), position_bias,
        ln_w.astype(bf16), wq.astype(bf16), wk.astype(bf16),
        wv.astype(bf16), wo.astype(bf16),
        n_heads=H, d_kv=DK, eps=EPS)
    jax.block_until_ready((lo_bf, sc_bf))
    assert jnp.allclose(lo_bf.astype(jnp.float32), ref_out, atol=0.25, rtol=0.25), \
        "bf16 layer_output mismatch"
    assert jnp.allclose(sc_bf.astype(jnp.float32), ref_scores, atol=0.25, rtol=0.25), \
        "bf16 scores mismatch"

    print("KERNEL_OK")
</pallas_src>

<mosaic_0001>
module attributes {stable_mosaic.version = 11 : i64} {
  func.func @_cross_attn_kernel_batched(%arg0: i32, %arg1: i32, %arg2: memref<1x8x32xf32, #tpu.memory_space<vmem>>, %arg3: memref<1x16x32xf32, #tpu.memory_space<vmem>>, %arg4: memref<1x4x8x16xf32, #tpu.memory_space<vmem>>, %arg5: memref<1x32xf32, #tpu.memory_space<vmem>>, %arg6: memref<32x32xf32, #tpu.memory_space<vmem>>, %arg7: memref<32x32xf32, #tpu.memory_space<vmem>>, %arg8: memref<32x32xf32, #tpu.memory_space<vmem>>, %arg9: memref<4x8x32xf32, #tpu.memory_space<vmem>>, %arg10: memref<1x8x32xf32, #tpu.memory_space<vmem>>, %arg11: memref<1x4x8x16xf32, #tpu.memory_space<vmem>>) attributes {dimension_semantics = [#tpu.dimension_semantics<parallel>, #tpu.dimension_semantics<parallel>], iteration_bounds = array<i64: 2, 1>, scalar_prefetch = 0 : i64, scratch_operands = 0 : i64, tpu.core_type = #tpu.core_type<tc>, window_params = [{transform_indices = @transform_0, window_bounds = array<i64: 1, 8, 32>}, {transform_indices = @transform_1, window_bounds = array<i64: 1, 16, 32>}, {transform_indices = @transform_2, window_bounds = array<i64: 1, 4, 8, 16>}, {pipeline_mode = #tpu.pipeline_mode<synchronous>, transform_indices = @transform_3, window_bounds = array<i64: 1, 32>}, {pipeline_mode = #tpu.pipeline_mode<synchronous>, transform_indices = @transform_4, window_bounds = array<i64: 32, 32>}, {pipeline_mode = #tpu.pipeline_mode<synchronous>, transform_indices = @transform_5, window_bounds = array<i64: 32, 32>}, {pipeline_mode = #tpu.pipeline_mode<synchronous>, transform_indices = @transform_6, window_bounds = array<i64: 32, 32>}, {pipeline_mode = #tpu.pipeline_mode<synchronous>, transform_indices = @transform_7, window_bounds = array<i64: 4, 8, 32>}, {transform_indices = @transform_8, window_bounds = array<i64: 1, 8, 32>}, {transform_indices = @transform_9, window_bounds = array<i64: 1, 4, 8, 16>}]} {
    %c0 = arith.constant 0 : index
    %c0_0 = arith.constant 0 : index
    %c0_1 = arith.constant 0 : index
    %0 = vector.load %arg2[%c0, %c0_0, %c0_1] : memref<1x8x32xf32, #tpu.memory_space<vmem>>, vector<1x8x32xf32>
    %1 = vector.shape_cast %0 : vector<1x8x32xf32> to vector<8x32xf32>
    %2 = arith.mulf %1, %1 : vector<8x32xf32>
    %cst = arith.constant dense<0.000000e+00> : vector<8xf32>
    %3 = vector.multi_reduction <add>, %2, %cst [1] : vector<8x32xf32> to vector<8xf32>
    %4 = vector.shape_cast %3 : vector<8xf32> to vector<8x1xf32>
    %cst_2 = arith.constant 3.200000e+01 : f32
    %5 = vector.broadcast %cst_2 : f32 to vector<8x1xf32>
    %6 = arith.divf %4, %5 : vector<8x1xf32>
    %cst_3 = arith.constant 9.99999997E-7 : f32
    %7 = vector.broadcast %cst_3 : f32 to vector<8x1xf32>
    %8 = arith.addf %6, %7 : vector<8x1xf32>
    %9 = math.rsqrt %8 : vector<8x1xf32>
    %10 = vector.broadcast %9 : vector<8x1xf32> to vector<8x32xf32>
    %11 = arith.mulf %1, %10 : vector<8x32xf32>
    %c0_4 = arith.constant 0 : index
    %c0_5 = arith.constant 0 : index
    %12 = vector.load %arg5[%c0_4, %c0_5] : memref<1x32xf32, #tpu.memory_space<vmem>>, vector<1x32xf32>
    %13 = vector.shape_cast %12 : vector<1x32xf32> to vector<32xf32>
    %14 = vector.shape_cast %13 : vector<32xf32> to vector<1x32xf32>
    %15 = vector.broadcast %14 : vector<1x32xf32> to vector<8x32xf32>
    %16 = arith.mulf %11, %15 : vector<8x32xf32>
    %c0_6 = arith.constant 0 : index
    %c0_7 = arith.constant 0 : index
    %c0_8 = arith.constant 0 : index
    %17 = vector.load %arg3[%c0_6, %c0_7, %c0_8] : memref<1x16x32xf32, #tpu.memory_space<vmem>>, vector<1x16x32xf32>
    %18 = vector.shape_cast %17 : vector<1x16x32xf32> to vector<16x32xf32>
    %c0_9 = arith.constant 0 : index
    %c0_10 = arith.constant 0 : index
    %19 = vector.load %arg6[%c0_9, %c0_10] : memref<32x32xf32, #tpu.memory_space<vmem>>, vector<32x32xf32>
    %cst_11 = arith.constant dense<0.000000e+00> : vector<8x32xf32>
    %20 = tpu.matmul %16, %19, %cst_11 {dimension_numbers = #tpu.dot_dimension_numbers<[1], [0], [0], [1], [0, 0, 1, 1], [], []>} : vector<8x32xf32>, vector<32x32xf32>, vector<8x32xf32> -> vector<8x32xf32>
    %c0_12 = arith.constant 0 : index
    %c0_13 = arith.constant 0 : index
    %21 = vector.load %arg7[%c0_12, %c0_13] : memref<32x32xf32, #tpu.memory_space<vmem>>, vector<32x32xf32>
    %cst_14 = arith.constant dense<0.000000e+00> : vector<16x32xf32>
    %22 = tpu.matmul %18, %21, %cst_14 {dimension_numbers = #tpu.dot_dimension_numbers<[1], [0], [0], [1], [0, 0, 1, 1], [], []>} : vector<16x32xf32>, vector<32x32xf32>, vector<16x32xf32> -> vector<16x32xf32>
    %c0_15 = arith.constant 0 : index
    %c0_16 = arith.constant 0 : index
    %23 = vector.load %arg8[%c0_15, %c0_16] : memref<32x32xf32, #tpu.memory_space<vmem>>, vector<32x32xf32>
    %cst_17 = arith.constant dense<0.000000e+00> : vector<16x32xf32>
    %24 = tpu.matmul %18, %23, %cst_17 {dimension_numbers = #tpu.dot_dimension_numbers<[1], [0], [0], [1], [0, 0, 1, 1], [], []>} : vector<16x32xf32>, vector<32x32xf32>, vector<16x32xf32> -> vector<16x32xf32>
    %25 = vector.shape_cast %20 : vector<8x32xf32> to vector<8x4x8xf32>
    %26 = tpu.transpose %25, [1, 0, 2] : vector<8x4x8xf32> -> vector<4x8x8xf32>
    %27 = vector.shape_cast %22 : vector<16x32xf32> to vector<16x4x8xf32>
    %28 = tpu.transpose %27, [1, 0, 2] : vector<16x4x8xf32> -> vector<4x16x8xf32>
    %29 = vector.shape_cast %24 : vector<16x32xf32> to vector<16x4x8xf32>
    %30 = tpu.transpose %29, [1, 0, 2] : vector<16x4x8xf32> -> vector<4x16x8xf32>
    "tpu.trace_start"() <{level = 10 : i32, message = "hqd,hkd->hqk"}> : () -> ()
    %cst_18 = arith.constant dense<0.000000e+00> : vector<4x8x16xf32>
    %31 = tpu.matmul %26, %28, %cst_18 {dimension_numbers = #tpu.dot_dimension_numbers<[2], [2], [1], [1], [0, 0, 0, 1, 1, 1], [0], [0]>} : vector<4x8x8xf32>, vector<4x16x8xf32>, vector<4x8x16xf32> -> vector<4x8x16xf32>
    "tpu.trace_stop"() : () -> ()
    %c0_19 = arith.constant 0 : index
    %c0_20 = arith.constant 0 : index
    %c0_21 = arith.constant 0 : index
    %c0_22 = arith.constant 0 : index
    %32 = vector.load %arg4[%c0_19, %c0_20, %c0_21, %c0_22] : memref<1x4x8x16xf32, #tpu.memory_space<vmem>>, vector<1x4x8x16xf32>
    %33 = vector.shape_cast %32 : vector<1x4x8x16xf32> to vector<4x8x16xf32>
    %34 = arith.addf %31, %33 : vector<4x8x16xf32>
    %c0_23 = arith.constant 0 : index
    %c0_24 = arith.constant 0 : index
    %c0_25 = arith.constant 0 : index
    %c0_26 = arith.constant 0 : index
    %35 = vector.load %arg11[%c0_23, %c0_24, %c0_25, %c0_26] : memref<1x4x8x16xf32, #tpu.memory_space<vmem>>, vector<1x4x8x16xf32>
    %36 = vector.shape_cast %35 : vector<1x4x8x16xf32> to vector<4x8x16xf32>
    %37 = vector.shape_cast %34 : vector<4x8x16xf32> to vector<1x4x8x16xf32>
    tpu.vector_store %arg11[%c0_23, %c0_24, %c0_25, %c0_26], %37 {strides = array<i32>} : memref<1x4x8x16xf32, #tpu.memory_space<vmem>>, vector<1x4x8x16xf32>,
    %cst_27 = arith.constant dense<0xFF800000> : vector<4x8xf32>
    %38 = vector.multi_reduction <maximumf>, %34, %cst_27 [2] : vector<4x8x16xf32> to vector<4x8xf32>
    %39 = vector.shape_cast %38 : vector<4x8xf32> to vector<4x8x1xf32>
    %40 = vector.broadcast %39 : vector<4x8x1xf32> to vector<4x8x16xf32>
    %41 = arith.subf %34, %40 : vector<4x8x16xf32>
    %42 = math.exp %41 : vector<4x8x16xf32>
    %cst_28 = arith.constant dense<0.000000e+00> : vector<4x8xf32>
    %43 = vector.multi_reduction <add>, %42, %cst_28 [2] : vector<4x8x16xf32> to vector<4x8xf32>
    %44 = vector.shape_cast %43 : vector<4x8xf32> to vector<4x8x1xf32>
    %45 = tpu.reciprocal %44 {approx = true} : vector<4x8x1xf32> -> vector<4x8x1xf32>
    %46 = vector.broadcast %45 : vector<4x8x1xf32> to vector<4x8x16xf32>
    %47 = arith.mulf %42, %46 : vector<4x8x16xf32>
    "tpu.trace_start"() <{level = 10 : i32, message = "hqk,hkd->hqd"}> : () -> ()
    %cst_29 = arith.constant dense<0.000000e+00> : vector<4x8x8xf32>
    %48 = tpu.matmul %47, %30, %cst_29 {dimension_numbers = #tpu.dot_dimension_numbers<[2], [1], [1], [2], [0, 0, 0, 1, 1, 2], [0], [0]>} : vector<4x8x16xf32>, vector<4x16x8xf32>, vector<4x8x8xf32> -> vector<4x8x8xf32>
    %cst_30 = arith.constant 0.000000e+00 : f32
    "tpu.trace_stop"() : () -> ()
    %49 = vector.broadcast %cst_30 : f32 to vector<8x32xf32>
    %50 = vector.extract_strided_slice %48 {offsets = [0, 0, 0], sizes = [1, 8, 8], strides = [1, 1, 1]} : vector<4x8x8xf32> to vector<1x8x8xf32>
    %51 = vector.shape_cast %50 : vector<1x8x8xf32> to vector<8x8xf32>
    %c0_31 = arith.constant 0 : index
    %c0_32 = arith.constant 0 : index
    %c0_33 = arith.constant 0 : index
    %52 = vector.load %arg9[%c0_31, %c0_32, %c0_33] : memref<4x8x32xf32, #tpu.memory_space<vmem>>, vector<1x8x32xf32>
    %53 = vector.shape_cast %52 : vector<1x8x32xf32> to vector<8x32xf32>
    %cst_34 = arith.constant dense<0.000000e+00> : vector<8x32xf32>
    %54 = tpu.matmul %51, %53, %cst_34 {dimension_numbers = #tpu.dot_dimension_numbers<[1], [0], [0], [1], [0, 0, 1, 1], [], []>} : vector<8x8xf32>, vector<8x32xf32>, vector<8x32xf32> -> vector<8x32xf32>
    %55 = arith.addf %49, %54 : vector<8x32xf32>
    %56 = vector.extract_strided_slice %48 {offsets = [1, 0, 0], sizes = [1, 8, 8], strides = [1, 1, 1]} : vector<4x8x8xf32> to vector<1x8x8xf32>
    %57 = vector.shape_cast %56 : vector<1x8x8xf32> to vector<8x8xf32>
    %c1 = arith.constant 1 : index
    %c0_35 = arith.constant 0 : index
    %c0_36 = arith.constant 0 : index
    %58 = vector.load %arg9[%c1, %c0_35, %c0_36] : memref<4x8x32xf32, #tpu.memory_space<vmem>>, vector<1x8x32xf32>
    %59 = vector.shape_cast %58 : vector<1x8x32xf32> to vector<8x32xf32>
    %cst_37 = arith.constant dense<0.000000e+00> : vector<8x32xf32>
    %60 = tpu.matmul %57, %59, %cst_37 {dimension_numbers = #tpu.dot_dimension_numbers<[1], [0], [0], [1], [0, 0, 1, 1], [], []>} : vector<8x8xf32>, vector<8x32xf32>, vector<8x32xf32> -> vector<8x32xf32>
    %61 = arith.addf %55, %60 : vector<8x32xf32>
    %62 = vector.extract_strided_slice %48 {offsets = [2, 0, 0], sizes = [1, 8, 8], strides = [1, 1, 1]} : vector<4x8x8xf32> to vector<1x8x8xf32>
    %63 = vector.shape_cast %62 : vector<1x8x8xf32> to vector<8x8xf32>
    %c2 = arith.constant 2 : index
    %c0_38 = arith.constant 0 : index
    %c0_39 = arith.constant 0 : index
    %64 = vector.load %arg9[%c2, %c0_38, %c0_39] : memref<4x8x32xf32, #tpu.memory_space<vmem>>, vector<1x8x32xf32>
    %65 = vector.shape_cast %64 : vector<1x8x32xf32> to vector<8x32xf32>
    %cst_40 = arith.constant dense<0.000000e+00> : vector<8x32xf32>
    %66 = tpu.matmul %63, %65, %cst_40 {dimension_numbers = #tpu.dot_dimension_numbers<[1], [0], [0], [1], [0, 0, 1, 1], [], []>} : vector<8x8xf32>, vector<8x32xf32>, vector<8x32xf32> -> vector<8x32xf32>
    %67 = arith.addf %61, %66 : vector<8x32xf32>
    %68 = vector.extract_strided_slice %48 {offsets = [3, 0, 0], sizes = [1, 8, 8], strides = [1, 1, 1]} : vector<4x8x8xf32> to vector<1x8x8xf32>
    %69 = vector.shape_cast %68 : vector<1x8x8xf32> to vector<8x8xf32>
    %c3 = arith.constant 3 : index
    %c0_41 = arith.constant 0 : index
    %c0_42 = arith.constant 0 : index
    %70 = vector.load %arg9[%c3, %c0_41, %c0_42] : memref<4x8x32xf32, #tpu.memory_space<vmem>>, vector<1x8x32xf32>
    %71 = vector.shape_cast %70 : vector<1x8x32xf32> to vector<8x32xf32>
    %cst_43 = arith.constant dense<0.000000e+00> : vector<8x32xf32>
    %72 = tpu.matmul %69, %71, %cst_43 {dimension_numbers = #tpu.dot_dimension_numbers<[1], [0], [0], [1], [0, 0, 1, 1], [], []>} : vector<8x8xf32>, vector<8x32xf32>, vector<8x32xf32> -> vector<8x32xf32>
    %73 = arith.addf %67, %72 : vector<8x32xf32>
    %74 = arith.addf %1, %73 : vector<8x32xf32>
    %c0_44 = arith.constant 0 : index
    %c0_45 = arith.constant 0 : index
    %c0_46 = arith.constant 0 : index
    %75 = vector.load %arg10[%c0_44, %c0_45, %c0_46] : memref<1x8x32xf32, #tpu.memory_space<vmem>>, vector<1x8x32xf32>
    %76 = vector.shape_cast %75 : vector<1x8x32xf32> to vector<8x32xf32>
    %77 = vector.shape_cast %74 : vector<8x32xf32> to vector<1x8x32xf32>
    tpu.vector_store %arg10[%c0_44, %c0_45, %c0_46], %77 {strides = array<i32>} : memref<1x8x32xf32, #tpu.memory_space<vmem>>, vector<1x8x32xf32>,
    return
  }
  func.func @transform_0(%arg0: i32, %arg1: i32) -> (i32, i32, i32) {
    %c0_i32 = arith.constant 0 : i32
    %c0_i32_0 = arith.constant 0 : i32
    return %arg0, %arg1, %c0_i32 : i32, i32, i32
  }
  func.func @transform_1(%arg0: i32, %arg1: i32) -> (i32, i32, i32) {
    %c0_i32 = arith.constant 0 : i32
    %c0_i32_0 = arith.constant 0 : i32
    %c0_i32_1 = arith.constant 0 : i32
    return %arg0, %c0_i32, %c0_i32_0 : i32, i32, i32
  }
  func.func @transform_2(%arg0: i32, %arg1: i32) -> (i32, i32, i32, i32) {
    %c0_i32 = arith.constant 0 : i32
    %c0_i32_0 = arith.constant 0 : i32
    %c0_i32_1 = arith.constant 0 : i32
    %c0_i32_2 = arith.constant 0 : i32
    return %c0_i32, %c0_i32_0, %arg1, %c0_i32_1 : i32, i32, i32, i32
  }
  func.func @transform_3(%arg0: i32, %arg1: i32) -> (i32, i32) {
    %c0_i32 = arith.constant 0 : i32
    %c0_i32_0 = arith.constant 0 : i32
    %c0_i32_1 = arith.constant 0 : i32
    return %c0_i32, %c0_i32_0 : i32, i32
  }
  func.func @transform_4(%arg0: i32, %arg1: i32) -> (i32, i32) {
    %c0_i32 = arith.constant 0 : i32
    %c0_i32_0 = arith.constant 0 : i32
    %c0_i32_1 = arith.constant 0 : i32
    return %c0_i32, %c0_i32_0 : i32, i32
  }
  func.func @transform_5(%arg0: i32, %arg1: i32) -> (i32, i32) {
    %c0_i32 = arith.constant 0 : i32
    %c0_i32_0 = arith.constant 0 : i32
    %c0_i32_1 = arith.constant 0 : i32
    return %c0_i32, %c0_i32_0 : i32, i32
  }
  func.func @transform_6(%arg0: i32, %arg1: i32) -> (i32, i32) {
    %c0_i32 = arith.constant 0 : i32
    %c0_i32_0 = arith.constant 0 : i32
    %c0_i32_1 = arith.constant 0 : i32
    return %c0_i32, %c0_i32_0 : i32, i32
  }
  func.func @transform_7(%arg0: i32, %arg1: i32) -> (i32, i32, i32) {
    %c0_i32 = arith.constant 0 : i32
    %c0_i32_0 = arith.constant 0 : i32
    %c0_i32_1 = arith.constant 0 : i32
    %c0_i32_2 = arith.constant 0 : i32
    return %c0_i32, %c0_i32_0, %c0_i32_1 : i32, i32, i32
  }
  func.func @transform_8(%arg0: i32, %arg1: i32) -> (i32, i32, i32) {
    %c0_i32 = arith.constant 0 : i32
    %c0_i32_0 = arith.constant 0 : i32
    return %arg0, %arg1, %c0_i32 : i32, i32, i32
  }
  func.func @transform_9(%arg0: i32, %arg1: i32) -> (i32, i32, i32, i32) {
    %c0_i32 = arith.constant 0 : i32
    %c0_i32_0 = arith.constant 0 : i32
    %c0_i32_1 = arith.constant 0 : i32
    return %arg0, %c0_i32, %arg1, %c0_i32_0 : i32, i32, i32, i32
  }
}

module attributes {stable_mosaic.version = 11 : i64} {
  func.func @_cross_attn_kernel_batched(%arg0: i32, %arg1: i32, %arg2: memref<1x8x32xf32, #tpu.memory_space<vmem>>, %arg3: memref<1x16x32xf32, #tpu.memory_space<vmem>>, %arg4: memref<1x4x8x16xf32, #tpu.memory_space<vmem>>, %arg5: memref<1x32xf32, #tpu.memory_space<vmem>>, %arg6: memref<32x32xf32, #tpu.memory_space<vmem>>, %arg7: memref<32x32xf32, #tpu.memory_space<vmem>>, %arg8: memref<32x32xf32, #tpu.memory_space<vmem>>, %arg9: memref<4x8x32xf32, #tpu.memory_space<vmem>>, %arg10: memref<1x8x32xf32, #tpu.memory_space<vmem>>, %arg11: memref<1x4x8x16xf32, #tpu.memory_space<vmem>>) attributes {dimension_semantics = [#tpu.dimension_semantics<parallel>, #tpu.dimension_semantics<parallel>], iteration_bounds = array<i64: 2, 1>, scalar_prefetch = 0 : i64, scratch_operands = 0 : i64, tpu.core_type = #tpu.core_type<tc>, window_params = [{transform_indices = @transform_0, window_bounds = array<i64: 1, 8, 32>}, {transform_indices = @transform_1, window_bounds = array<i64: 1, 16, 32>}, {transform_indices = @transform_2, window_bounds = array<i64: 1, 4, 8, 16>}, {pipeline_mode = #tpu.pipeline_mode<synchronous>, transform_indices = @transform_3, window_bounds = array<i64: 1, 32>}, {pipeline_mode = #tpu.pipeline_mode<synchronous>, transform_indices = @transform_4, window_bounds = array<i64: 32, 32>}, {pipeline_mode = #tpu.pipeline_mode<synchronous>, transform_indices = @transform_5, window_bounds = array<i64: 32, 32>}, {pipeline_mode = #tpu.pipeline_mode<synchronous>, transform_indices = @transform_6, window_bounds = array<i64: 32, 32>}, {pipeline_mode = #tpu.pipeline_mode<synchronous>, transform_indices = @transform_7, window_bounds = array<i64: 4, 8, 32>}, {transform_indices = @transform_8, window_bounds = array<i64: 1, 8, 32>}, {transform_indices = @transform_9, window_bounds = array<i64: 1, 4, 8, 16>}]} {
    %c0 = arith.constant 0 : index
    %c0_0 = arith.constant 0 : index
    %c0_1 = arith.constant 0 : index
    %0 = vector.load %arg2[%c0, %c0_0, %c0_1] : memref<1x8x32xf32, #tpu.memory_space<vmem>>, vector<1x8x32xf32>
    %1 = vector.shape_cast %0 : vector<1x8x32xf32> to vector<8x32xf32>
    %2 = arith.mulf %1, %1 : vector<8x32xf32>
    %cst = arith.constant dense<0.000000e+00> : vector<8xf32>
    %3 = vector.multi_reduction <add>, %2, %cst [1] : vector<8x32xf32> to vector<8xf32>
    %4 = vector.shape_cast %3 : vector<8xf32> to vector<8x1xf32>
    %cst_2 = arith.constant 3.200000e+01 : f32
    %5 = vector.broadcast %cst_2 : f32 to vector<8x1xf32>
    %6 = arith.divf %4, %5 : vector<8x1xf32>
    %cst_3 = arith.constant 9.99999997E-7 : f32
    %7 = vector.broadcast %cst_3 : f32 to vector<8x1xf32>
    %8 = arith.addf %6, %7 : vector<8x1xf32>
    %9 = math.rsqrt %8 : vector<8x1xf32>
    %10 = vector.broadcast %9 : vector<8x1xf32> to vector<8x32xf32>
    %11 = arith.mulf %1, %10 : vector<8x32xf32>
    %c0_4 = arith.constant 0 : index
    %c0_5 = arith.constant 0 : index
    %12 = vector.load %arg5[%c0_4, %c0_5] : memref<1x32xf32, #tpu.memory_space<vmem>>, vector<1x32xf32>
    %13 = vector.shape_cast %12 : vector<1x32xf32> to vector<32xf32>
    %14 = vector.shape_cast %13 : vector<32xf32> to vector<1x32xf32>
    %15 = vector.broadcast %14 : vector<1x32xf32> to vector<8x32xf32>
    %16 = arith.mulf %11, %15 : vector<8x32xf32>
    %c0_6 = arith.constant 0 : index
    %c0_7 = arith.constant 0 : index
    %c0_8 = arith.constant 0 : index
    %17 = vector.load %arg3[%c0_6, %c0_7, %c0_8] : memref<1x16x32xf32, #tpu.memory_space<vmem>>, vector<1x16x32xf32>
    %18 = vector.shape_cast %17 : vector<1x16x32xf32> to vector<16x32xf32>
    %c0_9 = arith.constant 0 : index
    %c0_10 = arith.constant 0 : index
    %19 = vector.load %arg6[%c0_9, %c0_10] : memref<32x32xf32, #tpu.memory_space<vmem>>, vector<32x32xf32>
    %cst_11 = arith.constant dense<0.000000e+00> : vector<8x32xf32>
    %20 = tpu.matmul %16, %19, %cst_11 {dimension_numbers = #tpu.dot_dimension_numbers<[1], [0], [0], [1], [0, 0, 1, 1], [], []>} : vector<8x32xf32>, vector<32x32xf32>, vector<8x32xf32> -> vector<8x32xf32>
    %c0_12 = arith.constant 0 : index
    %c0_13 = arith.constant 0 : index
    %21 = vector.load %arg7[%c0_12, %c0_13] : memref<32x32xf32, #tpu.memory_space<vmem>>, vector<32x32xf32>
    %cst_14 = arith.constant dense<0.000000e+00> : vector<16x32xf32>
    %22 = tpu.matmul %18, %21, %cst_14 {dimension_numbers = #tpu.dot_dimension_numbers<[1], [0], [0], [1], [0, 0, 1, 1], [], []>} : vector<16x32xf32>, vector<32x32xf32>, vector<16x32xf32> -> vector<16x32xf32>
    %c0_15 = arith.constant 0 : index
    %c0_16 = arith.constant 0 : index
    %23 = vector.load %arg8[%c0_15, %c0_16] : memref<32x32xf32, #tpu.memory_space<vmem>>, vector<32x32xf32>
    %cst_17 = arith.constant dense<0.000000e+00> : vector<16x32xf32>
    %24 = tpu.matmul %18, %23, %cst_17 {dimension_numbers = #tpu.dot_dimension_numbers<[1], [0], [0], [1], [0, 0, 1, 1], [], []>} : vector<16x32xf32>, vector<32x32xf32>, vector<16x32xf32> -> vector<16x32xf32>
    %25 = vector.shape_cast %20 : vector<8x32xf32> to vector<8x4x8xf32>
    %26 = tpu.transpose %25, [1, 0, 2] : vector<8x4x8xf32> -> vector<4x8x8xf32>
    %27 = vector.shape_cast %22 : vector<16x32xf32> to vector<16x4x8xf32>
    %28 = tpu.transpose %27, [1, 0, 2] : vector<16x4x8xf32> -> vector<4x16x8xf32>
    %29 = vector.shape_cast %24 : vector<16x32xf32> to vector<16x4x8xf32>
    %30 = tpu.transpose %29, [1, 0, 2] : vector<16x4x8xf32> -> vector<4x16x8xf32>
    "tpu.trace_start"() <{level = 10 : i32, message = "hqd,hkd->hqk"}> : () -> ()
    %cst_18 = arith.constant dense<0.000000e+00> : vector<4x8x16xf32>
    %31 = tpu.matmul %26, %28, %cst_18 {dimension_numbers = #tpu.dot_dimension_numbers<[2], [2], [1], [1], [0, 0, 0, 1, 1, 1], [0], [0]>} : vector<4x8x8xf32>, vector<4x16x8xf32>, vector<4x8x16xf32> -> vector<4x8x16xf32>
    "tpu.trace_stop"() : () -> ()
    %c0_19 = arith.constant 0 : index
    %c0_20 = arith.constant 0 : index
    %c0_21 = arith.constant 0 : index
    %c0_22 = arith.constant 0 : index
    %32 = vector.load %arg4[%c0_19, %c0_20, %c0_21, %c0_22] : memref<1x4x8x16xf32, #tpu.memory_space<vmem>>, vector<1x4x8x16xf32>
    %33 = vector.shape_cast %32 : vector<1x4x8x16xf32> to vector<4x8x16xf32>
    %34 = arith.addf %31, %33 : vector<4x8x16xf32>
    %c0_23 = arith.constant 0 : index
    %c0_24 = arith.constant 0 : index
    %c0_25 = arith.constant 0 : index
    %c0_26 = arith.constant 0 : index
    %35 = vector.load %arg11[%c0_23, %c0_24, %c0_25, %c0_26] : memref<1x4x8x16xf32, #tpu.memory_space<vmem>>, vector<1x4x8x16xf32>
    %36 = vector.shape_cast %35 : vector<1x4x8x16xf32> to vector<4x8x16xf32>
    %37 = vector.shape_cast %34 : vector<4x8x16xf32> to vector<1x4x8x16xf32>
    tpu.vector_store %arg11[%c0_23, %c0_24, %c0_25, %c0_26], %37 {strides = array<i32>} : memref<1x4x8x16xf32, #tpu.memory_space<vmem>>, vector<1x4x8x16xf32>,
    %cst_27 = arith.constant dense<0xFF800000> : vector<4x8xf32>
    %38 = vector.multi_reduction <maximumf>, %34, %cst_27 [2] : vector<4x8x16xf32> to vector<4x8xf32>
    %39 = vector.shape_cast %38 : vector<4x8xf32> to vector<4x8x1xf32>
    %40 = vector.broadcast %39 : vector<4x8x1xf32> to vector<4x8x16xf32>
    %41 = arith.subf %34, %40 : vector<4x8x16xf32>
    %42 = math.exp %41 : vector<4x8x16xf32>
    %cst_28 = arith.constant dense<0.000000e+00> : vector<4x8xf32>
    %43 = vector.multi_reduction <add>, %42, %cst_28 [2] : vector<4x8x16xf32> to vector<4x8xf32>
    %44 = vector.shape_cast %43 : vector<4x8xf32> to vector<4x8x1xf32>
    %45 = tpu.reciprocal %44 {approx = true} : vector<4x8x1xf32> -> vector<4x8x1xf32>
    %46 = vector.broadcast %45 : vector<4x8x1xf32> to vector<4x8x16xf32>
    %47 = arith.mulf %42, %46 : vector<4x8x16xf32>
    "tpu.trace_start"() <{level = 10 : i32, message = "hqk,hkd->hqd"}> : () -> ()
    %cst_29 = arith.constant dense<0.000000e+00> : vector<4x8x8xf32>
    %48 = tpu.matmul %47, %30, %cst_29 {dimension_numbers = #tpu.dot_dimension_numbers<[2], [1], [1], [2], [0, 0, 0, 1, 1, 2], [0], [0]>} : vector<4x8x16xf32>, vector<4x16x8xf32>, vector<4x8x8xf32> -> vector<4x8x8xf32>
    %cst_30 = arith.constant 0.000000e+00 : f32
    "tpu.trace_stop"() : () -> ()
    %49 = vector.broadcast %cst_30 : f32 to vector<8x32xf32>
    %50 = vector.extract_strided_slice %48 {offsets = [0, 0, 0], sizes = [1, 8, 8], strides = [1, 1, 1]} : vector<4x8x8xf32> to vector<1x8x8xf32>
    %51 = vector.shape_cast %50 : vector<1x8x8xf32> to vector<8x8xf32>
    %c0_31 = arith.constant 0 : index
    %c0_32 = arith.constant 0 : index
    %c0_33 = arith.constant 0 : index
    %52 = vector.load %arg9[%c0_31, %c0_32, %c0_33] : memref<4x8x32xf32, #tpu.memory_space<vmem>>, vector<1x8x32xf32>
    %53 = vector.shape_cast %52 : vector<1x8x32xf32> to vector<8x32xf32>
    %cst_34 = arith.constant dense<0.000000e+00> : vector<8x32xf32>
    %54 = tpu.matmul %51, %53, %cst_34 {dimension_numbers = #tpu.dot_dimension_numbers<[1], [0], [0], [1], [0, 0, 1, 1], [], []>} : vector<8x8xf32>, vector<8x32xf32>, vector<8x32xf32> -> vector<8x32xf32>
    %55 = arith.addf %49, %54 : vector<8x32xf32>
    %56 = vector.extract_strided_slice %48 {offsets = [1, 0, 0], sizes = [1, 8, 8], strides = [1, 1, 1]} : vector<4x8x8xf32> to vector<1x8x8xf32>
    %57 = vector.shape_cast %56 : vector<1x8x8xf32> to vector<8x8xf32>
    %c1 = arith.constant 1 : index
    %c0_35 = arith.constant 0 : index
    %c0_36 = arith.constant 0 : index
    %58 = vector.load %arg9[%c1, %c0_35, %c0_36] : memref<4x8x32xf32, #tpu.memory_space<vmem>>, vector<1x8x32xf32>
    %59 = vector.shape_cast %58 : vector<1x8x32xf32> to vector<8x32xf32>
    %cst_37 = arith.constant dense<0.000000e+00> : vector<8x32xf32>
    %60 = tpu.matmul %57, %59, %cst_37 {dimension_numbers = #tpu.dot_dimension_numbers<[1], [0], [0], [1], [0, 0, 1, 1], [], []>} : vector<8x8xf32>, vector<8x32xf32>, vector<8x32xf32> -> vector<8x32xf32>
    %61 = arith.addf %55, %60 : vector<8x32xf32>
    %62 = vector.extract_strided_slice %48 {offsets = [2, 0, 0], sizes = [1, 8, 8], strides = [1, 1, 1]} : vector<4x8x8xf32> to vector<1x8x8xf32>
    %63 = vector.shape_cast %62 : vector<1x8x8xf32> to vector<8x8xf32>
    %c2 = arith.constant 2 : index
    %c0_38 = arith.constant 0 : index
    %c0_39 = arith.constant 0 : index
    %64 = vector.load %arg9[%c2, %c0_38, %c0_39] : memref<4x8x32xf32, #tpu.memory_space<vmem>>, vector<1x8x32xf32>
    %65 = vector.shape_cast %64 : vector<1x8x32xf32> to vector<8x32xf32>
    %cst_40 = arith.constant dense<0.000000e+00> : vector<8x32xf32>
    %66 = tpu.matmul %63, %65, %cst_40 {dimension_numbers = #tpu.dot_dimension_numbers<[1], [0], [0], [1], [0, 0, 1, 1], [], []>} : vector<8x8xf32>, vector<8x32xf32>, vector<8x32xf32> -> vector<8x32xf32>
    %67 = arith.addf %61, %66 : vector<8x32xf32>
    %68 = vector.extract_strided_slice %48 {offsets = [3, 0, 0], sizes = [1, 8, 8], strides = [1, 1, 1]} : vector<4x8x8xf32> to vector<1x8x8xf32>
    %69 = vector.shape_cast %68 : vector<1x8x8xf32> to vector<8x8xf32>
    %c3 = arith.constant 3 : index
    %c0_41 = arith.constant 0 : index
    %c0_42 = arith.constant 0 : index
    %70 = vector.load %arg9[%c3, %c0_41, %c0_42] : memref<4x8x32xf32, #tpu.memory_space<vmem>>, vector<1x8x32xf32>
    %71 = vector.shape_cast %70 : vector<1x8x32xf32> to vector<8x32xf32>
    %cst_43 = arith.constant dense<0.000000e+00> : vector<8x32xf32>
    %72 = tpu.matmul %69, %71, %cst_43 {dimension_numbers = #tpu.dot_dimension_numbers<[1], [0], [0], [1], [0, 0, 1, 1], [], []>} : vector<8x8xf32>, vector<8x32xf32>, vector<8x32xf32> -> vector<8x32xf32>
    %73 = arith.addf %67, %72 : vector<8x32xf32>
    %74 = arith.addf %1, %73 : vector<8x32xf32>
    %c0_44 = arith.constant 0 : index
    %c0_45 = arith.constant 0 : index
    %c0_46 = arith.constant 0 : index
    %75 = vector.load %arg10[%c0_44, %c0_45, %c0_46] : memref<1x8x32xf32, #tpu.memory_space<vmem>>, vector<1x8x32xf32>
    %76 = vector.shape_cast %75 : vector<1x8x32xf32> to vector<8x32xf32>
    %77 = vector.shape_cast %74 : vector<8x32xf32> to vector<1x8x32xf32>
    tpu.vector_store %arg10[%c0_44, %c0_45, %c0_46], %77 {strides = array<i32>} : memref<1x8x32xf32, #tpu.memory_space<vmem>>, vector<1x8x32xf32>,
    return
  }
  func.func @transform_0(%arg0: i32, %arg1: i32) -> (i32, i32, i32) {
    %c0_i32 = arith.constant 0 : i32
    %c0_i32_0 = arith.constant 0 : i32
    return %arg0, %arg1, %c0_i32 : i32, i32, i32
  }
  func.func @transform_1(%arg0: i32, %arg1: i32) -> (i32, i32, i32) {
    %c0_i32 = arith.constant 0 : i32
    %c0_i32_0 = arith.constant 0 : i32
    %c0_i32_1 = arith.constant 0 : i32
    return %arg0, %c0_i32, %c0_i32_0 : i32, i32, i32
  }
  func.func @transform_2(%arg0: i32, %arg1: i32) -> (i32, i32, i32, i32) {
    %c0_i32 = arith.constant 0 : i32
    %c0_i32_0 = arith.constant 0 : i32
    %c0_i32_1 = arith.constant 0 : i32
    %c0_i32_2 = arith.constant 0 : i32
    return %c0_i32, %c0_i32_0, %arg1, %c0_i32_1 : i32, i32, i32, i32
  }
  func.func @transform_3(%arg0: i32, %arg1: i32) -> (i32, i32) {
    %c0_i32 = arith.constant 0 : i32
    %c0_i32_0 = arith.constant 0 : i32
    %c0_i32_1 = arith.constant 0 : i32
    return %c0_i32, %c0_i32_0 : i32, i32
  }
  func.func @transform_4(%arg0: i32, %arg1: i32) -> (i32, i32) {
    %c0_i32 = arith.constant 0 : i32
    %c0_i32_0 = arith.constant 0 : i32
    %c0_i32_1 = arith.constant 0 : i32
    return %c0_i32, %c0_i32_0 : i32, i32
  }
  func.func @transform_5(%arg0: i32, %arg1: i32) -> (i32, i32) {
    %c0_i32 = arith.constant 0 : i32
    %c0_i32_0 = arith.constant 0 : i32
    %c0_i32_1 = arith.constant 0 : i32
    return %c0_i32, %c0_i32_0 : i32, i32
  }
  func.func @transform_6(%arg0: i32, %arg1: i32) -> (i32, i32) {
    %c0_i32 = arith.constant 0 : i32
    %c0_i32_0 = arith.constant 0 : i32
    %c0_i32_1 = arith.constant 0 : i32
    return %c0_i32, %c0_i32_0 : i32, i32
  }
  func.func @transform_7(%arg0: i32, %arg1: i32) -> (i32, i32, i32) {
    %c0_i32 = arith.constant 0 : i32
    %c0_i32_0 = arith.constant 0 : i32
    %c0_i32_1 = arith.constant 0 : i32
    %c0_i32_2 = arith.constant 0 : i32
    return %c0_i32, %c0_i32_0, %c0_i32_1 : i32, i32, i32
  }
  func.func @transform_8(%arg0: i32, %arg1: i32) -> (i32, i32, i32) {
    %c0_i32 = arith.constant 0 : i32
    %c0_i32_0 = arith.constant 0 : i32
    return %arg0, %arg1, %c0_i32 : i32, i32, i32
  }
  func.func @transform_9(%arg0: i32, %arg1: i32) -> (i32, i32, i32, i32) {
    %c0_i32 = arith.constant 0 : i32
    %c0_i32_0 = arith.constant 0 : i32
    %c0_i32_1 = arith.constant 0 : i32
    return %arg0, %c0_i32, %arg1, %c0_i32_0 : i32, i32, i32, i32
  }
}

module attributes {stable_mosaic.version = 11 : i64} {
  func.func @_cross_attn_kernel_batched(%arg0: i32, %arg1: i32, %arg2: memref<1x8x32xf32, #tpu.memory_space<vmem>>, %arg3: memref<1x16x32xf32, #tpu.memory_space<vmem>>, %arg4: memref<1x4x8x16xf32, #tpu.memory_space<vmem>>, %arg5: memref<1x32xf32, #tpu.memory_space<vmem>>, %arg6: memref<32x32xf32, #tpu.memory_space<vmem>>, %arg7: memref<32x32xf32, #tpu.memory_space<vmem>>, %arg8: memref<32x32xf32, #tpu.memory_space<vmem>>, %arg9: memref<4x8x32xf32, #tpu.memory_space<vmem>>, %arg10: memref<1x8x32xf32, #tpu.memory_space<vmem>>, %arg11: memref<1x4x8x16xf32, #tpu.memory_space<vmem>>) attributes {dimension_semantics = [#tpu.dimension_semantics<parallel>, #tpu.dimension_semantics<parallel>], iteration_bounds = array<i64: 2, 1>, scalar_prefetch = 0 : i64, scratch_operands = 0 : i64, tpu.core_type = #tpu.core_type<tc>, window_params = [{transform_indices = @transform_0, window_bounds = array<i64: 1, 8, 32>}, {transform_indices = @transform_1, window_bounds = array<i64: 1, 16, 32>}, {transform_indices = @transform_2, window_bounds = array<i64: 1, 4, 8, 16>}, {pipeline_mode = #tpu.pipeline_mode<synchronous>, transform_indices = @transform_3, window_bounds = array<i64: 1, 32>}, {pipeline_mode = #tpu.pipeline_mode<synchronous>, transform_indices = @transform_4, window_bounds = array<i64: 32, 32>}, {pipeline_mode = #tpu.pipeline_mode<synchronous>, transform_indices = @transform_5, window_bounds = array<i64: 32, 32>}, {pipeline_mode = #tpu.pipeline_mode<synchronous>, transform_indices = @transform_6, window_bounds = array<i64: 32, 32>}, {pipeline_mode = #tpu.pipeline_mode<synchronous>, transform_indices = @transform_7, window_bounds = array<i64: 4, 8, 32>}, {transform_indices = @transform_8, window_bounds = array<i64: 1, 8, 32>}, {transform_indices = @transform_9, window_bounds = array<i64: 1, 4, 8, 16>}]} {
    %c0 = arith.constant 0 : index
    %c0_0 = arith.constant 0 : index
    %c0_1 = arith.constant 0 : index
    %0 = vector.load %arg2[%c0, %c0_0, %c0_1] : memref<1x8x32xf32, #tpu.memory_space<vmem>>, vector<1x8x32xf32>
    %1 = vector.shape_cast %0 : vector<1x8x32xf32> to vector<8x32xf32>
    %2 = arith.mulf %1, %1 : vector<8x32xf32>
    %cst = arith.constant dense<0.000000e+00> : vector<8xf32>
    %3 = vector.multi_reduction <add>, %2, %cst [1] : vector<8x32xf32> to vector<8xf32>
    %4 = vector.shape_cast %3 : vector<8xf32> to vector<8x1xf32>
    %cst_2 = arith.constant 3.200000e+01 : f32
    %5 = vector.broadcast %cst_2 : f32 to vector<8x1xf32>
    %6 = arith.divf %4, %5 : vector<8x1xf32>
    %cst_3 = arith.constant 9.99999997E-7 : f32
    %7 = vector.broadcast %cst_3 : f32 to vector<8x1xf32>
    %8 = arith.addf %6, %7 : vector<8x1xf32>
    %9 = math.rsqrt %8 : vector<8x1xf32>
    %10 = vector.broadcast %9 : vector<8x1xf32> to vector<8x32xf32>
    %11 = arith.mulf %1, %10 : vector<8x32xf32>
    %c0_4 = arith.constant 0 : index
    %c0_5 = arith.constant 0 : index
    %12 = vector.load %arg5[%c0_4, %c0_5] : memref<1x32xf32, #tpu.memory_space<vmem>>, vector<1x32xf32>
    %13 = vector.shape_cast %12 : vector<1x32xf32> to vector<32xf32>
    %14 = vector.shape_cast %13 : vector<32xf32> to vector<1x32xf32>
    %15 = vector.broadcast %14 : vector<1x32xf32> to vector<8x32xf32>
    %16 = arith.mulf %11, %15 : vector<8x32xf32>
    %c0_6 = arith.constant 0 : index
    %c0_7 = arith.constant 0 : index
    %c0_8 = arith.constant 0 : index
    %17 = vector.load %arg3[%c0_6, %c0_7, %c0_8] : memref<1x16x32xf32, #tpu.memory_space<vmem>>, vector<1x16x32xf32>
    %18 = vector.shape_cast %17 : vector<1x16x32xf32> to vector<16x32xf32>
    %c0_9 = arith.constant 0 : index
    %c0_10 = arith.constant 0 : index
    %19 = vector.load %arg6[%c0_9, %c0_10] : memref<32x32xf32, #tpu.memory_space<vmem>>, vector<32x32xf32>
    %cst_11 = arith.constant dense<0.000000e+00> : vector<8x32xf32>
    %20 = tpu.matmul %16, %19, %cst_11 {dimension_numbers = #tpu.dot_dimension_numbers<[1], [0], [0], [1], [0, 0, 1, 1], [], []>} : vector<8x32xf32>, vector<32x32xf32>, vector<8x32xf32> -> vector<8x32xf32>
    %c0_12 = arith.constant 0 : index
    %c0_13 = arith.constant 0 : index
    %21 = vector.load %arg7[%c0_12, %c0_13] : memref<32x32xf32, #tpu.memory_space<vmem>>, vector<32x32xf32>
    %cst_14 = arith.constant dense<0.000000e+00> : vector<16x32xf32>
    %22 = tpu.matmul %18, %21, %cst_14 {dimension_numbers = #tpu.dot_dimension_numbers<[1], [0], [0], [1], [0, 0, 1, 1], [], []>} : vector<16x32xf32>, vector<32x32xf32>, vector<16x32xf32> -> vector<16x32xf32>
    %c0_15 = arith.constant 0 : index
    %c0_16 = arith.constant 0 : index
    %23 = vector.load %arg8[%c0_15, %c0_16] : memref<32x32xf32, #tpu.memory_space<vmem>>, vector<32x32xf32>
    %cst_17 = arith.constant dense<0.000000e+00> : vector<16x32xf32>
    %24 = tpu.matmul %18, %23, %cst_17 {dimension_numbers = #tpu.dot_dimension_numbers<[1], [0], [0], [1], [0, 0, 1, 1], [], []>} : vector<16x32xf32>, vector<32x32xf32>, vector<16x32xf32> -> vector<16x32xf32>
    %25 = vector.shape_cast %20 : vector<8x32xf32> to vector<8x4x8xf32>
    %26 = tpu.transpose %25, [1, 0, 2] : vector<8x4x8xf32> -> vector<4x8x8xf32>
    %27 = vector.shape_cast %22 : vector<16x32xf32> to vector<16x4x8xf32>
    %28 = tpu.transpose %27, [1, 0, 2] : vector<16x4x8xf32> -> vector<4x16x8xf32>
    %29 = vector.shape_cast %24 : vector<16x32xf32> to vector<16x4x8xf32>
    %30 = tpu.transpose %29, [1, 0, 2] : vector<16x4x8xf32> -> vector<4x16x8xf32>
    "tpu.trace_start"() <{level = 10 : i32, message = "hqd,hkd->hqk"}> : () -> ()
    %cst_18 = arith.constant dense<0.000000e+00> : vector<4x8x16xf32>
    %31 = tpu.matmul %26, %28, %cst_18 {dimension_numbers = #tpu.dot_dimension_numbers<[2], [2], [1], [1], [0, 0, 0, 1, 1, 1], [0], [0]>} : vector<4x8x8xf32>, vector<4x16x8xf32>, vector<4x8x16xf32> -> vector<4x8x16xf32>
    "tpu.trace_stop"() : () -> ()
    %c0_19 = arith.constant 0 : index
    %c0_20 = arith.constant 0 : index
    %c0_21 = arith.constant 0 : index
    %c0_22 = arith.constant 0 : index
    %32 = vector.load %arg4[%c0_19, %c0_20, %c0_21, %c0_22] : memref<1x4x8x16xf32, #tpu.memory_space<vmem>>, vector<1x4x8x16xf32>
    %33 = vector.shape_cast %32 : vector<1x4x8x16xf32> to vector<4x8x16xf32>
    %34 = arith.addf %31, %33 : vector<4x8x16xf32>
    %c0_23 = arith.constant 0 : index
    %c0_24 = arith.constant 0 : index
    %c0_25 = arith.constant 0 : index
    %c0_26 = arith.constant 0 : index
    %35 = vector.load %arg11[%c0_23, %c0_24, %c0_25, %c0_26] : memref<1x4x8x16xf32, #tpu.memory_space<vmem>>, vector<1x4x8x16xf32>
    %36 = vector.shape_cast %35 : vector<1x4x8x16xf32> to vector<4x8x16xf32>
    %37 = vector.shape_cast %34 : vector<4x8x16xf32> to vector<1x4x8x16xf32>
    tpu.vector_store %arg11[%c0_23, %c0_24, %c0_25, %c0_26], %37 {strides = array<i32>} : memref<1x4x8x16xf32, #tpu.memory_space<vmem>>, vector<1x4x8x16xf32>,
    %cst_27 = arith.constant dense<0xFF800000> : vector<4x8xf32>
    %38 = vector.multi_reduction <maximumf>, %34, %cst_27 [2] : vector<4x8x16xf32> to vector<4x8xf32>
    %39 = vector.shape_cast %38 : vector<4x8xf32> to vector<4x8x1xf32>
    %40 = vector.broadcast %39 : vector<4x8x1xf32> to vector<4x8x16xf32>
    %41 = arith.subf %34, %40 : vector<4x8x16xf32>
    %42 = math.exp %41 : vector<4x8x16xf32>
    %cst_28 = arith.constant dense<0.000000e+00> : vector<4x8xf32>
    %43 = vector.multi_reduction <add>, %42, %cst_28 [2] : vector<4x8x16xf32> to vector<4x8xf32>
    %44 = vector.shape_cast %43 : vector<4x8xf32> to vector<4x8x1xf32>
    %45 = tpu.reciprocal %44 {approx = true} : vector<4x8x1xf32> -> vector<4x8x1xf32>
    %46 = vector.broadcast %45 : vector<4x8x1xf32> to vector<4x8x16xf32>
    %47 = arith.mulf %42, %46 : vector<4x8x16xf32>
    "tpu.trace_start"() <{level = 10 : i32, message = "hqk,hkd->hqd"}> : () -> ()
    %cst_29 = arith.constant dense<0.000000e+00> : vector<4x8x8xf32>
    %48 = tpu.matmul %47, %30, %cst_29 {dimension_numbers = #tpu.dot_dimension_numbers<[2], [1], [1], [2], [0, 0, 0, 1, 1, 2], [0], [0]>} : vector<4x8x16xf32>, vector<4x16x8xf32>, vector<4x8x8xf32> -> vector<4x8x8xf32>
    %cst_30 = arith.constant 0.000000e+00 : f32
    "tpu.trace_stop"() : () -> ()
    %49 = vector.broadcast %cst_30 : f32 to vector<8x32xf32>
    %50 = vector.extract_strided_slice %48 {offsets = [0, 0, 0], sizes = [1, 8, 8], strides = [1, 1, 1]} : vector<4x8x8xf32> to vector<1x8x8xf32>
    %51 = vector.shape_cast %50 : vector<1x8x8xf32> to vector<8x8xf32>
    %c0_31 = arith.constant 0 : index
    %c0_32 = arith.constant 0 : index
    %c0_33 = arith.constant 0 : index
    %52 = vector.load %arg9[%c0_31, %c0_32, %c0_33] : memref<4x8x32xf32, #tpu.memory_space<vmem>>, vector<1x8x32xf32>
    %53 = vector.shape_cast %52 : vector<1x8x32xf32> to vector<8x32xf32>
    %cst_34 = arith.constant dense<0.000000e+00> : vector<8x32xf32>
    %54 = tpu.matmul %51, %53, %cst_34 {dimension_numbers = #tpu.dot_dimension_numbers<[1], [0], [0], [1], [0, 0, 1, 1], [], []>} : vector<8x8xf32>, vector<8x32xf32>, vector<8x32xf32> -> vector<8x32xf32>
    %55 = arith.addf %49, %54 : vector<8x32xf32>
    %56 = vector.extract_strided_slice %48 {offsets = [1, 0, 0], sizes = [1, 8, 8], strides = [1, 1, 1]} : vector<4x8x8xf32> to vector<1x8x8xf32>
    %57 = vector.shape_cast %56 : vector<1x8x8xf32> to vector<8x8xf32>
    %c1 = arith.constant 1 : index
    %c0_35 = arith.constant 0 : index
    %c0_36 = arith.constant 0 : index
    %58 = vector.load %arg9[%c1, %c0_35, %c0_36] : memref<4x8x32xf32, #tpu.memory_space<vmem>>, vector<1x8x32xf32>
    %59 = vector.shape_cast %58 : vector<1x8x32xf32> to vector<8x32xf32>
    %cst_37 = arith.constant dense<0.000000e+00> : vector<8x32xf32>
    %60 = tpu.matmul %57, %59, %cst_37 {dimension_numbers = #tpu.dot_dimension_numbers<[1], [0], [0], [1], [0, 0, 1, 1], [], []>} : vector<8x8xf32>, vector<8x32xf32>, vector<8x32xf32> -> vector<8x32xf32>
    %61 = arith.addf %55, %60 : vector<8x32xf32>
    %62 = vector.extract_strided_slice %48 {offsets = [2, 0, 0], sizes = [1, 8, 8], strides = [1, 1, 1]} : vector<4x8x8xf32> to vector<1x8x8xf32>
    %63 = vector.shape_cast %62 : vector<1x8x8xf32> to vector<8x8xf32>
    %c2 = arith.constant 2 : index
    %c0_38 = arith.constant 0 : index
    %c0_39 = arith.constant 0 : index
    %64 = vector.load %arg9[%c2, %c0_38, %c0_39] : memref<4x8x32xf32, #tpu.memory_space<vmem>>, vector<1x8x32xf32>
    %65 = vector.shape_cast %64 : vector<1x8x32xf32> to vector<8x32xf32>
    %cst_40 = arith.constant dense<0.000000e+00> : vector<8x32xf32>
    %66 = tpu.matmul %63, %65, %cst_40 {dimension_numbers = #tpu.dot_dimension_numbers<[1], [0], [0], [1], [0, 0, 1, 1], [], []>} : vector<8x8xf32>, vector<8x32xf32>, vector<8x32xf32> -> vector<8x32xf32>
    %67 = arith.addf %61, %66 : vector<8x32xf32>
    %68 = vector.extract_strided_slice %48 {offsets = [3, 0, 0], sizes = [1, 8, 8], strides = [1, 1, 1]} : vector<4x8x8xf32> to vector<1x8x8xf32>
    %69 = vector.shape_cast %68 : vector<1x8x8xf32> to vector<8x8xf32>
    %c3 = arith.constant 3 : index
    %c0_41 = arith.constant 0 : index
    %c0_42 = arith.constant 0 : index
    %70 = vector.load %arg9[%c3, %c0_41, %c0_42] : memref<4x8x32xf32, #tpu.memory_space<vmem>>, vector<1x8x32xf32>
    %71 = vector.shape_cast %70 : vector<1x8x32xf32> to vector<8x32xf32>
    %cst_43 = arith.constant dense<0.000000e+00> : vector<8x32xf32>
    %72 = tpu.matmul %69, %71, %cst_43 {dimension_numbers = #tpu.dot_dimension_numbers<[1], [0], [0], [1], [0, 0, 1, 1], [], []>} : vector<8x8xf32>, vector<8x32xf32>, vector<8x32xf32> -> vector<8x32xf32>
    %73 = arith.addf %67, %72 : vector<8x32xf32>
    %74 = arith.addf %1, %73 : vector<8x32xf32>
    %c0_44 = arith.constant 0 : index
    %c0_45 = arith.constant 0 : index
    %c0_46 = arith.constant 0 : index
    %75 = vector.load %arg10[%c0_44, %c0_45, %c0_46] : memref<1x8x32xf32, #tpu.memory_space<vmem>>, vector<1x8x32xf32>
    %76 = vector.shape_cast %75 : vector<1x8x32xf32> to vector<8x32xf32>
    %77 = vector.shape_cast %74 : vector<8x32xf32> to vector<1x8x32xf32>
    tpu.vector_store %arg10[%c0_44, %c0_45, %c0_46], %77 {strides = array<i32>} : memref<1x8x32xf32, #tpu.memory_space<vmem>>, vector<1x8x32xf32>,
    return
  }
  func.func @transform_0(%arg0: i32, %arg1: i32) -> (i32, i32, i32) {
    %c0_i32 = arith.constant 0 : i32
    %c0_i32_0 = arith.constant 0 : i32
    return %arg0, %arg1, %c0_i32 : i32, i32, i32
  }
  func.func @transform_1(%arg0: i32, %arg1: i32) -> (i32, i32, i32) {
    %c0_i32 = arith.constant 0 : i32
    %c0_i32_0 = arith.constant 0 : i32
    %c0_i32_1 = arith.constant 0 : i32
    return %arg0, %c0_i32, %c0_i32_0 : i32, i32, i32
  }
  func.func @transform_2(%arg0: i32, %arg1: i32) -> (i32, i32, i32, i32) {
    %c0_i32 = arith.constant 0 : i32
    %c0_i32_0 = arith.constant 0 : i32
    %c0_i32_1 = arith.constant 0 : i32
    %c0_i32_2 = arith.constant 0 : i32
    return %c0_i32, %c0_i32_0, %arg1, %c0_i32_1 : i32, i32, i32, i32
  }
  func.func @transform_3(%arg0: i32, %arg1: i32) -> (i32, i32) {
    %c0_i32 = arith.constant 0 : i32
    %c0_i32_0 = arith.constant 0 : i32
    %c0_i32_1 = arith.constant 0 : i32
    return %c0_i32, %c0_i32_0 : i32, i32
  }
  func.func @transform_4(%arg0: i32, %arg1: i32) -> (i32, i32) {
    %c0_i32 = arith.constant 0 : i32
    %c0_i32_0 = arith.constant 0 : i32
    %c0_i32_1 = arith.constant 0 : i32
    return %c0_i32, %c0_i32_0 : i32, i32
  }
  func.func @transform_5(%arg0: i32, %arg1: i32) -> (i32, i32) {
    %c0_i32 = arith.constant 0 : i32
    %c0_i32_0 = arith.constant 0 : i32
    %c0_i32_1 = arith.constant 0 : i32
    return %c0_i32, %c0_i32_0 : i32, i32
  }
  func.func @transform_6(%arg0: i32, %arg1: i32) -> (i32, i32) {
    %c0_i32 = arith.constant 0 : i32
    %c0_i32_0 = arith.constant 0 : i32
    %c0_i32_1 = arith.constant 0 : i32
    return %c0_i32, %c0_i32_0 : i32, i32
  }
  func.func @transform_7(%arg0: i32, %arg1: i32) -> (i32, i32, i32) {
    %c0_i32 = arith.constant 0 : i32
    %c0_i32_0 = arith.constant 0 : i32
    %c0_i32_1 = arith.constant 0 : i32
    %c0_i32_2 = arith.constant 0 : i32
    return %c0_i32, %c0_i32_0, %c0_i32_1 : i32, i32, i32
  }
  func.func @transform_8(%arg0: i32, %arg1: i32) -> (i32, i32, i32) {
    %c0_i32 = arith.constant 0 : i32
    %c0_i32_0 = arith.constant 0 : i32
    return %arg0, %arg1, %c0_i32 : i32, i32, i32
  }
  func.func @transform_9(%arg0: i32, %arg1: i32) -> (i32, i32, i32, i32) {
    %c0_i32 = arith.constant 0 : i32
    %c0_i32_0 = arith.constant 0 : i32
    %c0_i32_1 = arith.constant 0 : i32
    return %arg0, %c0_i32, %arg1, %c0_i32_0 : i32, i32, i32, i32
  }
}

module attributes {stable_mosaic.version = 11 : i64} {
  func.func @_cross_attn_kernel_looped(%arg0: i32, %arg1: i32, %arg2: memref<1x8x32xf32, #tpu.memory_space<vmem>>, %arg3: memref<1x16x32xf32, #tpu.memory_space<vmem>>, %arg4: memref<1x4x8x16xf32, #tpu.memory_space<vmem>>, %arg5: memref<1x32xf32, #tpu.memory_space<vmem>>, %arg6: memref<32x32xf32, #tpu.memory_space<vmem>>, %arg7: memref<32x32xf32, #tpu.memory_space<vmem>>, %arg8: memref<32x32xf32, #tpu.memory_space<vmem>>, %arg9: memref<4x8x32xf32, #tpu.memory_space<vmem>>, %arg10: memref<1x8x32xf32, #tpu.memory_space<vmem>>, %arg11: memref<1x4x8x16xf32, #tpu.memory_space<vmem>>) attributes {dimension_semantics = [#tpu.dimension_semantics<parallel>, #tpu.dimension_semantics<parallel>], iteration_bounds = array<i64: 2, 1>, scalar_prefetch = 0 : i64, scratch_operands = 0 : i64, tpu.core_type = #tpu.core_type<tc>, window_params = [{transform_indices = @transform_0, window_bounds = array<i64: 1, 8, 32>}, {transform_indices = @transform_1, window_bounds = array<i64: 1, 16, 32>}, {transform_indices = @transform_2, window_bounds = array<i64: 1, 4, 8, 16>}, {pipeline_mode = #tpu.pipeline_mode<synchronous>, transform_indices = @transform_3, window_bounds = array<i64: 1, 32>}, {pipeline_mode = #tpu.pipeline_mode<synchronous>, transform_indices = @transform_4, window_bounds = array<i64: 32, 32>}, {pipeline_mode = #tpu.pipeline_mode<synchronous>, transform_indices = @transform_5, window_bounds = array<i64: 32, 32>}, {pipeline_mode = #tpu.pipeline_mode<synchronous>, transform_indices = @transform_6, window_bounds = array<i64: 32, 32>}, {pipeline_mode = #tpu.pipeline_mode<synchronous>, transform_indices = @transform_7, window_bounds = array<i64: 4, 8, 32>}, {transform_indices = @transform_8, window_bounds = array<i64: 1, 8, 32>}, {transform_indices = @transform_9, window_bounds = array<i64: 1, 4, 8, 16>}]} {
    %c0 = arith.constant 0 : index
    %c0_0 = arith.constant 0 : index
    %c0_1 = arith.constant 0 : index
    %0 = vector.load %arg2[%c0, %c0_0, %c0_1] : memref<1x8x32xf32, #tpu.memory_space<vmem>>, vector<1x8x32xf32>
    %1 = vector.shape_cast %0 : vector<1x8x32xf32> to vector<8x32xf32>
    %2 = arith.mulf %1, %1 : vector<8x32xf32>
    %cst = arith.constant dense<0.000000e+00> : vector<8xf32>
    %3 = vector.multi_reduction <add>, %2, %cst [1] : vector<8x32xf32> to vector<8xf32>
    %4 = vector.shape_cast %3 : vector<8xf32> to vector<8x1xf32>
    %cst_2 = arith.constant 3.200000e+01 : f32
    %5 = vector.broadcast %cst_2 : f32 to vector<8x1xf32>
    %6 = arith.divf %4, %5 : vector<8x1xf32>
    %cst_3 = arith.constant 9.99999997E-7 : f32
    %7 = vector.broadcast %cst_3 : f32 to vector<8x1xf32>
    %8 = arith.addf %6, %7 : vector<8x1xf32>
    %9 = math.rsqrt %8 : vector<8x1xf32>
    %10 = vector.broadcast %9 : vector<8x1xf32> to vector<8x32xf32>
    %11 = arith.mulf %1, %10 : vector<8x32xf32>
    %c0_4 = arith.constant 0 : index
    %c0_5 = arith.constant 0 : index
    %12 = vector.load %arg5[%c0_4, %c0_5] : memref<1x32xf32, #tpu.memory_space<vmem>>, vector<1x32xf32>
    %13 = vector.shape_cast %12 : vector<1x32xf32> to vector<32xf32>
    %14 = vector.shape_cast %13 : vector<32xf32> to vector<1x32xf32>
    %15 = vector.broadcast %14 : vector<1x32xf32> to vector<8x32xf32>
    %16 = arith.mulf %11, %15 : vector<8x32xf32>
    %c0_6 = arith.constant 0 : index
    %c0_7 = arith.constant 0 : index
    %c0_8 = arith.constant 0 : index
    %17 = vector.load %arg3[%c0_6, %c0_7, %c0_8] : memref<1x16x32xf32, #tpu.memory_space<vmem>>, vector<1x16x32xf32>
    %18 = vector.shape_cast %17 : vector<1x16x32xf32> to vector<16x32xf32>
    %c0_9 = arith.constant 0 : index
    %c0_10 = arith.constant 0 : index
    %19 = vector.load %arg6[%c0_9, %c0_10] : memref<32x32xf32, #tpu.memory_space<vmem>>, vector<32x32xf32>
    %cst_11 = arith.constant dense<0.000000e+00> : vector<8x32xf32>
    %20 = tpu.matmul %16, %19, %cst_11 {dimension_numbers = #tpu.dot_dimension_numbers<[1], [0], [0], [1], [0, 0, 1, 1], [], []>} : vector<8x32xf32>, vector<32x32xf32>, vector<8x32xf32> -> vector<8x32xf32>
    %c0_12 = arith.constant 0 : index
    %c0_13 = arith.constant 0 : index
    %21 = vector.load %arg7[%c0_12, %c0_13] : memref<32x32xf32, #tpu.memory_space<vmem>>, vector<32x32xf32>
    %cst_14 = arith.constant dense<0.000000e+00> : vector<16x32xf32>
    %22 = tpu.matmul %18, %21, %cst_14 {dimension_numbers = #tpu.dot_dimension_numbers<[1], [0], [0], [1], [0, 0, 1, 1], [], []>} : vector<16x32xf32>, vector<32x32xf32>, vector<16x32xf32> -> vector<16x32xf32>
    %c0_15 = arith.constant 0 : index
    %c0_16 = arith.constant 0 : index
    %23 = vector.load %arg8[%c0_15, %c0_16] : memref<32x32xf32, #tpu.memory_space<vmem>>, vector<32x32xf32>
    %cst_17 = arith.constant dense<0.000000e+00> : vector<16x32xf32>
    %24 = tpu.matmul %18, %23, %cst_17 {dimension_numbers = #tpu.dot_dimension_numbers<[1], [0], [0], [1], [0, 0, 1, 1], [], []>} : vector<16x32xf32>, vector<32x32xf32>, vector<16x32xf32> -> vector<16x32xf32>
    %cst_18 = arith.constant 0.000000e+00 : f32
    %25 = vector.broadcast %cst_18 : f32 to vector<8x32xf32>
    %26 = vector.extract_strided_slice %20 {offsets = [0, 0], sizes = [8, 8], strides = [1, 1]} : vector<8x32xf32> to vector<8x8xf32>
    %27 = vector.extract_strided_slice %22 {offsets = [0, 0], sizes = [16, 8], strides = [1, 1]} : vector<16x32xf32> to vector<16x8xf32>
    %28 = vector.extract_strided_slice %24 {offsets = [0, 0], sizes = [16, 8], strides = [1, 1]} : vector<16x32xf32> to vector<16x8xf32>
    %29 = tpu.transpose %27, [1, 0] : vector<16x8xf32> -> vector<8x16xf32>
    %cst_19 = arith.constant dense<0.000000e+00> : vector<8x16xf32>
    %30 = tpu.matmul %26, %29, %cst_19 {dimension_numbers = #tpu.dot_dimension_numbers<[1], [0], [0], [1], [0, 0, 1, 1], [], []>} : vector<8x8xf32>, vector<8x16xf32>, vector<8x16xf32> -> vector<8x16xf32>
    %c0_20 = arith.constant 0 : index
    %c0_21 = arith.constant 0 : index
    %c0_22 = arith.constant 0 : index
    %c0_23 = arith.constant 0 : index
    %31 = vector.load %arg4[%c0_20, %c0_21, %c0_22, %c0_23] : memref<1x4x8x16xf32, #tpu.memory_space<vmem>>, vector<1x1x8x16xf32>
    %32 = vector.shape_cast %31 : vector<1x1x8x16xf32> to vector<8x16xf32>
    %33 = arith.addf %30, %32 : vector<8x16xf32>
    %c0_24 = arith.constant 0 : index
    %c0_25 = arith.constant 0 : index
    %c0_26 = arith.constant 0 : index
    %c0_27 = arith.constant 0 : index
    %34 = vector.load %arg11[%c0_24, %c0_25, %c0_26, %c0_27] : memref<1x4x8x16xf32, #tpu.memory_space<vmem>>, vector<1x1x8x16xf32>
    %35 = vector.shape_cast %34 : vector<1x1x8x16xf32> to vector<8x16xf32>
    %36 = vector.shape_cast %33 : vector<8x16xf32> to vector<1x1x8x16xf32>
    tpu.vector_store %arg11[%c0_24, %c0_25, %c0_26, %c0_27], %36 {strides = array<i32>} : memref<1x4x8x16xf32, #tpu.memory_space<vmem>>, vector<1x1x8x16xf32>,
    %cst_28 = arith.constant dense<0xFF800000> : vector<8xf32>
    %37 = vector.multi_reduction <maximumf>, %33, %cst_28 [1] : vector<8x16xf32> to vector<8xf32>
    %38 = vector.shape_cast %37 : vector<8xf32> to vector<8x1xf32>
    %39 = vector.broadcast %38 : vector<8x1xf32> to vector<8x16xf32>
    %40 = arith.subf %33, %39 : vector<8x16xf32>
    %41 = math.exp %40 : vector<8x16xf32>
    %cst_29 = arith.constant dense<0.000000e+00> : vector<8xf32>
    %42 = vector.multi_reduction <add>, %41, %cst_29 [1] : vector<8x16xf32> to vector<8xf32>
    %43 = vector.shape_cast %42 : vector<8xf32> to vector<8x1xf32>
    %44 = tpu.reciprocal %43 {approx = true} : vector<8x1xf32> -> vector<8x1xf32>
    %45 = vector.broadcast %44 : vector<8x1xf32> to vector<8x16xf32>
    %46 = arith.mulf %41, %45 : vector<8x16xf32>
    %cst_30 = arith.constant dense<0.000000e+00> : vector<8x8xf32>
    %47 = tpu.matmul %46, %28, %cst_30 {dimension_numbers = #tpu.dot_dimension_numbers<[1], [0], [0], [1], [0, 0, 1, 1], [], []>} : vector<8x16xf32>, vector<16x8xf32>, vector<8x8xf32> -> vector<8x8xf32>
    %c0_31 = arith.constant 0 : index
    %c0_32 = arith.constant 0 : index
    %c0_33 = arith.constant 0 : index
    %48 = vector.load %arg9[%c0_31, %c0_32, %c0_33] : memref<4x8x32xf32, #tpu.memory_space<vmem>>, vector<1x8x32xf32>
    %49 = vector.shape_cast %48 : vector<1x8x32xf32> to vector<8x32xf32>
    %cst_34 = arith.constant dense<0.000000e+00> : vector<8x32xf32>
    %50 = tpu.matmul %47, %49, %cst_34 {dimension_numbers = #tpu.dot_dimension_numbers<[1], [0], [0], [1], [0, 0, 1, 1], [], []>} : vector<8x8xf32>, vector<8x32xf32>, vector<8x32xf32> -> vector<8x32xf32>
    %51 = arith.addf %25, %50 : vector<8x32xf32>
    %52 = vector.extract_strided_slice %20 {offsets = [0, 8], sizes = [8, 8], strides = [1, 1]} : vector<8x32xf32> to vector<8x8xf32>
    %53 = vector.extract_strided_slice %22 {offsets = [0, 8], sizes = [16, 8], strides = [1, 1]} : vector<16x32xf32> to vector<16x8xf32>
    %54 = vector.extract_strided_slice %24 {offsets = [0, 8], sizes = [16, 8], strides = [1, 1]} : vector<16x32xf32> to vector<16x8xf32>
    %55 = tpu.transpose %53, [1, 0] : vector<16x8xf32> -> vector<8x16xf32>
    %cst_35 = arith.constant dense<0.000000e+00> : vector<8x16xf32>
    %56 = tpu.matmul %52, %55, %cst_35 {dimension_numbers = #tpu.dot_dimension_numbers<[1], [0], [0], [1], [0, 0, 1, 1], [], []>} : vector<8x8xf32>, vector<8x16xf32>, vector<8x16xf32> -> vector<8x16xf32>
    %c0_36 = arith.constant 0 : index
    %c1 = arith.constant 1 : index
    %c0_37 = arith.constant 0 : index
    %c0_38 = arith.constant 0 : index
    %57 = vector.load %arg4[%c0_36, %c1, %c0_37, %c0_38] : memref<1x4x8x16xf32, #tpu.memory_space<vmem>>, vector<1x1x8x16xf32>
    %58 = vector.shape_cast %57 : vector<1x1x8x16xf32> to vector<8x16xf32>
    %59 = arith.addf %56, %58 : vector<8x16xf32>
    %c0_39 = arith.constant 0 : index
    %c1_40 = arith.constant 1 : index
    %c0_41 = arith.constant 0 : index
    %c0_42 = arith.constant 0 : index
    %60 = vector.load %arg11[%c0_39, %c1_40, %c0_41, %c0_42] : memref<1x4x8x16xf32, #tpu.memory_space<vmem>>, vector<1x1x8x16xf32>
    %61 = vector.shape_cast %60 : vector<1x1x8x16xf32> to vector<8x16xf32>
    %62 = vector.shape_cast %59 : vector<8x16xf32> to vector<1x1x8x16xf32>
    tpu.vector_store %arg11[%c0_39, %c1_40, %c0_41, %c0_42], %62 {strides = array<i32>} : memref<1x4x8x16xf32, #tpu.memory_space<vmem>>, vector<1x1x8x16xf32>,
    %cst_43 = arith.constant dense<0xFF800000> : vector<8xf32>
    %63 = vector.multi_reduction <maximumf>, %59, %cst_43 [1] : vector<8x16xf32> to vector<8xf32>
    %64 = vector.shape_cast %63 : vector<8xf32> to vector<8x1xf32>
    %65 = vector.broadcast %64 : vector<8x1xf32> to vector<8x16xf32>
    %66 = arith.subf %59, %65 : vector<8x16xf32>
    %67 = math.exp %66 : vector<8x16xf32>
    %cst_44 = arith.constant dense<0.000000e+00> : vector<8xf32>
    %68 = vector.multi_reduction <add>, %67, %cst_44 [1] : vector<8x16xf32> to vector<8xf32>
    %69 = vector.shape_cast %68 : vector<8xf32> to vector<8x1xf32>
    %70 = tpu.reciprocal %69 {approx = true} : vector<8x1xf32> -> vector<8x1xf32>
    %71 = vector.broadcast %70 : vector<8x1xf32> to vector<8x16xf32>
    %72 = arith.mulf %67, %71 : vector<8x16xf32>
    %cst_45 = arith.constant dense<0.000000e+00> : vector<8x8xf32>
    %73 = tpu.matmul %72, %54, %cst_45 {dimension_numbers = #tpu.dot_dimension_numbers<[1], [0], [0], [1], [0, 0, 1, 1], [], []>} : vector<8x16xf32>, vector<16x8xf32>, vector<8x8xf32> -> vector<8x8xf32>
    %c1_46 = arith.constant 1 : index
    %c0_47 = arith.constant 0 : index
    %c0_48 = arith.constant 0 : index
    %74 = vector.load %arg9[%c1_46, %c0_47, %c0_48] : memref<4x8x32xf32, #tpu.memory_space<vmem>>, vector<1x8x32xf32>
    %75 = vector.shape_cast %74 : vector<1x8x32xf32> to vector<8x32xf32>
    %cst_49 = arith.constant dense<0.000000e+00> : vector<8x32xf32>
    %76 = tpu.matmul %73, %75, %cst_49 {dimension_numbers = #tpu.dot_dimension_numbers<[1], [0], [0], [1], [0, 0, 1, 1], [], []>} : vector<8x8xf32>, vector<8x32xf32>, vector<8x32xf32> -> vector<8x32xf32>
    %77 = arith.addf %51, %76 : vector<8x32xf32>
    %78 = vector.extract_strided_slice %20 {offsets = [0, 16], sizes = [8, 8], strides = [1, 1]} : vector<8x32xf32> to vector<8x8xf32>
    %79 = vector.extract_strided_slice %22 {offsets = [0, 16], sizes = [16, 8], strides = [1, 1]} : vector<16x32xf32> to vector<16x8xf32>
    %80 = vector.extract_strided_slice %24 {offsets = [0, 16], sizes = [16, 8], strides = [1, 1]} : vector<16x32xf32> to vector<16x8xf32>
    %81 = tpu.transpose %79, [1, 0] : vector<16x8xf32> -> vector<8x16xf32>
    %cst_50 = arith.constant dense<0.000000e+00> : vector<8x16xf32>
    %82 = tpu.matmul %78, %81, %cst_50 {dimension_numbers = #tpu.dot_dimension_numbers<[1], [0], [0], [1], [0, 0, 1, 1], [], []>} : vector<8x8xf32>, vector<8x16xf32>, vector<8x16xf32> -> vector<8x16xf32>
    %c0_51 = arith.constant 0 : index
    %c2 = arith.constant 2 : index
    %c0_52 = arith.constant 0 : index
    %c0_53 = arith.constant 0 : index
    %83 = vector.load %arg4[%c0_51, %c2, %c0_52, %c0_53] : memref<1x4x8x16xf32, #tpu.memory_space<vmem>>, vector<1x1x8x16xf32>
    %84 = vector.shape_cast %83 : vector<1x1x8x16xf32> to vector<8x16xf32>
    %85 = arith.addf %82, %84 : vector<8x16xf32>
    %c0_54 = arith.constant 0 : index
    %c2_55 = arith.constant 2 : index
    %c0_56 = arith.constant 0 : index
    %c0_57 = arith.constant 0 : index
    %86 = vector.load %arg11[%c0_54, %c2_55, %c0_56, %c0_57] : memref<1x4x8x16xf32, #tpu.memory_space<vmem>>, vector<1x1x8x16xf32>
    %87 = vector.shape_cast %86 : vector<1x1x8x16xf32> to vector<8x16xf32>
    %88 = vector.shape_cast %85 : vector<8x16xf32> to vector<1x1x8x16xf32>
    tpu.vector_store %arg11[%c0_54, %c2_55, %c0_56, %c0_57], %88 {strides = array<i32>} : memref<1x4x8x16xf32, #tpu.memory_space<vmem>>, vector<1x1x8x16xf32>,
    %cst_58 = arith.constant dense<0xFF800000> : vector<8xf32>
    %89 = vector.multi_reduction <maximumf>, %85, %cst_58 [1] : vector<8x16xf32> to vector<8xf32>
    %90 = vector.shape_cast %89 : vector<8xf32> to vector<8x1xf32>
    %91 = vector.broadcast %90 : vector<8x1xf32> to vector<8x16xf32>
    %92 = arith.subf %85, %91 : vector<8x16xf32>
    %93 = math.exp %92 : vector<8x16xf32>
    %cst_59 = arith.constant dense<0.000000e+00> : vector<8xf32>
    %94 = vector.multi_reduction <add>, %93, %cst_59 [1] : vector<8x16xf32> to vector<8xf32>
    %95 = vector.shape_cast %94 : vector<8xf32> to vector<8x1xf32>
    %96 = tpu.reciprocal %95 {approx = true} : vector<8x1xf32> -> vector<8x1xf32>
    %97 = vector.broadcast %96 : vector<8x1xf32> to vector<8x16xf32>
    %98 = arith.mulf %93, %97 : vector<8x16xf32>
    %cst_60 = arith.constant dense<0.000000e+00> : vector<8x8xf32>
    %99 = tpu.matmul %98, %80, %cst_60 {dimension_numbers = #tpu.dot_dimension_numbers<[1], [0], [0], [1], [0, 0, 1, 1], [], []>} : vector<8x16xf32>, vector<16x8xf32>, vector<8x8xf32> -> vector<8x8xf32>
    %c2_61 = arith.constant 2 : index
    %c0_62 = arith.constant 0 : index
    %c0_63 = arith.constant 0 : index
    %100 = vector.load %arg9[%c2_61, %c0_62, %c0_63] : memref<4x8x32xf32, #tpu.memory_space<vmem>>, vector<1x8x32xf32>
    %101 = vector.shape_cast %100 : vector<1x8x32xf32> to vector<8x32xf32>
    %cst_64 = arith.constant dense<0.000000e+00> : vector<8x32xf32>
    %102 = tpu.matmul %99, %101, %cst_64 {dimension_numbers = #tpu.dot_dimension_numbers<[1], [0], [0], [1], [0, 0, 1, 1], [], []>} : vector<8x8xf32>, vector<8x32xf32>, vector<8x32xf32> -> vector<8x32xf32>
    %103 = arith.addf %77, %102 : vector<8x32xf32>
    %104 = vector.extract_strided_slice %20 {offsets = [0, 24], sizes = [8, 8], strides = [1, 1]} : vector<8x32xf32> to vector<8x8xf32>
    %105 = vector.extract_strided_slice %22 {offsets = [0, 24], sizes = [16, 8], strides = [1, 1]} : vector<16x32xf32> to vector<16x8xf32>
    %106 = vector.extract_strided_slice %24 {offsets = [0, 24], sizes = [16, 8], strides = [1, 1]} : vector<16x32xf32> to vector<16x8xf32>
    %107 = tpu.transpose %105, [1, 0] : vector<16x8xf32> -> vector<8x16xf32>
    %cst_65 = arith.constant dense<0.000000e+00> : vector<8x16xf32>
    %108 = tpu.matmul %104, %107, %cst_65 {dimension_numbers = #tpu.dot_dimension_numbers<[1], [0], [0], [1], [0, 0, 1, 1], [], []>} : vector<8x8xf32>, vector<8x16xf32>, vector<8x16xf32> -> vector<8x16xf32>
    %c0_66 = arith.constant 0 : index
    %c3 = arith.constant 3 : index
    %c0_67 = arith.constant 0 : index
    %c0_68 = arith.constant 0 : index
    %109 = vector.load %arg4[%c0_66, %c3, %c0_67, %c0_68] : memref<1x4x8x16xf32, #tpu.memory_space<vmem>>, vector<1x1x8x16xf32>
    %110 = vector.shape_cast %109 : vector<1x1x8x16xf32> to vector<8x16xf32>
    %111 = arith.addf %108, %110 : vector<8x16xf32>
    %c0_69 = arith.constant 0 : index
    %c3_70 = arith.constant 3 : index
    %c0_71 = arith.constant 0 : index
    %c0_72 = arith.constant 0 : index
    %112 = vector.load %arg11[%c0_69, %c3_70, %c0_71, %c0_72] : memref<1x4x8x16xf32, #tpu.memory_space<vmem>>, vector<1x1x8x16xf32>
    %113 = vector.shape_cast %112 : vector<1x1x8x16xf32> to vector<8x16xf32>
    %114 = vector.shape_cast %111 : vector<8x16xf32> to vector<1x1x8x16xf32>
    tpu.vector_store %arg11[%c0_69, %c3_70, %c0_71, %c0_72], %114 {strides = array<i32>} : memref<1x4x8x16xf32, #tpu.memory_space<vmem>>, vector<1x1x8x16xf32>,
    %cst_73 = arith.constant dense<0xFF800000> : vector<8xf32>
    %115 = vector.multi_reduction <maximumf>, %111, %cst_73 [1] : vector<8x16xf32> to vector<8xf32>
    %116 = vector.shape_cast %115 : vector<8xf32> to vector<8x1xf32>
    %117 = vector.broadcast %116 : vector<8x1xf32> to vector<8x16xf32>
    %118 = arith.subf %111, %117 : vector<8x16xf32>
    %119 = math.exp %118 : vector<8x16xf32>
    %cst_74 = arith.constant dense<0.000000e+00> : vector<8xf32>
    %120 = vector.multi_reduction <add>, %119, %cst_74 [1] : vector<8x16xf32> to vector<8xf32>
    %121 = vector.shape_cast %120 : vector<8xf32> to vector<8x1xf32>
    %122 = tpu.reciprocal %121 {approx = true} : vector<8x1xf32> -> vector<8x1xf32>
    %123 = vector.broadcast %122 : vector<8x1xf32> to vector<8x16xf32>
    %124 = arith.mulf %119, %123 : vector<8x16xf32>
    %cst_75 = arith.constant dense<0.000000e+00> : vector<8x8xf32>
    %125 = tpu.matmul %124, %106, %cst_75 {dimension_numbers = #tpu.dot_dimension_numbers<[1], [0], [0], [1], [0, 0, 1, 1], [], []>} : vector<8x16xf32>, vector<16x8xf32>, vector<8x8xf32> -> vector<8x8xf32>
    %c3_76 = arith.constant 3 : index
    %c0_77 = arith.constant 0 : index
    %c0_78 = arith.constant 0 : index
    %126 = vector.load %arg9[%c3_76, %c0_77, %c0_78] : memref<4x8x32xf32, #tpu.memory_space<vmem>>, vector<1x8x32xf32>
    %127 = vector.shape_cast %126 : vector<1x8x32xf32> to vector<8x32xf32>
    %cst_79 = arith.constant dense<0.000000e+00> : vector<8x32xf32>
    %128 = tpu.matmul %125, %127, %cst_79 {dimension_numbers = #tpu.dot_dimension_numbers<[1], [0], [0], [1], [0, 0, 1, 1], [], []>} : vector<8x8xf32>, vector<8x32xf32>, vector<8x32xf32> -> vector<8x32xf32>
    %129 = arith.addf %103, %128 : vector<8x32xf32>
    %130 = arith.addf %1, %129 : vector<8x32xf32>
    %c0_80 = arith.constant 0 : index
    %c0_81 = arith.constant 0 : index
    %c0_82 = arith.constant 0 : index
    %131 = vector.load %arg10[%c0_80, %c0_81, %c0_82] : memref<1x8x32xf32, #tpu.memory_space<vmem>>, vector<1x8x32xf32>
    %132 = vector.shape_cast %131 : vector<1x8x32xf32> to vector<8x32xf32>
    %133 = vector.shape_cast %130 : vector<8x32xf32> to vector<1x8x32xf32>
    tpu.vector_store %arg10[%c0_80, %c0_81, %c0_82], %133 {strides = array<i32>} : memref<1x8x32xf32, #tpu.memory_space<vmem>>, vector<1x8x32xf32>,
    return
  }
  func.func @transform_0(%arg0: i32, %arg1: i32) -> (i32, i32, i32) {
    %c0_i32 = arith.constant 0 : i32
    %c0_i32_0 = arith.constant 0 : i32
    return %arg0, %arg1, %c0_i32 : i32, i32, i32
  }
  func.func @transform_1(%arg0: i32, %arg1: i32) -> (i32, i32, i32) {
    %c0_i32 = arith.constant 0 : i32
    %c0_i32_0 = arith.constant 0 : i32
    %c0_i32_1 = arith.constant 0 : i32
    return %arg0, %c0_i32, %c0_i32_0 : i32, i32, i32
  }
  func.func @transform_2(%arg0: i32, %arg1: i32) -> (i32, i32, i32, i32) {
    %c0_i32 = arith.constant 0 : i32
    %c0_i32_0 = arith.constant 0 : i32
    %c0_i32_1 = arith.constant 0 : i32
    %c0_i32_2 = arith.constant 0 : i32
    return %c0_i32, %c0_i32_0, %arg1, %c0_i32_1 : i32, i32, i32, i32
  }
  func.func @transform_3(%arg0: i32, %arg1: i32) -> (i32, i32) {
    %c0_i32 = arith.constant 0 : i32
    %c0_i32_0 = arith.constant 0 : i32
    %c0_i32_1 = arith.constant 0 : i32
    return %c0_i32, %c0_i32_0 : i32, i32
  }
  func.func @transform_4(%arg0: i32, %arg1: i32) -> (i32, i32) {
    %c0_i32 = arith.constant 0 : i32
    %c0_i32_0 = arith.constant 0 : i32
    %c0_i32_1 = arith.constant 0 : i32
    return %c0_i32, %c0_i32_0 : i32, i32
  }
  func.func @transform_5(%arg0: i32, %arg1: i32) -> (i32, i32) {
    %c0_i32 = arith.constant 0 : i32
    %c0_i32_0 = arith.constant 0 : i32
    %c0_i32_1 = arith.constant 0 : i32
    return %c0_i32, %c0_i32_0 : i32, i32
  }
  func.func @transform_6(%arg0: i32, %arg1: i32) -> (i32, i32) {
    %c0_i32 = arith.constant 0 : i32
    %c0_i32_0 = arith.constant 0 : i32
    %c0_i32_1 = arith.constant 0 : i32
    return %c0_i32, %c0_i32_0 : i32, i32
  }
  func.func @transform_7(%arg0: i32, %arg1: i32) -> (i32, i32, i32) {
    %c0_i32 = arith.constant 0 : i32
    %c0_i32_0 = arith.constant 0 : i32
    %c0_i32_1 = arith.constant 0 : i32
    %c0_i32_2 = arith.constant 0 : i32
    return %c0_i32, %c0_i32_0, %c0_i32_1 : i32, i32, i32
  }
  func.func @transform_8(%arg0: i32, %arg1: i32) -> (i32, i32, i32) {
    %c0_i32 = arith.constant 0 : i32
    %c0_i32_0 = arith.constant 0 : i32
    return %arg0, %arg1, %c0_i32 : i32, i32, i32
  }
  func.func @transform_9(%arg0: i32, %arg1: i32) -> (i32, i32, i32, i32) {
    %c0_i32 = arith.constant 0 : i32
    %c0_i32_0 = arith.constant 0 : i32
    %c0_i32_1 = arith.constant 0 : i32
    return %arg0, %c0_i32, %arg1, %c0_i32_0 : i32, i32, i32, i32
  }
}

</mosaic_0001>

<bundles_post_ra>
// kernel: tpu_custom_call.1
= control target key start
LH: loop header
LB: loop body
LE: loop exit
PB: predicated region body
PF: predicated region fallthrough
CT: control target
= control target key end

     0   :  { %s2985_s0 = inlined_call_operand.hbm [shape: f32[2,8,32], index: 0, kind: input, shape index: {}]   ;;  %s2986_s1 = inlined_call_operand.hbm [shape: f32[2,16,32], index: 1, kind: input, shape index: {}]   ;;  %s2987_s2 = inlined_call_operand.hbm [shape: f32[1,4,8,16], index: 2, kind: input, shape index: {}]   ;;  %s2988_s3 = inlined_call_operand.vmem [shape: f32[1,32], index: 3, kind: input, shape index: {}]   ;;  %s2989_s4 = inlined_call_operand.hbm [shape: f32[32,32], index: 4, kind: input, shape index: {}]   ;;  %s2990_s5 = inlined_call_operand.hbm [shape: f32[32,32], index: 5, kind: input, shape index: {}]   ;;  %s2991_s6 = inlined_call_operand.hbm [shape: f32[32,32], index: 6, kind: input, shape index: {}]   ;;  %s2992_s7 = inlined_call_operand.hbm [shape: f32[4,8,32], index: 7, kind: input, shape index: {}]   ;;  %s2993_s8 = inlined_call_operand.hbm [shape: f32[2,8,32], index: 8, kind: output, shape index: {0}]   ;;  %s2994_s9 = inlined_call_operand.hbm [shape: f32[2,4,8,16], index: 9, kind: output, shape index: {1}]  }
   0x1   :  { %3001 = sst [smem:[#allocation29_spill]] %s2987_s2 }
   0x2   :  { %3002 = sst [smem:[#allocation30_spill]] %s2989_s4 }
   0x3   :  { %3003 = sst [smem:[#allocation31_spill]] %s2990_s5 }
   0x4   :  { %3004 = sst [smem:[#allocation32_spill]] %s2991_s6 }
   0x5   :  { %3005 = sst [smem:[#allocation33_spill]] %s2992_s7 }
   0x6   :  { %15 = vsyncpa [#allocation3], 0 }
   0x7   :  { %17 = vsyncpa [#allocation3 + $0x1], 0 }
   0x8   :  { %18 = vsyncpa [#allocation6], 0 }
   0x9   :  { %20 = vsyncpa [#allocation6 + $0x1], 0 }
   0xa   :  { %21 = vsyncpa [#allocation9], 0 }
   0xb   :  { %22 = vsyncpa [#allocation12], 0 }
   0xc   :  { %23 = vsyncpa [#allocation4], 0 }
   0xd   :  { %25 = vsyncpa [#allocation4 + $0x1], 0 }
   0xe   :  { %26 = vsyncpa [#allocation16], 0 }
   0xf   :  { %28 = vsyncpa [#allocation16 + $0x1], 0  ;;  %s2459_s30 = smov 0   ;;  %s2461_s10 = smov 0  }
  0x10   :  { %s2463_s11 = smov 0   ;;  %s2465_s12 = smov 0  }
  0x11   :  { %s2467_s13 = smov 0   ;;  %s2469_s14 = smov 0  }
  0x12 LB: > { %3006 = sst [smem:[#allocation24_spill]] %s2372_s30  ;;  %s2490_s15 = sadd.s32 4294967295, %s2392_s14   ;;  %s2392_s14 = sphi %s2469_s14, %s34_s14   ;;  %s2388_s13 = sphi %s2467_s13, %s3032_s13   ;;  %s2384_s12 = sphi %s2465_s12, %s3031_s12   ;;  %s2380_s11 = sphi %s2463_s11, %s3027_s11   ;;  %s2376_s10 = sphi %s2461_s10, %s3030_s10   ;;  %s2372_s30 = sphi %s2459_s30, %s3029_s30  }
  0x13   : > { %3007 = sst [smem:[#allocation25_spill]] %s2380_s11  ;;  %p1826_p0 = scmp.ge.s32.totalorder %s2392_s14, 1 }
  0x14   : > { %p69_p1 = scmp.eq.s32.totalorder %s2490_s15, 0  ;;  %p292_p2 = scmp.lt.s32.totalorder %s2392_s14, 3 }
  0x15   : > { %s3008_s2 = sld [smem:[#allocation29_spill]]  ;;  %s2394_s20 = smov [#allocation7]  }
  0x16   : > { %p2498_p3 = pnand %p1826_p0, %p292_p2  ;;  %s307_s21 = sshll.u32 %s2394_s20, 4  ;;  %s308_s21 = int_to_ptr.vmem [resolvable:$true] %s307_s21 }
  0x17   : > { %p1832_p6 = scmp.ge.s32.totalorder %s2392_s14, 2  ;;  %s3011_s4 = sld [smem:[#allocation30_spill]] }
  0x18   : > { %p1910_p4 = pneg %p2498_p3  ;;  %s2995_s26 = smov 128  }
  0x19   : > { %s2996_s27 = smov 8   ;;  %s2397_s28 = smov [#allocation8]  }
  0x1a   : > { %p2506_p5 = pnand %p1910_p4, %p69_p1  ;;  %s324_s29 = sshll.u32 %s2397_s28, 4  ;;  %s325_s29 = int_to_ptr.vmem [resolvable:$true] %s324_s29 }
  0x1b   : > { %s305_s18 = sshll.u32 %s3008_s2, 4  ;;  %s3012_s6 = sld [smem:[#allocation32_spill]]  ;;  %s306_s18 = int_to_ptr.hbm [resolvable:$true] %s305_s18 }
  0x1c   : > { %1913 = dma.hbm_to_vmem [thread:$0]  (!%p2506_p5), %s306_s18, 512, %s308_s21, [#allocation6], %s2995_s26, %s2995_s26, %s2996_s27  }
  0x1d   : > { %s322_s25 = sshll.u32 %s3011_s4, 4  ;;  %s3013_s5 = sld [smem:[#allocation31_spill]]  ;;  %s323_s25 = int_to_ptr.hbm [resolvable:$true] %s322_s25 }
  0x1e   : > { %1916 = dma.hbm_to_vmem [thread:$0]  (!%p2506_p5), %s323_s25, 512, %s325_s29, [#allocation9], %s2995_s26, %s2995_s26, %s2996_s27  }
  0x1f   : > { %s2398_s18 = smov [#allocation11]   ;;  %s2399_s25 = smov [#allocation10]  }
  0x20   : > { %s352_s21 = sshll.u32 %s2398_s18, 4  ;;  %s338_s28 = sshll.u32 %s2399_s25, 4  ;;  %s353_s21 = int_to_ptr.vmem [resolvable:$true] %s352_s21  ;;  %s339_s28 = int_to_ptr.vmem [resolvable:$true] %s338_s28 }
  0x21   : > { %s350_s20 = sshll.u32 %s3012_s6, 4  ;;  %s3014_s7 = sld [smem:[#allocation33_spill]]  ;;  %s351_s20 = int_to_ptr.hbm [resolvable:$true] %s350_s20 }
  0x22   : > { %1922 = dma.hbm_to_vmem [thread:$0]  (!%p2506_p5), %s351_s20, 512, %s353_s21, [#allocation12], %s2995_s26, %s2995_s26, %s2996_s27  }
  0x23   : > { %s336_s2 = sshll.u32 %s3013_s5, 4  ;;  %s2400_s20 = smov [#allocation13]   ;;  %s337_s2 = int_to_ptr.hbm [resolvable:$true] %s336_s2 }
  0x24   : > { %1919 = dma.hbm_to_vmem [thread:$0]  (!%p2506_p5), %s337_s2, 512, %s339_s28, [#allocation9], %s2995_s26, %s2995_s26, %s2996_s27  }
  0x25   : > { %s366_s23 = sshll.u32 %s2400_s20, 4  ;;  %s1825_s24 = sadd.s32 4294967294, %s2392_s14   ;;  %s367_s23 = int_to_ptr.vmem [resolvable:$true] %s366_s23 }
  0x26   : > { %s46_s18 = sadd.s32 1, %s2388_s13  ;;  %s55_s21 = sadd.s32 1, %s2380_s11 }
  0x27   : > { %s364_s17 = sshll.u32 %s3014_s7, 4  ;;  %p48_p7 = scmp.ge.s32.totalorder %s46_s18, 2  ;;  %s365_s17 = int_to_ptr.hbm [resolvable:$true] %s364_s17 }
  0x28   : > { %1925 = dma.hbm_to_vmem [thread:$0]  (!%p2506_p5), %s365_s17, 512, %s367_s23, [#allocation12], %s2995_s26, %s2995_s26, %s2996_s27  }
  0x29   : > { %p62_p8 = scmp.ne.s32.totalorder %s2380_s11, %s2376_s10  ;;  %p63_p9 = scmp.eq.s32.totalorder %s2392_s14, 0 }
  0x2a   : > { %p68_p10 = scmp.ne.s32.totalorder %s2376_s10, %s2372_s30  ;;  %s3034_s18 = smov (%p48_p7, %s46_s18), 0 }
  0x2b   : > { %3015 = sst [smem:[#allocation26_spill]] %s3034_s18  ;;  %p2558_p11 = por %p63_p9, %p62_p8 }
  0x2c   : > { %p2564_p12 = por %p69_p1, %p68_p10  ;;  %s50_s25 = ssub.s32 %s2388_s13, %s3034_s18 }
  0x2d   : > { %p251_p13 = scmp.eq.s32.totalorder %s2490_s15, 1  ;;  %p53_p0 = scmp.eq.s32.totalorder %s50_s25, 0 }
  0x2e   : > { %p257_p2 = scmp.eq.s32.totalorder %s1825_s24, 1  ;;  %p1945_p5 = scmp.lt.s32.totalorder %s2392_s14, 2 }
  0x2f   : > { %p2571_p4 = por %p251_p13, %p62_p8  ;;  %s380_s17 = sand.u32 1, %s2380_s11  }
  0x30   : > { %s2577_s29 = scalar_select %p53_p0, %s2380_s11, %s55_s21  }
  0x31   : > { %p2579_p7 = por %p257_p2, %p68_p10  ;;  %s1833_s20 = sshll.u32 %s380_s17, 3 }
  0x32   : > { %3019 = sst [smem:[#allocation27_spill]] %s2577_s29  ;;  %s1834_s23 = sshll.u32 %s2388_s13, 3 }
  0x33   : > { %s3020_s16 = scalar_select %p2579_p7, 1, 0 }
  0x34   : > { %s389_s24 = scalar_lea.hbm %s2985_s0, %s1834_s23  ;;  %s384_s25 = scalar_lea.vmem [#allocation2], %s1833_s20 }
  0x35   : > { %3021 = sst [smem:[#allocation28_spill]] %s3020_s16  ;;  %s393_s4 = sshll.u32 %s384_s25, 4  ;;  %s394_s4 = int_to_ptr.vmem [resolvable:$true] %s393_s4 }
  0x36   : > { %s391_s5 = sshll.u32 %s389_s24, 4  ;;  %p1927_p8 = pnand %p1945_p5, %p2558_p11  ;;  %s392_s5 = int_to_ptr.hbm [resolvable:$true] %s391_s5 }
  0x37   : > { %s1835_s21 = sshll.u32 %s380_s17, 4  ;;  %s1880_s6 = sshll.u32 %s2388_s13, 4 }
  0x38   : > { %s381_s7 = scalar_lea.sflag [#allocation3], %s380_s17  ;;  %s404_s18 = scalar_lea.vmem [#allocation5], %s1835_s21 }
  0x39   : > { %1929 = dma.hbm_to_vmem [thread:$0]  (!%p1927_p8), %s392_s5, 128, %s394_s4, %s381_s7  }
  0x3a   : > { %s412_s29 = sshll.u32 %s404_s18, 4  ;;  %s400_s11 = sand.u32 1, %s2392_s14   ;;  %s413_s29 = int_to_ptr.vmem [resolvable:$true] %s412_s29 }
  0x3b   : > { %s409_s26 = scalar_lea.hbm %s2986_s1, %s1880_s6  ;;  %s401_s20 = scalar_lea.sflag [#allocation6], %s400_s11 }
  0x3c   : > { %s410_s27 = sshll.u32 %s409_s26, 4  ;;  %s3022_s23 = smov 8   ;;  %s411_s27 = int_to_ptr.hbm [resolvable:$true] %s410_s27 }
  0x3d   : > { %s3023_s24 = smov 128   ;;  %424 = sbr.rel (%p2498_p3) target bundleno = 1161 (0x489), region = 52 }
  0x3e   : > { %1932 = dma.hbm_to_vmem [thread:$0]  (!%p1927_p8), %s411_s27, 256, %s413_s29, %s401_s20, %s3023_s24, %s3023_s24, %s3022_s23  }
  0x3f   : > { %s2601_s4 = sand.u32 (!%p2498_p3), 1, %s2376_s10  }
  0x40   : > { %s1839_s5 = sshll.u32 (!%p2498_p3), %s2601_s4, 3  ;;  %s427_s7 = scalar_lea.sflag (!%p2498_p3), [#allocation3], %s2601_s4 }
  0x41   : > { %s2607_s6 = scalar_lea.vmem (!%p2498_p3), [#allocation2], %s1839_s5 }
  0x42   : > { %2343 = dma.done.wait (%p2564_p12), %s427_s7, 128  }
  0x43   : > { %2345 = vsyncadd (%p2564_p12), %s427_s7, 4294967168  ;;  %s436_s30 = sand.u32 1, %s2490_s15   ;;  %s1840_s11 = sshll.u32 %s2601_s4, 4 }
  0x44   : > { %s437_s19 = scalar_lea.sflag [#allocation6], %s436_s30  ;;  %s440_s18 = scalar_lea.vmem [#allocation5], %s1840_s11 }
  0x45   : > { %2347 = dma.done.wait (%p2564_p12), %s437_s19, 256  }
  0x46   : > { %2349 = vsyncadd (%p2564_p12), %s437_s19, 4294967040 }
  0x47   : > { %2351 = dma.done.wait (%p69_p1), [#allocation6], 512  }
  0x48   : > { %2353 = vsyncadd (%p69_p1), [#allocation6], 4294966784 }
  0x49   : > { %2355 = dma.done.wait (%p69_p1), [#allocation9], 1024  }
  0x4a   : > { %2357 = vsyncadd (%p69_p1), [#allocation9], 4294966272 }
  0x4b   : > { %2359 = dma.done.wait (%p69_p1), [#allocation12], 1024  }
  0x4c   : > { %2361 = vsyncadd (%p69_p1), [#allocation12], 4294966272  ;;  %v574_v0 = vld [vmem:[#allocation10 + $0x18] sm:$0xff]  ;;  %v573_v1 = vld [vmem:[#allocation10 + $0x10] sm:$0xff]  ;;  %vm513_vm0 = vcmask 261120   ;;  %v2401_v9 = vmov 32.0  }
  0x4d   : > { %v511_v2 = vld [vmem:[%s2607_s6] sm:$0xff]  ;;  %593 = vmatpush.msra.mxu1 %v574_v0  ;;  %v572_v4 = vld [vmem:[#allocation10 + $0x8] sm:$0xff]  ;;  %v571_v6 = vld [vmem:[#allocation10] sm:$0xff]  ;;  %2031 = vrcp.f32 %v2401_v9  ;;  %s2402_s15 = smov 104   ;;  %s2403_s2 = smov 120   ;;  %vm642_vm5 = vcmask 1047556  }
  0x4e   : > { %v512_v3 = vmul.f32 %v511_v2, %v511_v2  ;;  %v2633_v7 = vld [vmem:[%s440_s18] sm:$0xff]  ;;  %v2637_v8 = vld [vmem:[%s440_s18 + $0x8] sm:$0xff]  ;;  %s2404_s16 = smov 112   ;;  %v2405_v36 = vmov 1983009808   ;;  %vm1236_vm6 = vcmask 64512  }
  0x4f   : > { %594 = vmatpush.msra.mxu1 %v573_v1  ;;  %v547_v13 = vld [vmem:[#allocation8 + $0x18] sm:$0xff]  ;;  %v546_v14 = vld [vmem:[#allocation8 + $0x10] sm:$0xff]  ;;  %v545_v16 = vld [vmem:[#allocation8 + $0x8] sm:$0xff]  ;;  %v647_v37 = vunpack.c.l.s4 %v2405_v36  ;;  %v2406_v46 = vmov 1934713408   ;;  %s1847_s17 = sshll.u32 %s2601_s4, 5 }
  0x50   : > { %v514_v5 = vsel %vm513_vm0, %v512_v3, 0.0  ;;  %563 = vmatpush.msra.mxu0 %v547_v13  ;;  %v544_v17 = vld [vmem:[#allocation8] sm:$0xff]  ;;  %v2030_v30 = vld [vmem:[%s2988_s3] ss:$0 sm:$0xff]  ;;  %v671_v47 = vunpack.c.l.s4 %v2406_v46  ;;  %vm1353_vm7 = vcmask 130048   ;;  %s2802_s25 = scalar_lea.vmem [#allocation15], %s1847_s17 }
  0x51   : > { %515 = vadd.xlane.f32.xlu0 %v514_v5  ;;  %595 = vmatpush.msra.mxu1 %v572_v4  ;;  %v2651_v41 = vunpack.c.0.s8 %v647_v37  ;;  %s1631_s21 = sshll.u32 %s2802_s25, 4  ;;  %s1881_s26 = sshll.u32 %s2384_s12, 5  ;;  %s1632_s21 = int_to_ptr.vmem [resolvable:$true] %s1631_s21 }
  0x52   : > { %564 = vmatpush.msra.mxu0 %v546_v14  ;;  %v2657_v51 = vunpack.c.0.s8 %v671_v47  ;;  %s1630_s23 = scalar_lea.hbm %s2994_s9, %s1881_s26  ;;  %s1603_s7 = scalar_lea.sflag [#allocation16], %s2601_s4 }
  0x53   : > { %596 = vmatpush.msra.mxu1 %v571_v6  ;;  %v2032_v10 = vpop.eup %2031  ;;  %s1633_s24 = sshll.u32 %s1630_s23, 4  ;;  %s1634_s24 = int_to_ptr.hbm [resolvable:$true] %s1633_s24 }
  0x54   : > { %1849 = vmatmul.msk.f32.vlgmr.msra.gmra.mxu1 %vm513_vm0, %v2633_v7  ;;  %v518_v11 = vmul.f32 32.0, %v2032_v10  ;;  %565 = vmatpush.msra.mxu0 %v545_v16  ;;  %vm522_vm1 = vweird.f32 %v2032_v10  ;;  %s2276_s30 = sshra.s32 %s1634_s24, 4  ;;  %s2277_s30 = int_to_ptr.hbm [resolvable:$true] %s2276_s30 }
  0x55   : > { %s2278_s11 = scalar_lea.hbm %s2277_s30, 32  ;;  %p2283_p10 = scmp.lt.s32.totalorder %s2277_s30, %s2994_s9 }
  0x56   : > { %v519_v12 = vsub.f32 1.0, %v518_v11  ;;  %566 = vmatpush.msra.mxu0 %v544_v17  ;;  %p2279_p1 = scmp.ne.s32.totalorder %s2277_s30, %s2278_s11 }
  0x58   : > { %v520_v15 = vmul.f32 %v2032_v10, %v519_v12  ;;  %p2280_p3 = pnand %p2279_p1, %p2571_p4 }
  0x5a   : > { %v521_v18 = vadd.f32 %v2032_v10, %v520_v15  ;;  %p2281_p9 = pneg %p2280_p3 }
  0x5c   : > { %1850 = vmatmul.msk.f32.gmra.mxu1 %vm513_vm0, %v2637_v8  ;;  %v523_v19 = vsel %vm522_vm1, %v2032_v10, %v521_v18 }
  0xc4   : > { %v516_v20 = vpop.xlane.xlu0 %515 }
  0xc5   : > { %v524_v21 = vmul.f32 %v523_v19, %v516_v20 }
  0xc7   : > { %v525_v22 = vadd.f32 1e-06, %v524_v21 }
  0xc9   : > { %2033 = vrsqrt.f32 %v525_v22  ;;  %vm532_vm3 = vweird.f32 %v525_v22 }
  0xcf   : > { %v2034_v23 = vpop.eup %2033 }
  0xd0   : > { %v527_v24 = vmul.f32 %v2034_v23, %v525_v22  ;;  %vm533_vm2 = vweird.f32 %v2034_v23 }
  0xd1   : > { %v598_v26 = vpop.f32.mrf.mxu1  ;;  %vm534_vm4 = vmor %vm532_vm3, %vm533_vm2 }
  0xd2   : > { %v528_v25 = vmul.f32 %v2034_v23, %v527_v24  ;;  %766 = vrot.lane.b32.xlu1 %v598_v26, %s2402_s15  ;;  %754 = vrot.lane.b32.xlu2 %v598_v26, %s2403_s2  ;;  %v774_v39 = vrot.slane %v598_v26, 4 }
  0xd4   : > { %v529_v27 = vmul.f32 0.5, %v528_v25 }
  0xd6   : > { %v530_v28 = vsub.f32 1.5, %v529_v27 }
  0xd8   : > { %v531_v29 = vmul.f32 %v2034_v23, %v530_v28 }
  0xd9   : > { %v601_v31 = vpop.f32.mrf.mxu1 }
  0xda   : > { %v535_v32 = vsel %vm534_vm4, %v2034_v23, %v531_v29  ;;  %762 = vrot.lane.b32.xlu1 %v601_v31, %s2404_s16  ;;  %756 = vrot.lane.b32.xlu0 %v601_v31, %s2403_s2  ;;  %v830_v1 = vrot.slane %v601_v31, 4 }
  0xdb   : > { %v536_v33 = vmul.f32 %v535_v32, %v511_v2  ;;  %760 = vrot.lane.b32.xlu2 %v598_v26, %s2404_s16 }
  0xdd   : > { %v541_v34 = vmul.f32 %v2030_v30, %v536_v33 }
  0xdf   : > { %1848 = vmatmul.msk.f32.vlgmr.msra.gmra.mxu0 %vm513_vm0, %v541_v34 }
  0xe2   : > { %768 = vrot.lane.b32.xlu1 %v601_v31, %s2402_s15 }
 0x12c   : > { %v755_v35 = vpop.permute.xlu2 %754 }
 0x12d   : > { %v786_v45 = vrot.slane %v755_v35, 4 }
 0x135   : > { %v761_v38 = vpop.permute.xlu2 %760 }
 0x136   : > { %v772_v40 = vrot.slane %v761_v38, 4  ;;  %v775_v42 = vsel %vm642_vm5, %v761_v38, %v774_v39 }
 0x137   : > { %v783_v44 = vperm.slane %v775_v42, %v2651_v41 }
 0x138   : > { %v773_v43 = vsel %vm642_vm5, %v772_v40, %v598_v26 }
 0x139   : > { %v779_v48 = vperm.slane %v773_v43, %v2651_v41  ;;  %v810_v49 = vrot.slane %v783_v44, 4 }
 0x13b   : > { %v798_v54 = vrot.slane %v779_v48, 4 }
 0x144   : > { %v767_v50 = vpop.permute.xlu1 %766 }
 0x145   : > { %v784_v52 = vrot.slane %v767_v50, 4  ;;  %v787_v53 = vsel %vm642_vm5, %v767_v50, %v786_v45 }
 0x146   : > { %v795_v55 = vperm.slane %v787_v53, %v2651_v41 }
 0x147   : > { %v785_v56 = vsel %vm642_vm5, %v784_v52, %v755_v35 }
 0x148   : > { %v791_v57 = vperm.slane %v785_v56, %v2651_v41  ;;  %v808_v58 = vrot.slane %v795_v55, 4  ;;  %v811_v59 = vsel %vm642_vm5, %v795_v55, %v810_v49 }
 0x149   : > { %v819_v60 = vperm.slane %v811_v59, %v2657_v51 }
 0x14a   : > { %v796_v61 = vrot.slane %v791_v57, 4  ;;  %v799_v62 = vsel %vm642_vm5, %v791_v57, %v798_v54  ;;  %v809_v63 = vsel %vm642_vm5, %v808_v58, %v783_v44 }
 0x14b   : > { %v807_v0 = vperm.slane %v799_v62, %v2657_v51  ;;  %v815_v3 = vperm.slane %v809_v63, %v2657_v51  ;;  %v826_v4 = vrot.slane %v819_v60, 4 }
 0x14c   : > { %v797_v2 = vsel %vm642_vm5, %v796_v61, %v779_v48  ;;  %v763_v5 = vpop.permute.xlu1 %762  ;;  %v757_v11 = vpop.permute.xlu0 %756 }
 0x14d   : > { %v803_v6 = vperm.slane %v797_v2, %v2657_v51  ;;  %v822_v9 = vrot.slane %v807_v0, 4  ;;  %v828_v10 = vrot.slane %v763_v5, 4  ;;  %v831_v12 = vsel %vm642_vm5, %v763_v5, %v830_v1 }
 0x14e   : > { %v824_v13 = vrot.slane %v815_v3, 4  ;;  %v827_v14 = vsel %vm642_vm5, 0.0, %v826_v4  ;;  %v842_v16 = vrot.slane %v757_v11, 4  ;;  %v839_v19 = vperm.slane %v831_v12, %v2651_v41 }
 0x14f   : > { %v829_v15 = vsel %vm642_vm5, %v828_v10, %v601_v31  ;;  %v820_v17 = vrot.slane %v803_v6, 4  ;;  %v823_v18 = vsel %vm642_vm5, 0.0, %v822_v9  ;;  %v900_v20 = vrot.slane %v827_v14, 4 }
 0x150   : > { %v825_v21 = vsel %vm642_vm5, 0.0, %v824_v13  ;;  %v835_v22 = vperm.slane %v829_v15, %v2651_v41  ;;  %v889_v24 = vrot.slane %v823_v18, 4  ;;  %v866_v27 = vrot.slane %v839_v19, 4 }
 0x151   : > { %v821_v29 = vsel %vm642_vm5, 0.0, %v820_v17  ;;  %v901_v30 = vsel %vm642_vm5, %v900_v20, %v825_v21  ;;  %v895_v43 = vsel %vm642_vm5, %v826_v4, %v815_v3  ;;  %v884_v49 = vsel %vm642_vm5, %v822_v9, %v803_v6 }
 0x152   : > { %v854_v32 = vrot.slane %v835_v22, 4  ;;  %v890_v37 = vsel %vm642_vm5, %v889_v24, %v821_v29  ;;  %v905_v42 = vperm.slane %v901_v30, %v2651_v41  ;;  %v899_v58 = vperm.slane %v895_v43, %v2651_v41 }
 0x153   : > { %v894_v50 = vperm.slane %v890_v37, %v2651_v41  ;;  %v888_v10 = vperm.slane %v884_v49, %v2651_v41 }
 0x154   : > { %v769_v23 = vpop.permute.xlu1 %768  ;;  %v918_v59 = vrot.slane %v905_v42, 4  ;;  %v920_v17 = vrot.slane %v899_v58, 4 }
 0x155   : > { %v840_v25 = vrot.slane %v769_v23, 4  ;;  %v843_v26 = vsel %vm642_vm5, %v769_v23, %v842_v16  ;;  %v906_v6 = vrot.slane %v894_v50, 4  ;;  %v908_v24 = vrot.slane %v888_v10, 4 }
 0x156   : > { %v851_v28 = vperm.slane %v843_v26, %v2651_v41  ;;  %v919_v15 = vsel %vm642_vm5, %v918_v59, %v899_v58  ;;  %v921_v30 = vsel %vm642_vm5, %v905_v42, %v920_v17 }
 0x157   : > { %v841_v31 = vsel %vm642_vm5, %v840_v25, %v757_v11  ;;  %v907_v20 = vsel %vm642_vm5, %v906_v6, %v888_v10  ;;  %v929_v37 = vperm.slane %v921_v30, %v2657_v51 }
 0x158   : > { %v847_v33 = vperm.slane %v841_v31, %v2651_v41  ;;  %v864_v34 = vrot.slane %v851_v28, 4  ;;  %v867_v35 = vsel %vm642_vm5, %v851_v28, %v866_v27  ;;  %v913_v29 = vperm.slane %v907_v20, %v2657_v51 }
 0x159   : > { %v875_v36 = vperm.slane %v867_v35, %v2657_v51  ;;  %v909_v35 = vsel %vm642_vm5, %v894_v50, %v908_v24 }
 0x15a   : > { %v852_v38 = vrot.slane %v847_v33, 4  ;;  %v855_v39 = vsel %vm642_vm5, %v847_v33, %v854_v32  ;;  %v865_v40 = vsel %vm642_vm5, %v864_v34, %v839_v19  ;;  %v917_v42 = vperm.slane %v909_v35, %v2657_v51 }
 0x15b   : > { %v863_v44 = vperm.slane %v855_v39, %v2657_v51  ;;  %v871_v45 = vperm.slane %v865_v40, %v2657_v51  ;;  %v882_v46 = vrot.slane %v875_v36, 4  ;;  %v932_v39 = vrot.slane %v913_v29, 4 }
 0x15c   : > { %v2693_v47 = vpop.f32.mrf.mxu0  ;;  %v853_v48 = vsel %vm642_vm5, %v852_v38, %v835_v22  ;;  %v925_v22 = vperm.slane %v919_v15, %v2657_v51  ;;  %v936_v49 = vrot.slane %v917_v42, 4 }
 0x15d   : > { %635 = vrot.lane.b32.xlu1 %v2693_v47, %s2404_s16  ;;  %632 = vrot.lane.b32.xlu2 %v2693_v47, %s2403_s2  ;;  %v859_v52 = vperm.slane %v853_v48, %v2657_v51  ;;  %v878_v53 = vrot.slane %v863_v44, 4  ;;  %v880_v54 = vrot.slane %v871_v45, 4  ;;  %v883_v55 = vsel %vm642_vm5, 0.0, %v882_v46 }
 0x15e   : > { %v949_v56 = vsel %vm642_vm5, %v882_v46, %v871_v45  ;;  %v954_v57 = vrot.slane %v883_v55, 4  ;;  %v930_v34 = vrot.slane %v925_v22, 4  ;;  %v934_v45 = vrot.slane %v929_v37, 4 }
 0x15f   : > { %v876_v60 = vrot.slane %v859_v52, 4  ;;  %v879_v61 = vsel %vm642_vm5, 0.0, %v878_v53  ;;  %v881_v62 = vsel %vm642_vm5, 0.0, %v880_v54  ;;  %v938_v63 = vsel %vm642_vm5, %v878_v53, %v859_v52 }
 0x160   : > { %v943_v0 = vrot.slane %v879_v61, 4  ;;  %v942_v1 = vperm.slane %v938_v63, %v2651_v41  ;;  %v953_v2 = vperm.slane %v949_v56, %v2651_v41  ;;  %v955_v3 = vsel %vm642_vm5, %v954_v57, %v881_v62 }
 0x161   : > { %v877_v4 = vsel %vm642_vm5, 0.0, %v876_v60  ;;  %v959_v5 = vperm.slane %v955_v3, %v2651_v41  ;;  %v931_v43 = vsel %vm642_vm5, %v930_v34, %v913_v29  ;;  %v933_v46 = vsel %vm642_vm5, %v925_v22, %v932_v39 }
 0x162   : > { %v944_v9 = vsel %vm642_vm5, %v943_v0, %v877_v4  ;;  %v962_v11 = vrot.slane %v942_v1, 4  ;;  %v974_v12 = vrot.slane %v953_v2, 4  ;;  %v935_v50 = vsel %vm642_vm5, %v934_v45, %v917_v42  ;;  %v607_v4 = vld [vmem:[#allocation11 + $0x18] sm:$0xff] }
 0x163   : > { %v948_v13 = vperm.slane %v944_v9, %v2651_v41  ;;  %v972_v14 = vrot.slane %v959_v5, 4  ;;  %v937_v52 = vsel %vm642_vm5, %v929_v37, %v936_v49  ;;  %v644_v60 = vrot.slane %v2693_v47, 4  ;;  %620 = vmatpush.msra.mxu2 %v607_v4 }
 0x164   : > { %v975_v16 = vsel %vm642_vm5, %v959_v5, %v974_v12  ;;  %v606_v5 = vld [vmem:[#allocation11 + $0x10] sm:$0xff] }
 0x165   : > { %638 = vrot.lane.b32.xlu2 %v2693_v47, %s2402_s15  ;;  %v960_v18 = vrot.slane %v948_v13, 4  ;;  %v973_v19 = vsel %vm642_vm5, %v972_v14, %v953_v2  ;;  %v963_v23 = vsel %vm642_vm5, %v948_v13, %v962_v11  ;;  %v983_v26 = vperm.slane %v975_v16, %v2657_v51  ;;  %v605_v13 = vld [vmem:[#allocation11 + $0x8] sm:$0xff]  ;;  %621 = vmatpush.msra.mxu2 %v606_v5 }
 0x166   : > { %v979_v21 = vperm.slane %v973_v19, %v2657_v51  ;;  %v971_v31 = vperm.slane %v963_v23, %v2657_v51 }
 0x167   : > { %v961_v25 = vsel %vm642_vm5, %v960_v18, %v942_v1  ;;  %v988_v36 = vrot.slane %v983_v26, 4  ;;  %v604_v18 = vld [vmem:[#allocation11] sm:$0xff]  ;;  %622 = vmatpush.msra.mxu2 %v605_v13 }
 0x168   : > { %v967_v27 = vperm.slane %v961_v25, %v2657_v51  ;;  %v984_v28 = vrot.slane %v979_v21, 4  ;;  %v990_v40 = vrot.slane %v971_v31, 4 }
 0x169   : > { %v989_v44 = vsel %vm642_vm5, %v988_v36, %v971_v31  ;;  %623 = vmatpush.msra.mxu2 %v604_v18 }
 0x16a   : > { %v985_v32 = vsel %vm642_vm5, %v984_v28, %v967_v27  ;;  %v986_v33 = vrot.slane %v967_v27, 4  ;;  %v991_v48 = vsel %vm642_vm5, %v983_v26, %v990_v40  ;;  %1851 = vmatmul.msk.f32.vlgmr.msra.gmra.mxu2 %vm513_vm0, %v2633_v7 }
 0x16b   : > { %1853 = vmatpush.xpose.msk.msra.mxu3 %vm1236_vm6, %v985_v32 }
 0x16c   : > { %v987_v38 = vsel %vm642_vm5, %v979_v21, %v986_v33 }
 0x16d   : > { %1856 = vmatpush.xpose.msk.msrb.mxu0 %vm1236_vm6, %v987_v38 }
 0x16f   : > { %1854 = vmatpush.xpose.msk.msra.mxu3 %vm1236_vm6, %v931_v43 }
 0x171   : > { %1857 = vmatpush.xpose.msk.msrb.mxu0 %vm1236_vm6, %v933_v46 }
 0x172   : > { %1852 = vmatmul.msk.f32.gmra.mxu2 %vm513_vm0, %v2637_v8 }
 0x173   : > { %1859 = vmatpush.xpose.msk.msrb.mxu3 %vm1236_vm6, %v989_v44 }
 0x175   : > { %1862 = vmatpush.xpose.msk.msra.mxu0 %vm1236_vm6, %v991_v48 }
 0x177   : > { %1860 = vmatpush.xpose.msk.msrb.mxu3 %vm1236_vm6, %v935_v50 }
 0x179   : > { %1863 = vmatpush.xpose.msk.msra.mxu0 %vm1236_vm6, %v937_v52 }
 0x1b7   : > { %v633_v53 = vpop.permute.xlu2 %632 }
 0x1b8   : > { %v656_v55 = vrot.slane %v633_v53, 4 }
 0x1bf   : > { %v639_v54 = vpop.permute.xlu2 %638 }
 0x1c0   : > { %v654_v56 = vrot.slane %v639_v54, 4  ;;  %v657_v57 = vsel %vm642_vm5, %v639_v54, %v656_v55 }
 0x1c1   : > { %v665_v59 = vperm.slane %v657_v57, %v2651_v41 }
 0x1c2   : > { %v655_v58 = vsel %vm642_vm5, %v654_v56, %v633_v53 }
 0x1c3   : > { %v661_v61 = vperm.slane %v655_v58, %v2651_v41  ;;  %v678_v1 = vrot.slane %v665_v59, 4 }
 0x1c5   : > { %v666_v6 = vrot.slane %v661_v61, 4 }
 0x1cf   : > { %v636_v62 = vpop.permute.xlu1 %635 }
 0x1d0   : > { %v641_v63 = vrot.slane %v636_v62, 4  ;;  %v645_v0 = vsel %vm642_vm5, %v636_v62, %v644_v60  ;;  %v1233_v60 = vld [vmem:[#allocation7 + $0x8] sm:$0xff] }
 0x1d1   : > { %v653_v2 = vperm.slane %v645_v0, %v2651_v41 }
 0x1d2   : > { %v643_v3 = vsel %vm642_vm5, %v641_v63, %v2693_v47  ;;  %v1232_v63 = vld [vmem:[#allocation7] sm:$0xff] }
 0x1d3   : > { %v649_v9 = vperm.slane %v643_v3, %v2651_v41  ;;  %v679_v10 = vsel %vm642_vm5, %v678_v1, %v653_v2  ;;  %v680_v11 = vrot.slane %v653_v2, 4  ;;  %v1235_v3 = vld [vmem:[#allocation7 + $0x18] sm:$0xff] }
 0x1d4   : > { %v685_v12 = vperm.slane %v679_v10, %v2657_v51 }
 0x1d5   : > { %v667_v14 = vsel %vm642_vm5, %v666_v6, %v649_v9  ;;  %v668_v15 = vrot.slane %v649_v9, 4  ;;  %v681_v16 = vsel %vm642_vm5, %v665_v59, %v680_v11  ;;  %v1234_v9 = vld [vmem:[#allocation7 + $0x10] sm:$0xff] }
 0x1d6   : > { %v673_v47 = vperm.slane %v667_v14, %v2657_v51  ;;  %v689_v17 = vperm.slane %v681_v16, %v2657_v51  ;;  %v694_v21 = vrot.slane %v685_v12, 4 }
 0x1d7   : > { %v669_v19 = vsel %vm642_vm5, %v661_v61, %v668_v15 }
 0x1d8   : > { %v677_v20 = vperm.slane %v669_v19, %v2657_v51  ;;  %v696_v22 = vrot.slane %v689_v17, 4  ;;  %v690_v23 = vrot.slane %v673_v47, 4  ;;  %v695_v29 = vsel %vm642_vm5, 0.0, %v694_v21 }
 0x1da   : > { %v692_v24 = vrot.slane %v677_v20, 4  ;;  %v697_v25 = vsel %vm642_vm5, 0.0, %v696_v22  ;;  %v709_v26 = vsel %vm642_vm5, %v696_v22, %v685_v12  ;;  %v691_v34 = vsel %vm642_vm5, 0.0, %v690_v23 }
 0x1db   : > { %v714_v27 = vrot.slane %v697_v25, 4  ;;  %v713_v31 = vperm.slane %v709_v26, %v2651_v41 }
 0x1dc   : > { %v693_v28 = vsel %vm642_vm5, 0.0, %v692_v24  ;;  %v698_v30 = vsel %vm642_vm5, %v692_v24, %v673_v47 }
 0x1dd   : > { %v703_v32 = vrot.slane %v693_v28, 4  ;;  %v715_v33 = vsel %vm642_vm5, %v714_v27, %v695_v29  ;;  %v702_v36 = vperm.slane %v698_v30, %v2651_v41  ;;  %v734_v39 = vrot.slane %v713_v31, 4 }
 0x1de   : > { %v719_v35 = vperm.slane %v715_v33, %v2651_v41 }
 0x1df   : > { %v704_v7 = vsel %vm642_vm5, %v703_v32, %v691_v34  ;;  %v722_v43 = vrot.slane %v702_v36, 4 }
 0x1e0   : > { %v708_v37 = vperm.slane %v704_v7, %v2651_v41  ;;  %v732_v38 = vrot.slane %v719_v35, 4  ;;  %v735_v46 = vsel %vm642_vm5, %v719_v35, %v734_v39 }
 0x1e1   : > { %v743_v54 = vperm.slane %v735_v46, %v2657_v51 }
 0x1e2   : > { %v720_v40 = vrot.slane %v708_v37, 4  ;;  %v733_v42 = vsel %vm642_vm5, %v732_v38, %v713_v31  ;;  %v723_v50 = vsel %vm642_vm5, %v708_v37, %v722_v43 }
 0x1e3   : > { %v739_v44 = vperm.slane %v733_v42, %v2657_v51  ;;  %v731_v55 = vperm.slane %v723_v50, %v2657_v51  ;;  %v748_v56 = vrot.slane %v743_v54, 4 }
 0x1e4   : > { %v721_v45 = vsel %vm642_vm5, %v720_v40, %v702_v36 }
 0x1e5   : > { %v727_v48 = vperm.slane %v721_v45, %v2657_v51  ;;  %v744_v49 = vrot.slane %v739_v44, 4  ;;  %v750_v57 = vrot.slane %v731_v55, 4  ;;  %v749_v58 = vsel %vm642_vm5, %v748_v56, %v731_v55 }
 0x1e7   : > { %v745_v52 = vsel %vm642_vm5, %v744_v49, %v727_v48  ;;  %v746_v53 = vrot.slane %v727_v48, 4  ;;  %v751_v59 = vsel %vm642_vm5, %v743_v54, %v750_v57 }
 0x1e8   : > { %1855 = vmatmul.msk.f32.vlgmr.msra.gmra.mxu3 %vm1236_vm6, %v745_v52 }
 0x1e9   : > { %v747_v8 = vsel %vm642_vm5, %v739_v44, %v746_v53 }
 0x1ea   : > { %1858 = vmatmul.msk.f32.vlgmr.msrb.gmra.mxu0 %vm1236_vm6, %v747_v8 }
 0x1ed   : > { %v625_v13 = vpop.f32.mrf.mxu2 }
 0x1ee   : > { %v1014_v37 = vrot.slane %v625_v13, 4 }
 0x1f0   : > { %1861 = vmatmul.msk.f32.vlgmr.msrb.gmra.mxu3 %vm1236_vm6, %v749_v58 }
 0x1f2   : > { %1864 = vmatmul.msk.f32.vlgmr.msra.gmra.mxu0 %vm1236_vm6, %v751_v59 }
 0x1f5   : > { %v628_v15 = vpop.f32.mrf.mxu2 }
 0x1f6   : > { %v2015_v16 = vpack.i.bf16 %v625_v13, %v628_v15  ;;  %v1070_v40 = vrot.slane %v628_v15, 4 }
 0x267   : > { %v1292_v61 = vpop.f32.mrf.mxu0 }
 0x268   : > { %v1293_v62 = vadd.f32 %v1292_v61, %v1233_v60 }
 0x26a   : > { %1355 = vst.msk [vmem:[%s2802_s25 + $0x8] sm:$0xff] %vm1353_vm7, %v1293_v62  ;;  %v1361_v0 = vsel %vm1353_vm7, %v1293_v62, -inf }
 0x26b   : > { %1362 = vmax.xlane.f32.xlu2 %v1361_v0  ;;  %v1263_v1 = vpop.f32.mrf.mxu3 }
 0x26c   : > { %v1264_v2 = vadd.f32 %v1263_v1, %v1232_v63 }
 0x26e   : > { %1354 = vst.msk [vmem:[%s2802_s25] sm:$0xff] %vm1353_vm7, %v1264_v2  ;;  %v1358_v4 = vsel %vm1353_vm7, %v1264_v2, -inf }
 0x26f   : > { %v1350_v5 = vpop.f32.mrf.mxu0  ;;  %1359 = vmax.xlane.f32.xlu1 %v1358_v4 }
 0x270   : > { %v1351_v6 = vadd.f32 %v1350_v5, %v1235_v3 }
 0x272   : > { %1357 = vst.msk [vmem:[%s2802_s25 + $0x18] sm:$0xff] %vm1353_vm7, %v1351_v6  ;;  %v1367_v10 = vsel %vm1353_vm7, %v1351_v6, -inf }
 0x273   : > { %1368 = vmax.xlane.f32.xlu0 %v1367_v10  ;;  %v1321_v11 = vpop.f32.mrf.mxu3 }
 0x274   : > { %v1322_v12 = vadd.f32 %v1321_v11, %v1234_v9 }
 0x276   : > { %1356 = vst.msk [vmem:[%s2802_s25 + $0x10] sm:$0xff] %vm1353_vm7, %v1322_v12  ;;  %v1364_v14 = vsel %vm1353_vm7, %v1322_v12, -inf }
 0x27b   : > { %1365 = vmax.xlane.f32.xlu0 %v1364_v14 }
 0x283   : > { %2016 = vrot.lane.b32.xlu2 %v2015_v16, %s2403_s2 }
 0x288   : > { %2021 = vrot.lane.b32.xlu1 %v2015_v16, %s2404_s16 }
 0x28f   : > { %2026 = vrot.lane.b32.xlu0 %v2015_v16, %s2402_s15  ;;  %s2282_s15 = scalar_lea.hbm %s2994_s9, 64 }
 0x290   : > { %p2284_p11 = scmp.lt.s32.totalorder %s2282_s15, %s2278_s11 }
 0x292   : > { %p2285_p12 = por %p2284_p11, %p2283_p10 }
 0x294   : > { %p2286_p13 = pnand %p2285_p12, %p2281_p9 }
 0x2de   : > { %v1363_v47 = vpop.xlane.xlu2 %1362 }
 0x2df   : > { %v1371_v17 = vsub.f32 %v1293_v62, %v1363_v47 }
 0x2e1   : > { %v1376_v18 = vmul.f32 1.442695, %v1371_v17 }
 0x2e2   : > { %v1360_v19 = vpop.xlane.xlu1 %1359 }
 0x2e3   : > { %2035 = vpow2.f32 %v1376_v18  ;;  %v1370_v20 = vsub.f32 %v1264_v2, %v1360_v19 }
 0x2e5   : > { %v1374_v21 = vmul.f32 1.442695, %v1370_v20 }
 0x2e6   : > { %v1369_v22 = vpop.xlane.xlu0 %1368  ;;  %v2017_v33 = vpop.permute.xlu2 %2016 }
 0x2e7   : > { %2037 = vpow2.f32 %v1374_v21  ;;  %v1373_v29 = vsub.f32 %v1351_v6, %v1369_v22  ;;  %v2019_v38 = vunpack.i.h.bf16 %v2017_v33  ;;  %v2018_v39 = vunpack.i.l.bf16 %v2017_v33 }
 0x2e9   : > { %v2819_v23 = vpop.eup %2035  ;;  %v1380_v31 = vmul.f32 1.442695, %v1373_v29  ;;  %v1026_v50 = vrot.slane %v2019_v38, 4  ;;  %v1082_v52 = vrot.slane %v2018_v39, 4 }
 0x2ea   : > { %v1385_v24 = vsel %vm1353_vm7, %v2819_v23, 0.0 }
 0x2eb   : > { %1386 = vadd.xlane.f32.xlu1 %v1385_v24 }
 0x2ed   : > { %v2823_v25 = vpop.eup %2037 }
 0x2ee   : > { %v1366_v26 = vpop.xlane.xlu0 %1365  ;;  %v1382_v27 = vsel %vm1353_vm7, %v2823_v25, 0.0 }
 0x2ef   : > { %v1372_v28 = vsub.f32 %v1322_v12, %v1366_v26  ;;  %1383 = vadd.xlane.f32.xlu0 %v1382_v27 }
 0x2f1   : > { %v1378_v30 = vmul.f32 1.442695, %v1372_v28 }
 0x2f3   : > { %2039 = vpow2.f32 %v1378_v30 }
 0x2f4   : > { %2041 = vpow2.f32 %v1380_v31 }
 0x2f9   : > { %v2827_v32 = vpop.eup %2039 }
 0x2fa   : > { %v2022_v34 = vpop.permute.xlu1 %2021  ;;  %v1388_v35 = vsel %vm1353_vm7, %v2827_v32, 0.0  ;;  %v2831_v44 = vpop.eup %2041 }
 0x2fb   : > { %v2024_v36 = vunpack.i.h.bf16 %v2022_v34  ;;  %v2023_v7 = vunpack.i.l.bf16 %v2022_v34  ;;  %1389 = vadd.xlane.f32.xlu2 %v1388_v35  ;;  %v1391_v8 = vsel %vm1353_vm7, %v2831_v44, 0.0 }
 0x2fd   : > { %v1012_v42 = vrot.slane %v2024_v36, 4  ;;  %v1068_v43 = vrot.slane %v2023_v7, 4  ;;  %v1015_v45 = vsel %vm642_vm5, %v2024_v36, %v1014_v37  ;;  %v1071_v48 = vsel %vm642_vm5, %v2023_v7, %v1070_v40 }
 0x2fe   : > { %v1023_v53 = vperm.slane %v1015_v45, %v2651_v41  ;;  %v1079_v56 = vperm.slane %v1071_v48, %v2651_v41 }
 0x2ff   : > { %v1013_v46 = vsel %vm642_vm5, %v1012_v42, %v625_v13  ;;  %v1069_v49 = vsel %vm642_vm5, %v1068_v43, %v628_v15 }
 0x300   : > { %v1019_v55 = vperm.slane %v1013_v46, %v2651_v41  ;;  %v1075_v59 = vperm.slane %v1069_v49, %v2651_v41  ;;  %v1050_v0 = vrot.slane %v1023_v53, 4  ;;  %v1106_v4 = vrot.slane %v1079_v56, 4 }
 0x301   : > { %v2027_v54 = vpop.permute.xlu0 %2026 }
 0x302   : > { %v2029_v57 = vunpack.i.h.bf16 %v2027_v54  ;;  %v2028_v58 = vunpack.i.l.bf16 %v2027_v54  ;;  %v1038_v3 = vrot.slane %v1019_v55, 4  ;;  %v1094_v13 = vrot.slane %v1075_v59, 4 }
 0x303   : > { %1392 = vadd.xlane.f32.xlu2 %v1391_v8 }
 0x304   : > { %v1024_v60 = vrot.slane %v2029_v57, 4  ;;  %v1027_v61 = vsel %vm642_vm5, %v2029_v57, %v1026_v50  ;;  %v1080_v62 = vrot.slane %v2028_v58, 4  ;;  %v1083_v63 = vsel %vm642_vm5, %v2028_v58, %v1082_v52 }
 0x305   : > { %v1035_v1 = vperm.slane %v1027_v61, %v2651_v41  ;;  %v1091_v2 = vperm.slane %v1083_v63, %v2651_v41 }
 0x306   : > { %v1025_v5 = vsel %vm642_vm5, %v1024_v60, %v2019_v38  ;;  %v1081_v6 = vsel %vm642_vm5, %v1080_v62, %v2018_v39 }
 0x307   : > { %v1031_v9 = vperm.slane %v1025_v5, %v2651_v41  ;;  %v1048_v10 = vrot.slane %v1035_v1, 4  ;;  %v1051_v11 = vsel %vm642_vm5, %v1035_v1, %v1050_v0  ;;  %v1087_v12 = vperm.slane %v1081_v6, %v2651_v41 }
 0x308   : > { %v1059_v14 = vperm.slane %v1051_v11, %v2657_v51  ;;  %v1104_v15 = vrot.slane %v1091_v2, 4  ;;  %v1107_v16 = vsel %vm642_vm5, %v1091_v2, %v1106_v4 }
 0x309   : > { %v1036_v47 = vrot.slane %v1031_v9, 4  ;;  %v1039_v17 = vsel %vm642_vm5, %v1031_v9, %v1038_v3  ;;  %v1049_v18 = vsel %vm642_vm5, %v1048_v10, %v1023_v53  ;;  %v1092_v19 = vrot.slane %v1087_v12, 4 }
 0x30a   : > { %v1047_v20 = vperm.slane %v1039_v17, %v2657_v51  ;;  %v1055_v21 = vperm.slane %v1049_v18, %v2657_v51  ;;  %v1066_v22 = vrot.slane %v1059_v14, 4  ;;  %v1095_v24 = vsel %vm642_vm5, %v1087_v12, %v1094_v13 }
 0x30b   : > { %v1037_v26 = vsel %vm642_vm5, %v1036_v47, %v1019_v55  ;;  %v1093_v27 = vsel %vm642_vm5, %v1092_v19, %v1075_v59  ;;  %v1103_v28 = vperm.slane %v1095_v24, %v2657_v51  ;;  %v1105_v29 = vsel %vm642_vm5, %v1104_v15, %v1079_v56 }
 0x30c   : > { %v1043_v30 = vperm.slane %v1037_v26, %v2657_v51  ;;  %v1062_v31 = vrot.slane %v1047_v20, 4  ;;  %v1064_v33 = vrot.slane %v1055_v21, 4  ;;  %v1067_v34 = vsel %vm642_vm5, 0.0, %v1066_v22 }
 0x30d   : > { %v1099_v35 = vperm.slane %v1093_v27, %v2657_v51  ;;  %v1111_v36 = vperm.slane %v1105_v29, %v2657_v51  ;;  %v1115_v7 = vperm.slane %v1107_v16, %v2657_v51  ;;  %v1118_v37 = vrot.slane %v1103_v28, 4 }
 0x30e   : > { %v1063_v38 = vsel %vm642_vm5, 0.0, %v1062_v31  ;;  %v1140_v39 = vrot.slane %v1067_v34, 4  ;;  %v1060_v40 = vrot.slane %v1043_v30, 4  ;;  %v1065_v42 = vsel %vm642_vm5, 0.0, %v1064_v33 }
 0x30f   : > { %v1119_v43 = vsel %vm642_vm5, 0.0, %v1118_v37  ;;  %v1120_v45 = vrot.slane %v1111_v36, 4  ;;  %v1122_v46 = vrot.slane %v1115_v7, 4  ;;  %v1116_v48 = vrot.slane %v1099_v35, 4 }
 0x310   : > { %v1183_v49 = vrot.slane %v1119_v43, 4  ;;  %v1178_v50 = vsel %vm642_vm5, %v1118_v37, %v1099_v35  ;;  %v1061_v52 = vsel %vm642_vm5, 0.0, %v1060_v40  ;;  %v1124_v53 = vsel %vm642_vm5, %v1062_v31, %v1043_v30 }
 0x311   : > { %v1123_v54 = vsel %vm642_vm5, 0.0, %v1122_v46  ;;  %v1189_v8 = vsel %vm642_vm5, %v1122_v46, %v1111_v36  ;;  %v1117_v55 = vsel %vm642_vm5, 0.0, %v1116_v48  ;;  %v1121_v56 = vsel %vm642_vm5, 0.0, %v1120_v45 }
 0x312   : > { %v1194_v57 = vrot.slane %v1123_v54, 4  ;;  %v1182_v58 = vperm.slane %v1178_v50, %v2651_v41  ;;  %v1184_v59 = vsel %vm642_vm5, %v1183_v49, %v1117_v55  ;;  %v1193_v60 = vperm.slane %v1189_v8, %v2651_v41 }
 0x313   : > { %v1188_v61 = vperm.slane %v1184_v59, %v2651_v41  ;;  %v1128_v62 = vperm.slane %v1124_v53, %v2651_v41  ;;  %v1129_v63 = vrot.slane %v1063_v38, 4  ;;  %v1135_v0 = vsel %vm642_vm5, %v1066_v22, %v1055_v21 }
 0x314   : > { %v1195_v1 = vsel %vm642_vm5, %v1194_v57, %v1121_v56  ;;  %v1202_v2 = vrot.slane %v1182_v58, 4  ;;  %v1214_v3 = vrot.slane %v1193_v60, 4  ;;  %v1139_v4 = vperm.slane %v1135_v0, %v2651_v41  ;;  %v1544_v0 = vld [vmem:[#allocation13 + $0x10] sm:$0xff] }
 0x315   : > { %v1199_v5 = vperm.slane %v1195_v1, %v2651_v41  ;;  %v1200_v6 = vrot.slane %v1188_v61, 4  ;;  %v1130_v9 = vsel %vm642_vm5, %v1129_v63, %v1061_v52  ;;  %v1141_v10 = vsel %vm642_vm5, %v1140_v39, %v1065_v42  ;;  %v1570_v1 = vld [vmem:[#allocation13 + $0x18] sm:$0xff] }
 0x316   : > { %v1203_v11 = vsel %vm642_vm5, %v1188_v61, %v1202_v2  ;;  %v1134_v12 = vperm.slane %v1130_v9, %v2651_v41  ;;  %v1145_v13 = vperm.slane %v1141_v10, %v2651_v41  ;;  %v1148_v14 = vrot.slane %v1128_v62, 4 }
 0x317   : > { %v1211_v15 = vperm.slane %v1203_v11, %v2657_v51  ;;  %v1215_v16 = vsel %vm642_vm5, %v1199_v5, %v1214_v3  ;;  %v1201_v47 = vsel %vm642_vm5, %v1200_v6, %v1182_v58  ;;  %v1212_v17 = vrot.slane %v1199_v5, 4 }
 0x318   : > { %v1223_v18 = vperm.slane %v1215_v16, %v2657_v51  ;;  %v1207_v19 = vperm.slane %v1201_v47, %v2657_v51  ;;  %v1149_v20 = vsel %vm642_vm5, %v1134_v12, %v1148_v14  ;;  %v1160_v21 = vrot.slane %v1139_v4, 4 }
 0x319   : > { %v1213_v22 = vsel %vm642_vm5, %v1212_v17, %v1193_v60  ;;  %v1157_v24 = vperm.slane %v1149_v20, %v2657_v51  ;;  %v1230_v41 = vrot.slane %v1211_v15, 4  ;;  %v1146_v26 = vrot.slane %v1134_v12, 4 }
 0x31a   : > { %v1228_v27 = vrot.slane %v1223_v18, 4  ;;  %v1219_v28 = vperm.slane %v1213_v22, %v2657_v51  ;;  %v1161_v29 = vsel %vm642_vm5, %v1145_v13, %v1160_v21  ;;  %v1158_v30 = vrot.slane %v1145_v13, 4 }
 0x31b   : > { %v1169_v31 = vperm.slane %v1161_v29, %v2657_v51  ;;  %v1231_v33 = vsel %vm642_vm5, %v1223_v18, %v1230_v41  ;;  %v1147_v34 = vsel %vm642_vm5, %v1146_v26, %v1128_v62  ;;  %v1226_v35 = vrot.slane %v1207_v19, 4 }
 0x31c   : > { %v1229_v36 = vsel %vm642_vm5, %v1228_v27, %v1211_v15  ;;  %v1224_v7 = vrot.slane %v1219_v28, 4  ;;  %1488 = vmatpush.msrb.mxu0 %v1231_v33  ;;  %v1153_v37 = vperm.slane %v1147_v34, %v2657_v51  ;;  %v1159_v38 = vsel %vm642_vm5, %v1158_v30, %v1139_v4 }
 0x31d   : > { %1465 = vmatpush.msra.mxu3 %v1229_v36  ;;  %v1174_v39 = vrot.slane %v1169_v31, 4  ;;  %v1165_v40 = vperm.slane %v1159_v38, %v2657_v51  ;;  %v1227_v42 = vsel %vm642_vm5, %v1219_v28, %v1226_v35  ;;  %v1176_v43 = vrot.slane %v1157_v24, 4 }
 0x31e   : > { %v1225_v45 = vsel %vm642_vm5, %v1224_v7, %v1207_v19  ;;  %1442 = vmatpush.msrb.mxu2 %v1227_v42  ;;  %v1172_v46 = vrot.slane %v1153_v37, 4 }
 0x31f   : > { %1419 = vmatpush.msrb.mxu1 %v1225_v45  ;;  %v1175_v48 = vsel %vm642_vm5, %v1174_v39, %v1157_v24  ;;  %v1170_v49 = vrot.slane %v1165_v40, 4  ;;  %v1177_v50 = vsel %vm642_vm5, %v1169_v31, %v1176_v43 }
 0x320   : > { %1466 = vmatpush.msra.mxu3 %v1175_v48  ;;  %1489 = vmatpush.msrb.mxu0 %v1177_v50  ;;  %v1173_v52 = vsel %vm642_vm5, %v1165_v40, %v1172_v46 }
 0x321   : > { %v1171_v53 = vsel %vm642_vm5, %v1170_v49, %v1153_v37  ;;  %1443 = vmatpush.msrb.mxu2 %v1173_v52 }
 0x322   : > { %1420 = vmatpush.msrb.mxu1 %v1171_v53  ;;  %1563 = vmatpush.msrb.mxu3 %v1544_v0 }
 0x323   : > { %1589 = vmatpush.msra.mxu0 %v1570_v1 }
 0x35e   : > { %v1387_v51 = vpop.xlane.xlu1 %1386 }
 0x35f   : > { %2043 = vrcp.f32 %v1387_v51 }
 0x362   : > { %v1384_v54 = vpop.xlane.xlu0 %1383 }
 0x363   : > { %2045 = vrcp.f32 %v1384_v54 }
 0x365   : > { %v2044_v8 = vpop.eup %2043 }
 0x366   : > { %v1399_v55 = vmul.f32 %v2044_v8, %v2819_v23  ;;  %v1494_v23 = vld [vmem:[#allocation13] sm:$0xff] }
 0x367   : > { %1538 = vmatpush.msra.mxu2 %v1494_v23 }
 0x368   : > { %1866 = vmatmul.msk.f32.vlgmr.msrb.gmra.mxu2 %vm1353_vm7, %v1399_v55 }
 0x369   : > { %v2046_v56 = vpop.eup %2045 }
 0x36a   : > { %v1398_v57 = vmul.f32 %v2046_v56, %v2823_v25  ;;  %v1496_v25 = vld [vmem:[#allocation13 + $0x8] sm:$0xff] }
 0x36b   : > { %1515 = vmatpush.msra.mxu1 %v1496_v25 }
 0x36c   : > { %1865 = vmatmul.msk.f32.vlgmr.msrb.gmra.mxu1 %vm1353_vm7, %v1398_v57 }
 0x36e   : > { %v1390_v58 = vpop.xlane.xlu2 %1389 }
 0x36f   : > { %2047 = vrcp.f32 %v1390_v58 }
 0x375   : > { %v2048_v59 = vpop.eup %2047 }
 0x376   : > { %v1400_v60 = vmul.f32 %v2048_v59, %v2827_v32  ;;  %v1393_v61 = vpop.xlane.xlu2 %1392 }
 0x377   : > { %2049 = vrcp.f32 %v1393_v61 }
 0x378   : > { %1867 = vmatmul.msk.f32.vlgmr.msra.gmra.mxu3 %vm1353_vm7, %v1400_v60 }
 0x37d   : > { %v2050_v62 = vpop.eup %2049 }
 0x37e   : > { %v1401_v63 = vmul.f32 %v2050_v62, %v2831_v44 }
 0x380   : > { %1868 = vmatmul.msk.f32.vlgmr.msrb.gmra.mxu0 %vm1353_vm7, %v1401_v63 }
 0x3e9   : > { %v1422_v32 = vpop.f32.mrf.mxu1 }
 0x3ea   : > { %1870 = vmatmul.msk.f32.vlgmr.msra.gmra.mxu2 %vm1236_vm6, %v1422_v32 }
 0x3eb   : > { %v1445_v2 = vpop.f32.mrf.mxu2 }
 0x3ec   : > { %1869 = vmatmul.msk.f32.vlgmr.msra.gmra.mxu1 %vm1236_vm6, %v1445_v2 }
 0x3fb   : > { %v1468_v44 = vpop.f32.mrf.mxu3 }
 0x3fc   : > { %1871 = vmatmul.msk.f32.vlgmr.msrb.gmra.mxu3 %vm1236_vm6, %v1468_v44 }
 0x3fd   : > { %v1491_v3 = vpop.f32.mrf.mxu0 }
 0x3fe   : > { %1872 = vmatmul.msk.f32.vlgmr.msra.gmra.mxu0 %vm1236_vm6, %v1491_v3 }
 0x3ff   : > { %2289 = shalt.err (!%p2286_p13)
}
 0x400   : > { %s2407_s29 = smov 128   ;;  %s2408_s16 = smov 8   ;;  %v2051_v13 = vld [vmem:[%s2607_s6] sm:$0xff] }
 0x401   : > { %1907 = dma.vmem_to_hbm [thread:$0]  (%p2571_p4), %s1632_s21, 512, %s1634_s24, %s1603_s7, %s2407_s29, %s2407_s29, %s2408_s16  }
 0x402   : > { %s1875_s17 = sshll.u32 %s2384_s12, 3  ;;  %s503_s20 = scalar_lea.vmem [#allocation14], %s1839_s5 }
 0x403   : > { %s1614_s27 = scalar_lea.hbm %s2993_s8, %s1875_s17  ;;  %s1616_s23 = sshll.u32 %s503_s20, 4  ;;  %s1617_s23 = int_to_ptr.vmem [resolvable:$true] %s1616_s23 }
 0x404   : > { %s1618_s30 = sshll.u32 %s1614_s27, 4  ;;  %s1598_s12 = scalar_lea.sflag [#allocation4], %s2601_s4  ;;  %s1619_s30 = int_to_ptr.hbm [resolvable:$true] %s1618_s30 }
 0x405   : > { %s2304_s21 = sshra.s32 %s1619_s30, 4  ;;  %s2310_s5 = scalar_lea.hbm %s2993_s8, 16  ;;  %s2305_s21 = int_to_ptr.hbm [resolvable:$true] %s2304_s21 }
 0x406   : > { %s2306_s24 = scalar_lea.hbm %s2305_s21, 8  ;;  %p2311_p8 = scmp.lt.s32.totalorder %s2305_s21, %s2993_s8 }
 0x407   : > { %p2307_p0 = scmp.ne.s32.totalorder %s2305_s21, %s2306_s24  ;;  %p2312_p1 = scmp.lt.s32.totalorder %s2310_s5, %s2306_s24 }
 0x409   : > { %p2308_p2 = pnand %p2307_p0, %p2571_p4  ;;  %p2313_p3 = por %p2312_p1, %p2311_p8 }
 0x40b   : > { %p2309_p5 = pneg %p2308_p2 }
 0x40d   : > { %p2314_p9 = pnand %p2313_p3, %p2309_p5 }
 0x469   : > { %v1517_v5 = vpop.f32.mrf.mxu1 }
 0x46d   : > { %v1540_v4 = vpop.f32.mrf.mxu2 }
 0x46e   : > { %v1541_v6 = vadd.f32 %v1540_v4, %v1517_v5 }
 0x47b   : > { %v1591_v11 = vpop.f32.mrf.mxu0 }
 0x47f   : > { %v1565_v9 = vpop.f32.mrf.mxu3 }
 0x480   : > { %v1568_v10 = vadd.f32 %v1565_v9, %v1541_v6 }
 0x482   : > { %v1594_v12 = vadd.f32 %v1591_v11, %v1568_v10 }
 0x484   : > { %v1595_v14 = vadd.f32 %v2051_v13, %v1594_v12 }
 0x486   : > { %1596 = vst.msk [vmem:[%s503_s20] sm:$0xff] %vm513_vm0, %v1595_v14 }
 0x487   : > { %2317 = shalt.err (!%p2314_p9)
}
 0x488   : > { %1906 = dma.vmem_to_hbm [thread:$0]  (%p2571_p4), %s1617_s23, 128, %s1619_s30, %s1598_s12  }
 0x489 PF: > { %s3024_s4 = sld [smem:[#allocation24_spill]]  ;;  %p1934_p10 = pnand %p1832_p6, %p2579_p7 }
 0x48b   : > { %p1935_p11 = pneg %p1934_p10 }
 0x48f   : > { %s1648_s15 = sand.u32 1, %s3024_s4  }
 0x490   : > { %s1649_s2 = scalar_lea.sflag [#allocation4], %s1648_s15 }
 0x491   : > { %2363 = dma.done.wait (%p1935_p11), %s1649_s2, 128  }
 0x492   : > { %2365 = vsyncadd (%p1935_p11), %s1649_s2, 4294967168  ;;  %s1659_s22 = scalar_lea.sflag [#allocation16], %s1648_s15 }
 0x493   : > { %2367 = dma.done.wait (%p1935_p11), %s1659_s22, 512  }
 0x494   : > { %2369 = vsyncadd (%p1935_p11), %s1659_s22, 4294966784  ;;  %s34_s14 = sadd.s32 1, %s2392_s14   ;;  %s3026_s28 = sld [smem:[#allocation25_spill]] }
 0x495   : > { %p31_p12 = scmp.ge.s32.totalorder %s34_s14, 4   ;;  %s3027_s11 = sld [smem:[#allocation27_spill]] }
 0x496   : > { %s3028_s29 = sld [smem:[#allocation26_spill]]  ;;  %s3029_s30 = smov %s2376_s10 }
 0x497   : > { %s3031_s12 = smov %s2388_s13 }
 0x498   :  { %33 = sbr.rel (!%p31_p12) target bundleno = 18 (0x12), region = 151 }
 0x49a   : > { %s3030_s10 = smov %s3026_s28 }
 0x49c   : > { %s3032_s13 = smov %s3028_s29 }
 0x49d   :  { %1665 = vsyncpa [#allocation3], 1 }
 0x49e   :  { %1667 = vsyncpa [#allocation3 + $0x1], 1 }
 0x49f   :  { %1668 = vsyncpa [#allocation6], 1 }
 0x4a0   :  { %1670 = vsyncpa [#allocation6 + $0x1], 1 }
 0x4a1   :  { %1671 = vsyncpa [#allocation9], 1 }
 0x4a2   :  { %1672 = vsyncpa [#allocation12], 1 }
 0x4a3   :  { %1673 = vsyncpa [#allocation4], 1 }
 0x4a4   :  { %1675 = vsyncpa [#allocation4 + $0x1], 1 }
 0x4a5   :  { %1676 = vsyncpa [#allocation16], 1 }
 0x4a6   :  { %1678 = vsyncpa [#allocation16 + $0x1], 1 }

// kernel: tpu_custom_call.1
= control target key start
LH: loop header
LB: loop body
LE: loop exit
PB: predicated region body
PF: predicated region fallthrough
CT: control target
= control target key end

     0   :  { %s2985_s0 = inlined_call_operand.hbm [shape: f32[2,8,32], index: 0, kind: input, shape index: {}]   ;;  %s2986_s1 = inlined_call_operand.hbm [shape: f32[2,16,32], index: 1, kind: input, shape index: {}]   ;;  %s2987_s2 = inlined_call_operand.hbm [shape: f32[1,4,8,16], index: 2, kind: input, shape index: {}]   ;;  %s2988_s3 = inlined_call_operand.vmem [shape: f32[1,32], index: 3, kind: input, shape index: {}]   ;;  %s2989_s4 = inlined_call_operand.hbm [shape: f32[32,32], index: 4, kind: input, shape index: {}]   ;;  %s2990_s5 = inlined_call_operand.hbm [shape: f32[32,32], index: 5, kind: input, shape index: {}]   ;;  %s2991_s6 = inlined_call_operand.hbm [shape: f32[32,32], index: 6, kind: input, shape index: {}]   ;;  %s2992_s7 = inlined_call_operand.hbm [shape: f32[4,8,32], index: 7, kind: input, shape index: {}]   ;;  %s2993_s8 = inlined_call_operand.hbm [shape: f32[2,8,32], index: 8, kind: output, shape index: {0}]   ;;  %s2994_s9 = inlined_call_operand.hbm [shape: f32[2,4,8,16], index: 9, kind: output, shape index: {1}]  }
   0x1   :  { %3001 = sst [smem:[#allocation29_spill]] %s2987_s2 }
   0x2   :  { %3002 = sst [smem:[#allocation30_spill]] %s2989_s4 }
   0x3   :  { %3003 = sst [smem:[#allocation31_spill]] %s2990_s5 }
   0x4   :  { %3004 = sst [smem:[#allocation32_spill]] %s2991_s6 }
   0x5   :  { %3005 = sst [smem:[#allocation33_spill]] %s2992_s7 }
   0x6   :  { %15 = vsyncpa [#allocation3], 0 }
   0x7   :  { %17 = vsyncpa [#allocation3 + $0x1], 0 }
   0x8   :  { %18 = vsyncpa [#allocation6], 0 }
   0x9   :  { %20 = vsyncpa [#allocation6 + $0x1], 0 }
   0xa   :  { %21 = vsyncpa [#allocation9], 0 }
   0xb   :  { %22 = vsyncpa [#allocation12], 0 }
   0xc   :  { %23 = vsyncpa [#allocation4], 0 }
   0xd   :  { %25 = vsyncpa [#allocation4 + $0x1], 0 }
   0xe   :  { %26 = vsyncpa [#allocation16], 0 }
   0xf   :  { %28 = vsyncpa [#allocation16 + $0x1], 0  ;;  %s2459_s30 = smov 0   ;;  %s2461_s10 = smov 0  }
  0x10   :  { %s2463_s11 = smov 0   ;;  %s2465_s12 = smov 0  }
  0x11   :  { %s2467_s13 = smov 0   ;;  %s2469_s14 = smov 0  }
  0x12 LB: > { %3006 = sst [smem:[#allocation24_spill]] %s2372_s30  ;;  %s2490_s15 = sadd.s32 4294967295, %s2392_s14   ;;  %s2392_s14 = sphi %s2469_s14, %s34_s14   ;;  %s2388_s13 = sphi %s2467_s13, %s3032_s13   ;;  %s2384_s12 = sphi %s2465_s12, %s3031_s12   ;;  %s2380_s11 = sphi %s2463_s11, %s3027_s11   ;;  %s2376_s10 = sphi %s2461_s10, %s3030_s10   ;;  %s2372_s30 = sphi %s2459_s30, %s3029_s30  }
  0x13   : > { %3007 = sst [smem:[#allocation25_spill]] %s2380_s11  ;;  %p1826_p0 = scmp.ge.s32.totalorder %s2392_s14, 1 }
  0x14   : > { %p69_p1 = scmp.eq.s32.totalorder %s2490_s15, 0  ;;  %p292_p2 = scmp.lt.s32.totalorder %s2392_s14, 3 }
  0x15   : > { %s3008_s2 = sld [smem:[#allocation29_spill]]  ;;  %s2394_s20 = smov [#allocation7]  }
  0x16   : > { %p2498_p3 = pnand %p1826_p0, %p292_p2  ;;  %s307_s21 = sshll.u32 %s2394_s20, 4  ;;  %s308_s21 = int_to_ptr.vmem [resolvable:$true] %s307_s21 }
  0x17   : > { %p1832_p6 = scmp.ge.s32.totalorder %s2392_s14, 2  ;;  %s3011_s4 = sld [smem:[#allocation30_spill]] }
  0x18   : > { %p1910_p4 = pneg %p2498_p3  ;;  %s2995_s26 = smov 128  }
  0x19   : > { %s2996_s27 = smov 8   ;;  %s2397_s28 = smov [#allocation8]  }
  0x1a   : > { %p2506_p5 = pnand %p1910_p4, %p69_p1  ;;  %s324_s29 = sshll.u32 %s2397_s28, 4  ;;  %s325_s29 = int_to_ptr.vmem [resolvable:$true] %s324_s29 }
  0x1b   : > { %s305_s18 = sshll.u32 %s3008_s2, 4  ;;  %s3012_s6 = sld [smem:[#allocation32_spill]]  ;;  %s306_s18 = int_to_ptr.hbm [resolvable:$true] %s305_s18 }
  0x1c   : > { %1913 = dma.hbm_to_vmem [thread:$0]  (!%p2506_p5), %s306_s18, 512, %s308_s21, [#allocation6], %s2995_s26, %s2995_s26, %s2996_s27  }
  0x1d   : > { %s322_s25 = sshll.u32 %s3011_s4, 4  ;;  %s3013_s5 = sld [smem:[#allocation31_spill]]  ;;  %s323_s25 = int_to_ptr.hbm [resolvable:$true] %s322_s25 }
  0x1e   : > { %1916 = dma.hbm_to_vmem [thread:$0]  (!%p2506_p5), %s323_s25, 512, %s325_s29, [#allocation9], %s2995_s26, %s2995_s26, %s2996_s27  }
  0x1f   : > { %s2398_s18 = smov [#allocation11]   ;;  %s2399_s25 = smov [#allocation10]  }
  0x20   : > { %s352_s21 = sshll.u32 %s2398_s18, 4  ;;  %s338_s28 = sshll.u32 %s2399_s25, 4  ;;  %s353_s21 = int_to_ptr.vmem [resolvable:$true] %s352_s21  ;;  %s339_s28 = int_to_ptr.vmem [resolvable:$true] %s338_s28 }
  0x21   : > { %s350_s20 = sshll.u32 %s3012_s6, 4  ;;  %s3014_s7 = sld [smem:[#allocation33_spill]]  ;;  %s351_s20 = int_to_ptr.hbm [resolvable:$true] %s350_s20 }
  0x22   : > { %1922 = dma.hbm_to_vmem [thread:$0]  (!%p2506_p5), %s351_s20, 512, %s353_s21, [#allocation12], %s2995_s26, %s2995_s26, %s2996_s27  }
  0x23   : > { %s336_s2 = sshll.u32 %s3013_s5, 4  ;;  %s2400_s20 = smov [#allocation13]   ;;  %s337_s2 = int_to_ptr.hbm [resolvable:$true] %s336_s2 }
  0x24   : > { %1919 = dma.hbm_to_vmem [thread:$0]  (!%p2506_p5), %s337_s2, 512, %s339_s28, [#allocation9], %s2995_s26, %s2995_s26, %s2996_s27  }
  0x25   : > { %s366_s23 = sshll.u32 %s2400_s20, 4  ;;  %s1825_s24 = sadd.s32 4294967294, %s2392_s14   ;;  %s367_s23 = int_to_ptr.vmem [resolvable:$true] %s366_s23 }
  0x26   : > { %s46_s18 = sadd.s32 1, %s2388_s13  ;;  %s55_s21 = sadd.s32 1, %s2380_s11 }
  0x27   : > { %s364_s17 = sshll.u32 %s3014_s7, 4  ;;  %p48_p7 = scmp.ge.s32.totalorder %s46_s18, 2  ;;  %s365_s17 = int_to_ptr.hbm [resolvable:$true] %s364_s17 }
  0x28   : > { %1925 = dma.hbm_to_vmem [thread:$0]  (!%p2506_p5), %s365_s17, 512, %s367_s23, [#allocation12], %s2995_s26, %s2995_s26, %s2996_s27  }
  0x29   : > { %p62_p8 = scmp.ne.s32.totalorder %s2380_s11, %s2376_s10  ;;  %p63_p9 = scmp.eq.s32.totalorder %s2392_s14, 0 }
  0x2a   : > { %p68_p10 = scmp.ne.s32.totalorder %s2376_s10, %s2372_s30  ;;  %s3034_s18 = smov (%p48_p7, %s46_s18), 0 }
  0x2b   : > { %3015 = sst [smem:[#allocation26_spill]] %s3034_s18  ;;  %p2558_p11 = por %p63_p9, %p62_p8 }
  0x2c   : > { %p2564_p12 = por %p69_p1, %p68_p10  ;;  %s50_s25 = ssub.s32 %s2388_s13, %s3034_s18 }
  0x2d   : > { %p251_p13 = scmp.eq.s32.totalorder %s2490_s15, 1  ;;  %p53_p0 = scmp.eq.s32.totalorder %s50_s25, 0 }
  0x2e   : > { %p257_p2 = scmp.eq.s32.totalorder %s1825_s24, 1  ;;  %p1945_p5 = scmp.lt.s32.totalorder %s2392_s14, 2 }
  0x2f   : > { %p2571_p4 = por %p251_p13, %p62_p8  ;;  %s380_s17 = sand.u32 1, %s2380_s11  }
  0x30   : > { %s2577_s29 = scalar_select %p53_p0, %s2380_s11, %s55_s21  }
  0x31   : > { %p2579_p7 = por %p257_p2, %p68_p10  ;;  %s1833_s20 = sshll.u32 %s380_s17, 3 }
  0x32   : > { %3019 = sst [smem:[#allocation27_spill]] %s2577_s29  ;;  %s1834_s23 = sshll.u32 %s2388_s13, 3 }
  0x33   : > { %s3020_s16 = scalar_select %p2579_p7, 1, 0 }
  0x34   : > { %s389_s24 = scalar_lea.hbm %s2985_s0, %s1834_s23  ;;  %s384_s25 = scalar_lea.vmem [#allocation2], %s1833_s20 }
  0x35   : > { %3021 = sst [smem:[#allocation28_spill]] %s3020_s16  ;;  %s393_s4 = sshll.u32 %s384_s25, 4  ;;  %s394_s4 = int_to_ptr.vmem [resolvable:$true] %s393_s4 }
  0x36   : > { %s391_s5 = sshll.u32 %s389_s24, 4  ;;  %p1927_p8 = pnand %p1945_p5, %p2558_p11  ;;  %s392_s5 = int_to_ptr.hbm [resolvable:$true] %s391_s5 }
  0x37   : > { %s1835_s21 = sshll.u32 %s380_s17, 4  ;;  %s1880_s6 = sshll.u32 %s2388_s13, 4 }
  0x38   : > { %s381_s7 = scalar_lea.sflag [#allocation3], %s380_s17  ;;  %s404_s18 = scalar_lea.vmem [#allocation5], %s1835_s21 }
  0x39   : > { %1929 = dma.hbm_to_vmem [thread:$0]  (!%p1927_p8), %s392_s5, 128, %s394_s4, %s381_s7  }
  0x3a   : > { %s412_s29 = sshll.u32 %s404_s18, 4  ;;  %s400_s11 = sand.u32 1, %s2392_s14   ;;  %s413_s29 = int_to_ptr.vmem [resolvable:$true] %s412_s29 }
  0x3b   : > { %s409_s26 = scalar_lea.hbm %s2986_s1, %s1880_s6  ;;  %s401_s20 = scalar_lea.sflag [#allocation6], %s400_s11 }
  0x3c   : > { %s410_s27 = sshll.u32 %s409_s26, 4  ;;  %s3022_s23 = smov 8   ;;  %s411_s27 = int_to_ptr.hbm [resolvable:$true] %s410_s27 }
  0x3d   : > { %s3023_s24 = smov 128   ;;  %424 = sbr.rel (%p2498_p3) target bundleno = 1161 (0x489), region = 52 }
  0x3e   : > { %1932 = dma.hbm_to_vmem [thread:$0]  (!%p1927_p8), %s411_s27, 256, %s413_s29, %s401_s20, %s3023_s24, %s3023_s24, %s3022_s23  }
  0x3f   : > { %s2601_s4 = sand.u32 (!%p2498_p3), 1, %s2376_s10  }
  0x40   : > { %s1839_s5 = sshll.u32 (!%p2498_p3), %s2601_s4, 3  ;;  %s427_s7 = scalar_lea.sflag (!%p2498_p3), [#allocation3], %s2601_s4 }
  0x41   : > { %s2607_s6 = scalar_lea.vmem (!%p2498_p3), [#allocation2], %s1839_s5 }
  0x42   : > { %2343 = dma.done.wait (%p2564_p12), %s427_s7, 128  }
  0x43   : > { %2345 = vsyncadd (%p2564_p12), %s427_s7, 4294967168  ;;  %s436_s30 = sand.u32 1, %s2490_s15   ;;  %s1840_s11 = sshll.u32 %s2601_s4, 4 }
  0x44   : > { %s437_s19 = scalar_lea.sflag [#allocation6], %s436_s30  ;;  %s440_s18 = scalar_lea.vmem [#allocation5], %s1840_s11 }
  0x45   : > { %2347 = dma.done.wait (%p2564_p12), %s437_s19, 256  }
  0x46   : > { %2349 = vsyncadd (%p2564_p12), %s437_s19, 4294967040 }
  0x47   : > { %2351 = dma.done.wait (%p69_p1), [#allocation6], 512  }
  0x48   : > { %2353 = vsyncadd (%p69_p1), [#allocation6], 4294966784 }
  0x49   : > { %2355 = dma.done.wait (%p69_p1), [#allocation9], 1024  }
  0x4a   : > { %2357 = vsyncadd (%p69_p1), [#allocation9], 4294966272 }
  0x4b   : > { %2359 = dma.done.wait (%p69_p1), [#allocation12], 1024  }
  0x4c   : > { %2361 = vsyncadd (%p69_p1), [#allocation12], 4294966272  ;;  %v574_v0 = vld [vmem:[#allocation10 + $0x18] sm:$0xff]  ;;  %v573_v1 = vld [vmem:[#allocation10 + $0x10] sm:$0xff]  ;;  %vm513_vm0 = vcmask 261120   ;;  %v2401_v9 = vmov 32.0  }
  0x4d   : > { %v511_v2 = vld [vmem:[%s2607_s6] sm:$0xff]  ;;  %593 = vmatpush.msra.mxu1 %v574_v0  ;;  %v572_v4 = vld [vmem:[#allocation10 + $0x8] sm:$0xff]  ;;  %v571_v6 = vld [vmem:[#allocation10] sm:$0xff]  ;;  %2031 = vrcp.f32 %v2401_v9  ;;  %s2402_s15 = smov 104   ;;  %s2403_s2 = smov 120   ;;  %vm642_vm5 = vcmask 1047556  }
  0x4e   : > { %v512_v3 = vmul.f32 %v511_v2, %v511_v2  ;;  %v2633_v7 = vld [vmem:[%s440_s18] sm:$0xff]  ;;  %v2637_v8 = vld [vmem:[%s440_s18 + $0x8] sm:$0xff]  ;;  %s2404_s16 = smov 112   ;;  %v2405_v36 = vmov 1983009808   ;;  %vm1236_vm6 = vcmask 64512  }
  0x4f   : > { %594 = vmatpush.msra.mxu1 %v573_v1  ;;  %v547_v13 = vld [vmem:[#allocation8 + $0x18] sm:$0xff]  ;;  %v546_v14 = vld [vmem:[#allocation8 + $0x10] sm:$0xff]  ;;  %v545_v16 = vld [vmem:[#allocation8 + $0x8] sm:$0xff]  ;;  %v647_v37 = vunpack.c.l.s4 %v2405_v36  ;;  %v2406_v46 = vmov 1934713408   ;;  %s1847_s17 = sshll.u32 %s2601_s4, 5 }
  0x50   : > { %v514_v5 = vsel %vm513_vm0, %v512_v3, 0.0  ;;  %563 = vmatpush.msra.mxu0 %v547_v13  ;;  %v544_v17 = vld [vmem:[#allocation8] sm:$0xff]  ;;  %v2030_v30 = vld [vmem:[%s2988_s3] ss:$0 sm:$0xff]  ;;  %v671_v47 = vunpack.c.l.s4 %v2406_v46  ;;  %vm1353_vm7 = vcmask 130048   ;;  %s2802_s25 = scalar_lea.vmem [#allocation15], %s1847_s17 }
  0x51   : > { %515 = vadd.xlane.f32.xlu0 %v514_v5  ;;  %595 = vmatpush.msra.mxu1 %v572_v4  ;;  %v2651_v41 = vunpack.c.0.s8 %v647_v37  ;;  %s1631_s21 = sshll.u32 %s2802_s25, 4  ;;  %s1881_s26 = sshll.u32 %s2384_s12, 5  ;;  %s1632_s21 = int_to_ptr.vmem [resolvable:$true] %s1631_s21 }
  0x52   : > { %564 = vmatpush.msra.mxu0 %v546_v14  ;;  %v2657_v51 = vunpack.c.0.s8 %v671_v47  ;;  %s1630_s23 = scalar_lea.hbm %s2994_s9, %s1881_s26  ;;  %s1603_s7 = scalar_lea.sflag [#allocation16], %s2601_s4 }
  0x53   : > { %596 = vmatpush.msra.mxu1 %v571_v6  ;;  %v2032_v10 = vpop.eup %2031  ;;  %s1633_s24 = sshll.u32 %s1630_s23, 4  ;;  %s1634_s24 = int_to_ptr.hbm [resolvable:$true] %s1633_s24 }
  0x54   : > { %1849 = vmatmul.msk.f32.vlgmr.msra.gmra.mxu1 %vm513_vm0, %v2633_v7  ;;  %v518_v11 = vmul.f32 32.0, %v2032_v10  ;;  %565 = vmatpush.msra.mxu0 %v545_v16  ;;  %vm522_vm1 = vweird.f32 %v2032_v10  ;;  %s2276_s30 = sshra.s32 %s1634_s24, 4  ;;  %s2277_s30 = int_to_ptr.hbm [resolvable:$true] %s2276_s30 }
  0x55   : > { %s2278_s11 = scalar_lea.hbm %s2277_s30, 32  ;;  %p2283_p10 = scmp.lt.s32.totalorder %s2277_s30, %s2994_s9 }
  0x56   : > { %v519_v12 = vsub.f32 1.0, %v518_v11  ;;  %566 = vmatpush.msra.mxu0 %v544_v17  ;;  %p2279_p1 = scmp.ne.s32.totalorder %s2277_s30, %s2278_s11 }
  0x58   : > { %v520_v15 = vmul.f32 %v2032_v10, %v519_v12  ;;  %p2280_p3 = pnand %p2279_p1, %p2571_p4 }
  0x5a   : > { %v521_v18 = vadd.f32 %v2032_v10, %v520_v15  ;;  %p2281_p9 = pneg %p2280_p3 }
  0x5c   : > { %1850 = vmatmul.msk.f32.gmra.mxu1 %vm513_vm0, %v2637_v8  ;;  %v523_v19 = vsel %vm522_vm1, %v2032_v10, %v521_v18 }
  0xc4   : > { %v516_v20 = vpop.xlane.xlu0 %515 }
  0xc5   : > { %v524_v21 = vmul.f32 %v523_v19, %v516_v20 }
  0xc7   : > { %v525_v22 = vadd.f32 1e-06, %v524_v21 }
  0xc9   : > { %2033 = vrsqrt.f32 %v525_v22  ;;  %vm532_vm3 = vweird.f32 %v525_v22 }
  0xcf   : > { %v2034_v23 = vpop.eup %2033 }
  0xd0   : > { %v527_v24 = vmul.f32 %v2034_v23, %v525_v22  ;;  %vm533_vm2 = vweird.f32 %v2034_v23 }
  0xd1   : > { %v598_v26 = vpop.f32.mrf.mxu1  ;;  %vm534_vm4 = vmor %vm532_vm3, %vm533_vm2 }
  0xd2   : > { %v528_v25 = vmul.f32 %v2034_v23, %v527_v24  ;;  %766 = vrot.lane.b32.xlu1 %v598_v26, %s2402_s15  ;;  %754 = vrot.lane.b32.xlu2 %v598_v26, %s2403_s2  ;;  %v774_v39 = vrot.slane %v598_v26, 4 }
  0xd4   : > { %v529_v27 = vmul.f32 0.5, %v528_v25 }
  0xd6   : > { %v530_v28 = vsub.f32 1.5, %v529_v27 }
  0xd8   : > { %v531_v29 = vmul.f32 %v2034_v23, %v530_v28 }
  0xd9   : > { %v601_v31 = vpop.f32.mrf.mxu1 }
  0xda   : > { %v535_v32 = vsel %vm534_vm4, %v2034_v23, %v531_v29  ;;  %762 = vrot.lane.b32.xlu1 %v601_v31, %s2404_s16  ;;  %756 = vrot.lane.b32.xlu0 %v601_v31, %s2403_s2  ;;  %v830_v1 = vrot.slane %v601_v31, 4 }
  0xdb   : > { %v536_v33 = vmul.f32 %v535_v32, %v511_v2  ;;  %760 = vrot.lane.b32.xlu2 %v598_v26, %s2404_s16 }
  0xdd   : > { %v541_v34 = vmul.f32 %v2030_v30, %v536_v33 }
  0xdf   : > { %1848 = vmatmul.msk.f32.vlgmr.msra.gmra.mxu0 %vm513_vm0, %v541_v34 }
  0xe2   : > { %768 = vrot.lane.b32.xlu1 %v601_v31, %s2402_s15 }
 0x12c   : > { %v755_v35 = vpop.permute.xlu2 %754 }
 0x12d   : > { %v786_v45 = vrot.slane %v755_v35, 4 }
 0x135   : > { %v761_v38 = vpop.permute.xlu2 %760 }
 0x136   : > { %v772_v40 = vrot.slane %v761_v38, 4  ;;  %v775_v42 = vsel %vm642_vm5, %v761_v38, %v774_v39 }
 0x137   : > { %v783_v44 = vperm.slane %v775_v42, %v2651_v41 }
 0x138   : > { %v773_v43 = vsel %vm642_vm5, %v772_v40, %v598_v26 }
 0x139   : > { %v779_v48 = vperm.slane %v773_v43, %v2651_v41  ;;  %v810_v49 = vrot.slane %v783_v44, 4 }
 0x13b   : > { %v798_v54 = vrot.slane %v779_v48, 4 }
 0x144   : > { %v767_v50 = vpop.permute.xlu1 %766 }
 0x145   : > { %v784_v52 = vrot.slane %v767_v50, 4  ;;  %v787_v53 = vsel %vm642_vm5, %v767_v50, %v786_v45 }
 0x146   : > { %v795_v55 = vperm.slane %v787_v53, %v2651_v41 }
 0x147   : > { %v785_v56 = vsel %vm642_vm5, %v784_v52, %v755_v35 }
 0x148   : > { %v791_v57 = vperm.slane %v785_v56, %v2651_v41  ;;  %v808_v58 = vrot.slane %v795_v55, 4  ;;  %v811_v59 = vsel %vm642_vm5, %v795_v55, %v810_v49 }
 0x149   : > { %v819_v60 = vperm.slane %v811_v59, %v2657_v51 }
 0x14a   : > { %v796_v61 = vrot.slane %v791_v57, 4  ;;  %v799_v62 = vsel %vm642_vm5, %v791_v57, %v798_v54  ;;  %v809_v63 = vsel %vm642_vm5, %v808_v58, %v783_v44 }
 0x14b   : > { %v807_v0 = vperm.slane %v799_v62, %v2657_v51  ;;  %v815_v3 = vperm.slane %v809_v63, %v2657_v51  ;;  %v826_v4 = vrot.slane %v819_v60, 4 }
 0x14c   : > { %v797_v2 = vsel %vm642_vm5, %v796_v61, %v779_v48  ;;  %v763_v5 = vpop.permute.xlu1 %762  ;;  %v757_v11 = vpop.permute.xlu0 %756 }
 0x14d   : > { %v803_v6 = vperm.slane %v797_v2, %v2657_v51  ;;  %v822_v9 = vrot.slane %v807_v0, 4  ;;  %v828_v10 = vrot.slane %v763_v5, 4  ;;  %v831_v12 = vsel %vm642_vm5, %v763_v5, %v830_v1 }
 0x14e   : > { %v824_v13 = vrot.slane %v815_v3, 4  ;;  %v827_v14 = vsel %vm642_vm5, 0.0, %v826_v4  ;;  %v842_v16 = vrot.slane %v757_v11, 4  ;;  %v839_v19 = vperm.slane %v831_v12, %v2651_v41 }
 0x14f   : > { %v829_v15 = vsel %vm642_vm5, %v828_v10, %v601_v31  ;;  %v820_v17 = vrot.slane %v803_v6, 4  ;;  %v823_v18 = vsel %vm642_vm5, 0.0, %v822_v9  ;;  %v900_v20 = vrot.slane %v827_v14, 4 }
 0x150   : > { %v825_v21 = vsel %vm642_vm5, 0.0, %v824_v13  ;;  %v835_v22 = vperm.slane %v829_v15, %v2651_v41  ;;  %v889_v24 = vrot.slane %v823_v18, 4  ;;  %v866_v27 = vrot.slane %v839_v19, 4 }
 0x151   : > { %v821_v29 = vsel %vm642_vm5, 0.0, %v820_v17  ;;  %v901_v30 = vsel %vm642_vm5, %v900_v20, %v825_v21  ;;  %v895_v43 = vsel %vm642_vm5, %v826_v4, %v815_v3  ;;  %v884_v49 = vsel %vm642_vm5, %v822_v9, %v803_v6 }
 0x152   : > { %v854_v32 = vrot.slane %v835_v22, 4  ;;  %v890_v37 = vsel %vm642_vm5, %v889_v24, %v821_v29  ;;  %v905_v42 = vperm.slane %v901_v30, %v2651_v41  ;;  %v899_v58 = vperm.slane %v895_v43, %v2651_v41 }
 0x153   : > { %v894_v50 = vperm.slane %v890_v37, %v2651_v41  ;;  %v888_v10 = vperm.slane %v884_v49, %v2651_v41 }
 0x154   : > { %v769_v23 = vpop.permute.xlu1 %768  ;;  %v918_v59 = vrot.slane %v905_v42, 4  ;;  %v920_v17 = vrot.slane %v899_v58, 4 }
 0x155   : > { %v840_v25 = vrot.slane %v769_v23, 4  ;;  %v843_v26 = vsel %vm642_vm5, %v769_v23, %v842_v16  ;;  %v906_v6 = vrot.slane %v894_v50, 4  ;;  %v908_v24 = vrot.slane %v888_v10, 4 }
 0x156   : > { %v851_v28 = vperm.slane %v843_v26, %v2651_v41  ;;  %v919_v15 = vsel %vm642_vm5, %v918_v59, %v899_v58  ;;  %v921_v30 = vsel %vm642_vm5, %v905_v42, %v920_v17 }
 0x157   : > { %v841_v31 = vsel %vm642_vm5, %v840_v25, %v757_v11  ;;  %v907_v20 = vsel %vm642_vm5, %v906_v6, %v888_v10  ;;  %v929_v37 = vperm.slane %v921_v30, %v2657_v51 }
 0x158   : > { %v847_v33 = vperm.slane %v841_v31, %v2651_v41  ;;  %v864_v34 = vrot.slane %v851_v28, 4  ;;  %v867_v35 = vsel %vm642_vm5, %v851_v28, %v866_v27  ;;  %v913_v29 = vperm.slane %v907_v20, %v2657_v51 }
 0x159   : > { %v875_v36 = vperm.slane %v867_v35, %v2657_v51  ;;  %v909_v35 = vsel %vm642_vm5, %v894_v50, %v908_v24 }
 0x15a   : > { %v852_v38 = vrot.slane %v847_v33, 4  ;;  %v855_v39 = vsel %vm642_vm5, %v847_v33, %v854_v32  ;;  %v865_v40 = vsel %vm642_vm5, %v864_v34, %v839_v19  ;;  %v917_v42 = vperm.slane %v909_v35, %v2657_v51 }
 0x15b   : > { %v863_v44 = vperm.slane %v855_v39, %v2657_v51  ;;  %v871_v45 = vperm.slane %v865_v40, %v2657_v51  ;;  %v882_v46 = vrot.slane %v875_v36, 4  ;;  %v932_v39 = vrot.slane %v913_v29, 4 }
 0x15c   : > { %v2693_v47 = vpop.f32.mrf.mxu0  ;;  %v853_v48 = vsel %vm642_vm5, %v852_v38, %v835_v22  ;;  %v925_v22 = vperm.slane %v919_v15, %v2657_v51  ;;  %v936_v49 = vrot.slane %v917_v42, 4 }
 0x15d   : > { %635 = vrot.lane.b32.xlu1 %v2693_v47, %s2404_s16  ;;  %632 = vrot.lane.b32.xlu2 %v2693_v47, %s2403_s2  ;;  %v859_v52 = vperm.slane %v853_v48, %v2657_v51  ;;  %v878_v53 = vrot.slane %v863_v44, 4  ;;  %v880_v54 = vrot.slane %v871_v45, 4  ;;  %v883_v55 = vsel %vm642_vm5, 0.0, %v882_v46 }
 0x15e   : > { %v949_v56 = vsel %vm642_vm5, %v882_v46, %v871_v45  ;;  %v954_v57 = vrot.slane %v883_v55, 4  ;;  %v930_v34 = vrot.slane %v925_v22, 4  ;;  %v934_v45 = vrot.slane %v929_v37, 4 }
 0x15f   : > { %v876_v60 = vrot.slane %v859_v52, 4  ;;  %v879_v61 = vsel %vm642_vm5, 0.0, %v878_v53  ;;  %v881_v62 = vsel %vm642_vm5, 0.0, %v880_v54  ;;  %v938_v63 = vsel %vm642_vm5, %v878_v53, %v859_v52 }
 0x160   : > { %v943_v0 = vrot.slane %v879_v61, 4  ;;  %v942_v1 = vperm.slane %v938_v63, %v2651_v41  ;;  %v953_v2 = vperm.slane %v949_v56, %v2651_v41  ;;  %v955_v3 = vsel %vm642_vm5, %v954_v57, %v881_v62 }
 0x161   : > { %v877_v4 = vsel %vm642_vm5, 0.0, %v876_v60  ;;  %v959_v5 = vperm.slane %v955_v3, %v2651_v41  ;;  %v931_v43 = vsel %vm642_vm5, %v930_v34, %v913_v29  ;;  %v933_v46 = vsel %vm642_vm5, %v925_v22, %v932_v39 }
 0x162   : > { %v944_v9 = vsel %vm642_vm5, %v943_v0, %v877_v4  ;;  %v962_v11 = vrot.slane %v942_v1, 4  ;;  %v974_v12 = vrot.slane %v953_v2, 4  ;;  %v935_v50 = vsel %vm642_vm5, %v934_v45, %v917_v42  ;;  %v607_v4 = vld [vmem:[#allocation11 + $0x18] sm:$0xff] }
 0x163   : > { %v948_v13 = vperm.slane %v944_v9, %v2651_v41  ;;  %v972_v14 = vrot.slane %v959_v5, 4  ;;  %v937_v52 = vsel %vm642_vm5, %v929_v37, %v936_v49  ;;  %v644_v60 = vrot.slane %v2693_v47, 4  ;;  %620 = vmatpush.msra.mxu2 %v607_v4 }
 0x164   : > { %v975_v16 = vsel %vm642_vm5, %v959_v5, %v974_v12  ;;  %v606_v5 = vld [vmem:[#allocation11 + $0x10] sm:$0xff] }
 0x165   : > { %638 = vrot.lane.b32.xlu2 %v2693_v47, %s2402_s15  ;;  %v960_v18 = vrot.slane %v948_v13, 4  ;;  %v973_v19 = vsel %vm642_vm5, %v972_v14, %v953_v2  ;;  %v963_v23 = vsel %vm642_vm5, %v948_v13, %v962_v11  ;;  %v983_v26 = vperm.slane %v975_v16, %v2657_v51  ;;  %v605_v13 = vld [vmem:[#allocation11 + $0x8] sm:$0xff]  ;;  %621 = vmatpush.msra.mxu2 %v606_v5 }
 0x166   : > { %v979_v21 = vperm.slane %v973_v19, %v2657_v51  ;;  %v971_v31 = vperm.slane %v963_v23, %v2657_v51 }
 0x167   : > { %v961_v25 = vsel %vm642_vm5, %v960_v18, %v942_v1  ;;  %v988_v36 = vrot.slane %v983_v26, 4  ;;  %v604_v18 = vld [vmem:[#allocation11] sm:$0xff]  ;;  %622 = vmatpush.msra.mxu2 %v605_v13 }
 0x168   : > { %v967_v27 = vperm.slane %v961_v25, %v2657_v51  ;;  %v984_v28 = vrot.slane %v979_v21, 4  ;;  %v990_v40 = vrot.slane %v971_v31, 4 }
 0x169   : > { %v989_v44 = vsel %vm642_vm5, %v988_v36, %v971_v31  ;;  %623 = vmatpush.msra.mxu2 %v604_v18 }
 0x16a   : > { %v985_v32 = vsel %vm642_vm5, %v984_v28, %v967_v27  ;;  %v986_v33 = vrot.slane %v967_v27, 4  ;;  %v991_v48 = vsel %vm642_vm5, %v983_v26, %v990_v40  ;;  %1851 = vmatmul.msk.f32.vlgmr.msra.gmra.mxu2 %vm513_vm0, %v2633_v7 }
 0x16b   : > { %1853 = vmatpush.xpose.msk.msra.mxu3 %vm1236_vm6, %v985_v32 }
 0x16c   : > { %v987_v38 = vsel %vm642_vm5, %v979_v21, %v986_v33 }
 0x16d   : > { %1856 = vmatpush.xpose.msk.msrb.mxu0 %vm1236_vm6, %v987_v38 }
 0x16f   : > { %1854 = vmatpush.xpose.msk.msra.mxu3 %vm1236_vm6, %v931_v43 }
 0x171   : > { %1857 = vmatpush.xpose.msk.msrb.mxu0 %vm1236_vm6, %v933_v46 }
 0x172   : > { %1852 = vmatmul.msk.f32.gmra.mxu2 %vm513_vm0, %v2637_v8 }
 0x173   : > { %1859 = vmatpush.xpose.msk.msrb.mxu3 %vm1236_vm6, %v989_v44 }
 0x175   : > { %1862 = vmatpush.xpose.msk.msra.mxu0 %vm1236_vm6, %v991_v48 }
 0x177   : > { %1860 = vmatpush.xpose.msk.msrb.mxu3 %vm1236_vm6, %v935_v50 }
 0x179   : > { %1863 = vmatpush.xpose.msk.msra.mxu0 %vm1236_vm6, %v937_v52 }
 0x1b7   : > { %v633_v53 = vpop.permute.xlu2 %632 }
 0x1b8   : > { %v656_v55 = vrot.slane %v633_v53, 4 }
 0x1bf   : > { %v639_v54 = vpop.permute.xlu2 %638 }
 0x1c0   : > { %v654_v56 = vrot.slane %v639_v54, 4  ;;  %v657_v57 = vsel %vm642_vm5, %v639_v54, %v656_v55 }
 0x1c1   : > { %v665_v59 = vperm.slane %v657_v57, %v2651_v41 }
 0x1c2   : > { %v655_v58 = vsel %vm642_vm5, %v654_v56, %v633_v53 }
 0x1c3   : > { %v661_v61 = vperm.slane %v655_v58, %v2651_v41  ;;  %v678_v1 = vrot.slane %v665_v59, 4 }
 0x1c5   : > { %v666_v6 = vrot.slane %v661_v61, 4 }
 0x1cf   : > { %v636_v62 = vpop.permute.xlu1 %635 }
 0x1d0   : > { %v641_v63 = vrot.slane %v636_v62, 4  ;;  %v645_v0 = vsel %vm642_vm5, %v636_v62, %v644_v60  ;;  %v1233_v60 = vld [vmem:[#allocation7 + $0x8] sm:$0xff] }
 0x1d1   : > { %v653_v2 = vperm.slane %v645_v0, %v2651_v41 }
 0x1d2   : > { %v643_v3 = vsel %vm642_vm5, %v641_v63, %v2693_v47  ;;  %v1232_v63 = vld [vmem:[#allocation7] sm:$0xff] }
 0x1d3   : > { %v649_v9 = vperm.slane %v643_v3, %v2651_v41  ;;  %v679_v10 = vsel %vm642_vm5, %v678_v1, %v653_v2  ;;  %v680_v11 = vrot.slane %v653_v2, 4  ;;  %v1235_v3 = vld [vmem:[#allocation7 + $0x18] sm:$0xff] }
 0x1d4   : > { %v685_v12 = vperm.slane %v679_v10, %v2657_v51 }
 0x1d5   : > { %v667_v14 = vsel %vm642_vm5, %v666_v6, %v649_v9  ;;  %v668_v15 = vrot.slane %v649_v9, 4  ;;  %v681_v16 = vsel %vm642_vm5, %v665_v59, %v680_v11  ;;  %v1234_v9 = vld [vmem:[#allocation7 + $0x10] sm:$0xff] }
 0x1d6   : > { %v673_v47 = vperm.slane %v667_v14, %v2657_v51  ;;  %v689_v17 = vperm.slane %v681_v16, %v2657_v51  ;;  %v694_v21 = vrot.slane %v685_v12, 4 }
 0x1d7   : > { %v669_v19 = vsel %vm642_vm5, %v661_v61, %v668_v15 }
 0x1d8   : > { %v677_v20 = vperm.slane %v669_v19, %v2657_v51  ;;  %v696_v22 = vrot.slane %v689_v17, 4  ;;  %v690_v23 = vrot.slane %v673_v47, 4  ;;  %v695_v29 = vsel %vm642_vm5, 0.0, %v694_v21 }
 0x1da   : > { %v692_v24 = vrot.slane %v677_v20, 4  ;;  %v697_v25 = vsel %vm642_vm5, 0.0, %v696_v22  ;;  %v709_v26 = vsel %vm642_vm5, %v696_v22, %v685_v12  ;;  %v691_v34 = vsel %vm642_vm5, 0.0, %v690_v23 }
 0x1db   : > { %v714_v27 = vrot.slane %v697_v25, 4  ;;  %v713_v31 = vperm.slane %v709_v26, %v2651_v41 }
 0x1dc   : > { %v693_v28 = vsel %vm642_vm5, 0.0, %v692_v24  ;;  %v698_v30 = vsel %vm642_vm5, %v692_v24, %v673_v47 }
 0x1dd   : > { %v703_v32 = vrot.slane %v693_v28, 4  ;;  %v715_v33 = vsel %vm642_vm5, %v714_v27, %v695_v29  ;;  %v702_v36 = vperm.slane %v698_v30, %v2651_v41  ;;  %v734_v39 = vrot.slane %v713_v31, 4 }
 0x1de   : > { %v719_v35 = vperm.slane %v715_v33, %v2651_v41 }
 0x1df   : > { %v704_v7 = vsel %vm642_vm5, %v703_v32, %v691_v34  ;;  %v722_v43 = vrot.slane %v702_v36, 4 }
 0x1e0   : > { %v708_v37 = vperm.slane %v704_v7, %v2651_v41  ;;  %v732_v38 = vrot.slane %v719_v35, 4  ;;  %v735_v46 = vsel %vm642_vm5, %v719_v35, %v734_v39 }
 0x1e1   : > { %v743_v54 = vperm.slane %v735_v46, %v2657_v51 }
 0x1e2   : > { %v720_v40 = vrot.slane %v708_v37, 4  ;;  %v733_v42 = vsel %vm642_vm5, %v732_v38, %v713_v31  ;;  %v723_v50 = vsel %vm642_vm5, %v708_v37, %v722_v43 }
 0x1e3   : > { %v739_v44 = vperm.slane %v733_v42, %v2657_v51  ;;  %v731_v55 = vperm.slane %v723_v50, %v2657_v51  ;;  %v748_v56 = vrot.slane %v743_v54, 4 }
 0x1e4   : > { %v721_v45 = vsel %vm642_vm5, %v720_v40, %v702_v36 }
 0x1e5   : > { %v727_v48 = vperm.slane %v721_v45, %v2657_v51  ;;  %v744_v49 = vrot.slane %v739_v44, 4  ;;  %v750_v57 = vrot.slane %v731_v55, 4  ;;  %v749_v58 = vsel %vm642_vm5, %v748_v56, %v731_v55 }
 0x1e7   : > { %v745_v52 = vsel %vm642_vm5, %v744_v49, %v727_v48  ;;  %v746_v53 = vrot.slane %v727_v48, 4  ;;  %v751_v59 = vsel %vm642_vm5, %v743_v54, %v750_v57 }
 0x1e8   : > { %1855 = vmatmul.msk.f32.vlgmr.msra.gmra.mxu3 %vm1236_vm6, %v745_v52 }
 0x1e9   : > { %v747_v8 = vsel %vm642_vm5, %v739_v44, %v746_v53 }
 0x1ea   : > { %1858 = vmatmul.msk.f32.vlgmr.msrb.gmra.mxu0 %vm1236_vm6, %v747_v8 }
 0x1ed   : > { %v625_v13 = vpop.f32.mrf.mxu2 }
 0x1ee   : > { %v1014_v37 = vrot.slane %v625_v13, 4 }
 0x1f0   : > { %1861 = vmatmul.msk.f32.vlgmr.msrb.gmra.mxu3 %vm1236_vm6, %v749_v58 }
 0x1f2   : > { %1864 = vmatmul.msk.f32.vlgmr.msra.gmra.mxu0 %vm1236_vm6, %v751_v59 }
 0x1f5   : > { %v628_v15 = vpop.f32.mrf.mxu2 }
 0x1f6   : > { %v2015_v16 = vpack.i.bf16 %v625_v13, %v628_v15  ;;  %v1070_v40 = vrot.slane %v628_v15, 4 }
 0x267   : > { %v1292_v61 = vpop.f32.mrf.mxu0 }
 0x268   : > { %v1293_v62 = vadd.f32 %v1292_v61, %v1233_v60 }
 0x26a   : > { %1355 = vst.msk [vmem:[%s2802_s25 + $0x8] sm:$0xff] %vm1353_vm7, %v1293_v62  ;;  %v1361_v0 = vsel %vm1353_vm7, %v1293_v62, -inf }
 0x26b   : > { %1362 = vmax.xlane.f32.xlu2 %v1361_v0  ;;  %v1263_v1 = vpop.f32.mrf.mxu3 }
 0x26c   : > { %v1264_v2 = vadd.f32 %v1263_v1, %v1232_v63 }
 0x26e   : > { %1354 = vst.msk [vmem:[%s2802_s25] sm:$0xff] %vm1353_vm7, %v1264_v2  ;;  %v1358_v4 = vsel %vm1353_vm7, %v1264_v2, -inf }
 0x26f   : > { %v1350_v5 = vpop.f32.mrf.mxu0  ;;  %1359 = vmax.xlane.f32.xlu1 %v1358_v4 }
 0x270   : > { %v1351_v6 = vadd.f32 %v1350_v5, %v1235_v3 }
 0x272   : > { %1357 = vst.msk [vmem:[%s2802_s25 + $0x18] sm:$0xff] %vm1353_vm7, %v1351_v6  ;;  %v1367_v10 = vsel %vm1353_vm7, %v1351_v6, -inf }
 0x273   : > { %1368 = vmax.xlane.f32.xlu0 %v1367_v10  ;;  %v1321_v11 = vpop.f32.mrf.mxu3 }
 0x274   : > { %v1322_v12 = vadd.f32 %v1321_v11, %v1234_v9 }
 0x276   : > { %1356 = vst.msk [vmem:[%s2802_s25 + $0x10] sm:$0xff] %vm1353_vm7, %v1322_v12  ;;  %v1364_v14 = vsel %vm1353_vm7, %v1322_v12, -inf }
 0x27b   : > { %1365 = vmax.xlane.f32.xlu0 %v1364_v14 }
 0x283   : > { %2016 = vrot.lane.b32.xlu2 %v2015_v16, %s2403_s2 }
 0x288   : > { %2021 = vrot.lane.b32.xlu1 %v2015_v16, %s2404_s16 }
 0x28f   : > { %2026 = vrot.lane.b32.xlu0 %v2015_v16, %s2402_s15  ;;  %s2282_s15 = scalar_lea.hbm %s2994_s9, 64 }
 0x290   : > { %p2284_p11 = scmp.lt.s32.totalorder %s2282_s15, %s2278_s11 }
 0x292   : > { %p2285_p12 = por %p2284_p11, %p2283_p10 }
 0x294   : > { %p2286_p13 = pnand %p2285_p12, %p2281_p9 }
 0x2de   : > { %v1363_v47 = vpop.xlane.xlu2 %1362 }
 0x2df   : > { %v1371_v17 = vsub.f32 %v1293_v62, %v1363_v47 }
 0x2e1   : > { %v1376_v18 = vmul.f32 1.442695, %v1371_v17 }
 0x2e2   : > { %v1360_v19 = vpop.xlane.xlu1 %1359 }
 0x2e3   : > { %2035 = vpow2.f32 %v1376_v18  ;;  %v1370_v20 = vsub.f32 %v1264_v2, %v1360_v19 }
 0x2e5   : > { %v1374_v21 = vmul.f32 1.442695, %v1370_v20 }
 0x2e6   : > { %v1369_v22 = vpop.xlane.xlu0 %1368  ;;  %v2017_v33 = vpop.permute.xlu2 %2016 }
 0x2e7   : > { %2037 = vpow2.f32 %v1374_v21  ;;  %v1373_v29 = vsub.f32 %v1351_v6, %v1369_v22  ;;  %v2019_v38 = vunpack.i.h.bf16 %v2017_v33  ;;  %v2018_v39 = vunpack.i.l.bf16 %v2017_v33 }
 0x2e9   : > { %v2819_v23 = vpop.eup %2035  ;;  %v1380_v31 = vmul.f32 1.442695, %v1373_v29  ;;  %v1026_v50 = vrot.slane %v2019_v38, 4  ;;  %v1082_v52 = vrot.slane %v2018_v39, 4 }
 0x2ea   : > { %v1385_v24 = vsel %vm1353_vm7, %v2819_v23, 0.0 }
 0x2eb   : > { %1386 = vadd.xlane.f32.xlu1 %v1385_v24 }
 0x2ed   : > { %v2823_v25 = vpop.eup %2037 }
 0x2ee   : > { %v1366_v26 = vpop.xlane.xlu0 %1365  ;;  %v1382_v27 = vsel %vm1353_vm7, %v2823_v25, 0.0 }
 0x2ef   : > { %v1372_v28 = vsub.f32 %v1322_v12, %v1366_v26  ;;  %1383 = vadd.xlane.f32.xlu0 %v1382_v27 }
 0x2f1   : > { %v1378_v30 = vmul.f32 1.442695, %v1372_v28 }
 0x2f3   : > { %2039 = vpow2.f32 %v1378_v30 }
 0x2f4   : > { %2041 = vpow2.f32 %v1380_v31 }
 0x2f9   : > { %v2827_v32 = vpop.eup %2039 }
 0x2fa   : > { %v2022_v34 = vpop.permute.xlu1 %2021  ;;  %v1388_v35 = vsel %vm1353_vm7, %v2827_v32, 0.0  ;;  %v2831_v44 = vpop.eup %2041 }
 0x2fb   : > { %v2024_v36 = vunpack.i.h.bf16 %v2022_v34  ;;  %v2023_v7 = vunpack.i.l.bf16 %v2022_v34  ;;  %1389 = vadd.xlane.f32.xlu2 %v1388_v35  ;;  %v1391_v8 = vsel %vm1353_vm7, %v2831_v44, 0.0 }
 0x2fd   : > { %v1012_v42 = vrot.slane %v2024_v36, 4  ;;  %v1068_v43 = vrot.slane %v2023_v7, 4  ;;  %v1015_v45 = vsel %vm642_vm5, %v2024_v36, %v1014_v37  ;;  %v1071_v48 = vsel %vm642_vm5, %v2023_v7, %v1070_v40 }
 0x2fe   : > { %v1023_v53 = vperm.slane %v1015_v45, %v2651_v41  ;;  %v1079_v56 = vperm.slane %v1071_v48, %v2651_v41 }
 0x2ff   : > { %v1013_v46 = vsel %vm642_vm5, %v1012_v42, %v625_v13  ;;  %v1069_v49 = vsel %vm642_vm5, %v1068_v43, %v628_v15 }
 0x300   : > { %v1019_v55 = vperm.slane %v1013_v46, %v2651_v41  ;;  %v1075_v59 = vperm.slane %v1069_v49, %v2651_v41  ;;  %v1050_v0 = vrot.slane %v1023_v53, 4  ;;  %v1106_v4 = vrot.slane %v1079_v56, 4 }
 0x301   : > { %v2027_v54 = vpop.permute.xlu0 %2026 }
 0x302   : > { %v2029_v57 = vunpack.i.h.bf16 %v2027_v54  ;;  %v2028_v58 = vunpack.i.l.bf16 %v2027_v54  ;;  %v1038_v3 = vrot.slane %v1019_v55, 4  ;;  %v1094_v13 = vrot.slane %v1075_v59, 4 }
 0x303   : > { %1392 = vadd.xlane.f32.xlu2 %v1391_v8 }
 0x304   : > { %v1024_v60 = vrot.slane %v2029_v57, 4  ;;  %v1027_v61 = vsel %vm642_vm5, %v2029_v57, %v1026_v50  ;;  %v1080_v62 = vrot.slane %v2028_v58, 4  ;;  %v1083_v63 = vsel %vm642_vm5, %v2028_v58, %v1082_v52 }
 0x305   : > { %v1035_v1 = vperm.slane %v1027_v61, %v2651_v41  ;;  %v1091_v2 = vperm.slane %v1083_v63, %v2651_v41 }
 0x306   : > { %v1025_v5 = vsel %vm642_vm5, %v1024_v60, %v2019_v38  ;;  %v1081_v6 = vsel %vm642_vm5, %v1080_v62, %v2018_v39 }
 0x307   : > { %v1031_v9 = vperm.slane %v1025_v5, %v2651_v41  ;;  %v1048_v10 = vrot.slane %v1035_v1, 4  ;;  %v1051_v11 = vsel %vm642_vm5, %v1035_v1, %v1050_v0  ;;  %v1087_v12 = vperm.slane %v1081_v6, %v2651_v41 }
 0x308   : > { %v1059_v14 = vperm.slane %v1051_v11, %v2657_v51  ;;  %v1104_v15 = vrot.slane %v1091_v2, 4  ;;  %v1107_v16 = vsel %vm642_vm5, %v1091_v2, %v1106_v4 }
 0x309   : > { %v1036_v47 = vrot.slane %v1031_v9, 4  ;;  %v1039_v17 = vsel %vm642_vm5, %v1031_v9, %v1038_v3  ;;  %v1049_v18 = vsel %vm642_vm5, %v1048_v10, %v1023_v53  ;;  %v1092_v19 = vrot.slane %v1087_v12, 4 }
 0x30a   : > { %v1047_v20 = vperm.slane %v1039_v17, %v2657_v51  ;;  %v1055_v21 = vperm.slane %v1049_v18, %v2657_v51  ;;  %v1066_v22 = vrot.slane %v1059_v14, 4  ;;  %v1095_v24 = vsel %vm642_vm5, %v1087_v12, %v1094_v13 }
 0x30b   : > { %v1037_v26 = vsel %vm642_vm5, %v1036_v47, %v1019_v55  ;;  %v1093_v27 = vsel %vm642_vm5, %v1092_v19, %v1075_v59  ;;  %v1103_v28 = vperm.slane %v1095_v24, %v2657_v51  ;;  %v1105_v29 = vsel %vm642_vm5, %v1104_v15, %v1079_v56 }
 0x30c   : > { %v1043_v30 = vperm.slane %v1037_v26, %v2657_v51  ;;  %v1062_v31 = vrot.slane %v1047_v20, 4  ;;  %v1064_v33 = vrot.slane %v1055_v21, 4  ;;  %v1067_v34 = vsel %vm642_vm5, 0.0, %v1066_v22 }
 0x30d   : > { %v1099_v35 = vperm.slane %v1093_v27, %v2657_v51  ;;  %v1111_v36 = vperm.slane %v1105_v29, %v2657_v51  ;;  %v1115_v7 = vperm.slane %v1107_v16, %v2657_v51  ;;  %v1118_v37 = vrot.slane %v1103_v28, 4 }
 0x30e   : > { %v1063_v38 = vsel %vm642_vm5, 0.0, %v1062_v31  ;;  %v1140_v39 = vrot.slane %v1067_v34, 4  ;;  %v1060_v40 = vrot.slane %v1043_v30, 4  ;;  %v1065_v42 = vsel %vm642_vm5, 0.0, %v1064_v33 }
 0x30f   : > { %v1119_v43 = vsel %vm642_vm5, 0.0, %v1118_v37  ;;  %v1120_v45 = vrot.slane %v1111_v36, 4  ;;  %v1122_v46 = vrot.slane %v1115_v7, 4  ;;  %v1116_v48 = vrot.slane %v1099_v35, 4 }
 0x310   : > { %v1183_v49 = vrot.slane %v1119_v43, 4  ;;  %v1178_v50 = vsel %vm642_vm5, %v1118_v37, %v1099_v35  ;;  %v1061_v52 = vsel %vm642_vm5, 0.0, %v1060_v40  ;;  %v1124_v53 = vsel %vm642_vm5, %v1062_v31, %v1043_v30 }
 0x311   : > { %v1123_v54 = vsel %vm642_vm5, 0.0, %v1122_v46  ;;  %v1189_v8 = vsel %vm642_vm5, %v1122_v46, %v1111_v36  ;;  %v1117_v55 = vsel %vm642_vm5, 0.0, %v1116_v48  ;;  %v1121_v56 = vsel %vm642_vm5, 0.0, %v1120_v45 }
 0x312   : > { %v1194_v57 = vrot.slane %v1123_v54, 4  ;;  %v1182_v58 = vperm.slane %v1178_v50, %v2651_v41  ;;  %v1184_v59 = vsel %vm642_vm5, %v1183_v49, %v1117_v55  ;;  %v1193_v60 = vperm.slane %v1189_v8, %v2651_v41 }
 0x313   : > { %v1188_v61 = vperm.slane %v1184_v59, %v2651_v41  ;;  %v1128_v62 = vperm.slane %v1124_v53, %v2651_v41  ;;  %v1129_v63 = vrot.slane %v1063_v38, 4  ;;  %v1135_v0 = vsel %vm642_vm5, %v1066_v22, %v1055_v21 }
 0x314   : > { %v1195_v1 = vsel %vm642_vm5, %v1194_v57, %v1121_v56  ;;  %v1202_v2 = vrot.slane %v1182_v58, 4  ;;  %v1214_v3 = vrot.slane %v1193_v60, 4  ;;  %v1139_v4 = vperm.slane %v1135_v0, %v2651_v41  ;;  %v1544_v0 = vld [vmem:[#allocation13 + $0x10] sm:$0xff] }
 0x315   : > { %v1199_v5 = vperm.slane %v1195_v1, %v2651_v41  ;;  %v1200_v6 = vrot.slane %v1188_v61, 4  ;;  %v1130_v9 = vsel %vm642_vm5, %v1129_v63, %v1061_v52  ;;  %v1141_v10 = vsel %vm642_vm5, %v1140_v39, %v1065_v42  ;;  %v1570_v1 = vld [vmem:[#allocation13 + $0x18] sm:$0xff] }
 0x316   : > { %v1203_v11 = vsel %vm642_vm5, %v1188_v61, %v1202_v2  ;;  %v1134_v12 = vperm.slane %v1130_v9, %v2651_v41  ;;  %v1145_v13 = vperm.slane %v1141_v10, %v2651_v41  ;;  %v1148_v14 = vrot.slane %v1128_v62, 4 }
 0x317   : > { %v1211_v15 = vperm.slane %v1203_v11, %v2657_v51  ;;  %v1215_v16 = vsel %vm642_vm5, %v1199_v5, %v1214_v3  ;;  %v1201_v47 = vsel %vm642_vm5, %v1200_v6, %v1182_v58  ;;  %v1212_v17 = vrot.slane %v1199_v5, 4 }
 0x318   : > { %v1223_v18 = vperm.slane %v1215_v16, %v2657_v51  ;;  %v1207_v19 = vperm.slane %v1201_v47, %v2657_v51  ;;  %v1149_v20 = vsel %vm642_vm5, %v1134_v12, %v1148_v14  ;;  %v1160_v21 = vrot.slane %v1139_v4, 4 }
 0x319   : > { %v1213_v22 = vsel %vm642_vm5, %v1212_v17, %v1193_v60  ;;  %v1157_v24 = vperm.slane %v1149_v20, %v2657_v51  ;;  %v1230_v41 = vrot.slane %v1211_v15, 4  ;;  %v1146_v26 = vrot.slane %v1134_v12, 4 }
 0x31a   : > { %v1228_v27 = vrot.slane %v1223_v18, 4  ;;  %v1219_v28 = vperm.slane %v1213_v22, %v2657_v51  ;;  %v1161_v29 = vsel %vm642_vm5, %v1145_v13, %v1160_v21  ;;  %v1158_v30 = vrot.slane %v1145_v13, 4 }
 0x31b   : > { %v1169_v31 = vperm.slane %v1161_v29, %v2657_v51  ;;  %v1231_v33 = vsel %vm642_vm5, %v1223_v18, %v1230_v41  ;;  %v1147_v34 = vsel %vm642_vm5, %v1146_v26, %v1128_v62  ;;  %v1226_v35 = vrot.slane %v1207_v19, 4 }
 0x31c   : > { %v1229_v36 = vsel %vm642_vm5, %v1228_v27, %v1211_v15  ;;  %v1224_v7 = vrot.slane %v1219_v28, 4  ;;  %1488 = vmatpush.msrb.mxu0 %v1231_v33  ;;  %v1153_v37 = vperm.slane %v1147_v34, %v2657_v51  ;;  %v1159_v38 = vsel %vm642_vm5, %v1158_v30, %v1139_v4 }
 0x31d   : > { %1465 = vmatpush.msra.mxu3 %v1229_v36  ;;  %v1174_v39 = vrot.slane %v1169_v31, 4  ;;  %v1165_v40 = vperm.slane %v1159_v38, %v2657_v51  ;;  %v1227_v42 = vsel %vm642_vm5, %v1219_v28, %v1226_v35  ;;  %v1176_v43 = vrot.slane %v1157_v24, 4 }
 0x31e   : > { %v1225_v45 = vsel %vm642_vm5, %v1224_v7, %v1207_v19  ;;  %1442 = vmatpush.msrb.mxu2 %v1227_v42  ;;  %v1172_v46 = vrot.slane %v1153_v37, 4 }
 0x31f   : > { %1419 = vmatpush.msrb.mxu1 %v1225_v45  ;;  %v1175_v48 = vsel %vm642_vm5, %v1174_v39, %v1157_v24  ;;  %v1170_v49 = vrot.slane %v1165_v40, 4  ;;  %v1177_v50 = vsel %vm642_vm5, %v1169_v31, %v1176_v43 }
 0x320   : > { %1466 = vmatpush.msra.mxu3 %v1175_v48  ;;  %1489 = vmatpush.msrb.mxu0 %v1177_v50  ;;  %v1173_v52 = vsel %vm642_vm5, %v1165_v40, %v1172_v46 }
 0x321   : > { %v1171_v53 = vsel %vm642_vm5, %v1170_v49, %v1153_v37  ;;  %1443 = vmatpush.msrb.mxu2 %v1173_v52 }
 0x322   : > { %1420 = vmatpush.msrb.mxu1 %v1171_v53  ;;  %1563 = vmatpush.msrb.mxu3 %v1544_v0 }
 0x323   : > { %1589 = vmatpush.msra.mxu0 %v1570_v1 }
 0x35e   : > { %v1387_v51 = vpop.xlane.xlu1 %1386 }
 0x35f   : > { %2043 = vrcp.f32 %v1387_v51 }
 0x362   : > { %v1384_v54 = vpop.xlane.xlu0 %1383 }
 0x363   : > { %2045 = vrcp.f32 %v1384_v54 }
 0x365   : > { %v2044_v8 = vpop.eup %2043 }
 0x366   : > { %v1399_v55 = vmul.f32 %v2044_v8, %v2819_v23  ;;  %v1494_v23 = vld [vmem:[#allocation13] sm:$0xff] }
 0x367   : > { %1538 = vmatpush.msra.mxu2 %v1494_v23 }
 0x368   : > { %1866 = vmatmul.msk.f32.vlgmr.msrb.gmra.mxu2 %vm1353_vm7, %v1399_v55 }
 0x369   : > { %v2046_v56 = vpop.eup %2045 }
 0x36a   : > { %v1398_v57 = vmul.f32 %v2046_v56, %v2823_v25  ;;  %v1496_v25 = vld [vmem:[#allocation13 + $0x8] sm:$0xff] }
 0x36b   : > { %1515 = vmatpush.msra.mxu1 %v1496_v25 }
 0x36c   : > { %1865 = vmatmul.msk.f32.vlgmr.msrb.gmra.mxu1 %vm1353_vm7, %v1398_v57 }
 0x36e   : > { %v1390_v58 = vpop.xlane.xlu2 %1389 }
 0x36f   : > { %2047 = vrcp.f32 %v1390_v58 }
 0x375   : > { %v2048_v59 = vpop.eup %2047 }
 0x376   : > { %v1400_v60 = vmul.f32 %v2048_v59, %v2827_v32  ;;  %v1393_v61 = vpop.xlane.xlu2 %1392 }
 0x377   : > { %2049 = vrcp.f32 %v1393_v61 }
 0x378   : > { %1867 = vmatmul.msk.f32.vlgmr.msra.gmra.mxu3 %vm1353_vm7, %v1400_v60 }
 0x37d   : > { %v2050_v62 = vpop.eup %2049 }
 0x37e   : > { %v1401_v63 = vmul.f32 %v2050_v62, %v2831_v44 }
 0x380   : > { %1868 = vmatmul.msk.f32.vlgmr.msrb.gmra.mxu0 %vm1353_vm7, %v1401_v63 }
 0x3e9   : > { %v1422_v32 = vpop.f32.mrf.mxu1 }
 0x3ea   : > { %1870 = vmatmul.msk.f32.vlgmr.msra.gmra.mxu2 %vm1236_vm6, %v1422_v32 }
 0x3eb   : > { %v1445_v2 = vpop.f32.mrf.mxu2 }
 0x3ec   : > { %1869 = vmatmul.msk.f32.vlgmr.msra.gmra.mxu1 %vm1236_vm6, %v1445_v2 }
 0x3fb   : > { %v1468_v44 = vpop.f32.mrf.mxu3 }
 0x3fc   : > { %1871 = vmatmul.msk.f32.vlgmr.msrb.gmra.mxu3 %vm1236_vm6, %v1468_v44 }
 0x3fd   : > { %v1491_v3 = vpop.f32.mrf.mxu0 }
 0x3fe   : > { %1872 = vmatmul.msk.f32.vlgmr.msra.gmra.mxu0 %vm1236_vm6, %v1491_v3 }
 0x3ff   : > { %2289 = shalt.err (!%p2286_p13)
}
 0x400   : > { %s2407_s29 = smov 128   ;;  %s2408_s16 = smov 8   ;;  %v2051_v13 = vld [vmem:[%s2607_s6] sm:$0xff] }
 0x401   : > { %1907 = dma.vmem_to_hbm [thread:$0]  (%p2571_p4), %s1632_s21, 512, %s1634_s24, %s1603_s7, %s2407_s29, %s2407_s29, %s2408_s16  }
 0x402   : > { %s1875_s17 = sshll.u32 %s2384_s12, 3  ;;  %s503_s20 = scalar_lea.vmem [#allocation14], %s1839_s5 }
 0x403   : > { %s1614_s27 = scalar_lea.hbm %s2993_s8, %s1875_s17  ;;  %s1616_s23 = sshll.u32 %s503_s20, 4  ;;  %s1617_s23 = int_to_ptr.vmem [resolvable:$true] %s1616_s23 }
 0x404   : > { %s1618_s30 = sshll.u32 %s1614_s27, 4  ;;  %s1598_s12 = scalar_lea.sflag [#allocation4], %s2601_s4  ;;  %s1619_s30 = int_to_ptr.hbm [resolvable:$true] %s1618_s30 }
 0x405   : > { %s2304_s21 = sshra.s32 %s1619_s30, 4  ;;  %s2310_s5 = scalar_lea.hbm %s2993_s8, 16  ;;  %s2305_s21 = int_to_ptr.hbm [resolvable:$true] %s2304_s21 }
 0x406   : > { %s2306_s24 = scalar_lea.hbm %s2305_s21, 8  ;;  %p2311_p8 = scmp.lt.s32.totalorder %s2305_s21, %s2993_s8 }
 0x407   : > { %p2307_p0 = scmp.ne.s32.totalorder %s2305_s21, %s2306_s24  ;;  %p2312_p1 = scmp.lt.s32.totalorder %s2310_s5, %s2306_s24 }
 0x409   : > { %p2308_p2 = pnand %p2307_p0, %p2571_p4  ;;  %p2313_p3 = por %p2312_p1, %p2311_p8 }
 0x40b   : > { %p2309_p5 = pneg %p2308_p2 }
 0x40d   : > { %p2314_p9 = pnand %p2313_p3, %p2309_p5 }
 0x469   : > { %v1517_v5 = vpop.f32.mrf.mxu1 }
 0x46d   : > { %v1540_v4 = vpop.f32.mrf.mxu2 }
 0x46e   : > { %v1541_v6 = vadd.f32 %v1540_v4, %v1517_v5 }
 0x47b   : > { %v1591_v11 = vpop.f32.mrf.mxu0 }
 0x47f   : > { %v1565_v9 = vpop.f32.mrf.mxu3 }
 0x480   : > { %v1568_v10 = vadd.f32 %v1565_v9, %v1541_v6 }
 0x482   : > { %v1594_v12 = vadd.f32 %v1591_v11, %v1568_v10 }
 0x484   : > { %v1595_v14 = vadd.f32 %v2051_v13, %v1594_v12 }
 0x486   : > { %1596 = vst.msk [vmem:[%s503_s20] sm:$0xff] %vm513_vm0, %v1595_v14 }
 0x487   : > { %2317 = shalt.err (!%p2314_p9)
}
 0x488   : > { %1906 = dma.vmem_to_hbm [thread:$0]  (%p2571_p4), %s1617_s23, 128, %s1619_s30, %s1598_s12  }
 0x489 PF: > { %s3024_s4 = sld [smem:[#allocation24_spill]]  ;;  %p1934_p10 = pnand %p1832_p6, %p2579_p7 }
 0x48b   : > { %p1935_p11 = pneg %p1934_p10 }
 0x48f   : > { %s1648_s15 = sand.u32 1, %s3024_s4  }
 0x490   : > { %s1649_s2 = scalar_lea.sflag [#allocation4], %s1648_s15 }
 0x491   : > { %2363 = dma.done.wait (%p1935_p11), %s1649_s2, 128  }
 0x492   : > { %2365 = vsyncadd (%p1935_p11), %s1649_s2, 4294967168  ;;  %s1659_s22 = scalar_lea.sflag [#allocation16], %s1648_s15 }
 0x493   : > { %2367 = dma.done.wait (%p1935_p11), %s1659_s22, 512  }
 0x494   : > { %2369 = vsyncadd (%p1935_p11), %s1659_s22, 4294966784  ;;  %s34_s14 = sadd.s32 1, %s2392_s14   ;;  %s3026_s28 = sld [smem:[#allocation25_spill]] }
 0x495   : > { %p31_p12 = scmp.ge.s32.totalorder %s34_s14, 4   ;;  %s3027_s11 = sld [smem:[#allocation27_spill]] }
 0x496   : > { %s3028_s29 = sld [smem:[#allocation26_spill]]  ;;  %s3029_s30 = smov %s2376_s10 }
 0x497   : > { %s3031_s12 = smov %s2388_s13 }
 0x498   :  { %33 = sbr.rel (!%p31_p12) target bundleno = 18 (0x12), region = 151 }
 0x49a   : > { %s3030_s10 = smov %s3026_s28 }
 0x49c   : > { %s3032_s13 = smov %s3028_s29 }
 0x49d   :  { %1665 = vsyncpa [#allocation3], 1 }
 0x49e   :  { %1667 = vsyncpa [#allocation3 + $0x1], 1 }
 0x49f   :  { %1668 = vsyncpa [#allocation6], 1 }
 0x4a0   :  { %1670 = vsyncpa [#allocation6 + $0x1], 1 }
 0x4a1   :  { %1671 = vsyncpa [#allocation9], 1 }
 0x4a2   :  { %1672 = vsyncpa [#allocation12], 1 }
 0x4a3   :  { %1673 = vsyncpa [#allocation4], 1 }
 0x4a4   :  { %1675 = vsyncpa [#allocation4 + $0x1], 1 }
 0x4a5   :  { %1676 = vsyncpa [#allocation16], 1 }
 0x4a6   :  { %1678 = vsyncpa [#allocation16 + $0x1], 1 }

// kernel: tpu_custom_call.1
= control target key start
LH: loop header
LB: loop body
LE: loop exit
PB: predicated region body
PF: predicated region fallthrough
CT: control target
= control target key end

     0   :  { %s2985_s0 = inlined_call_operand.hbm [shape: f32[2,8,32], index: 0, kind: input, shape index: {}]   ;;  %s2986_s1 = inlined_call_operand.hbm [shape: f32[2,16,32], index: 1, kind: input, shape index: {}]   ;;  %s2987_s2 = inlined_call_operand.hbm [shape: f32[1,4,8,16], index: 2, kind: input, shape index: {}]   ;;  %s2988_s3 = inlined_call_operand.vmem [shape: f32[1,32], index: 3, kind: input, shape index: {}]   ;;  %s2989_s4 = inlined_call_operand.hbm [shape: f32[32,32], index: 4, kind: input, shape index: {}]   ;;  %s2990_s5 = inlined_call_operand.hbm [shape: f32[32,32], index: 5, kind: input, shape index: {}]   ;;  %s2991_s6 = inlined_call_operand.hbm [shape: f32[32,32], index: 6, kind: input, shape index: {}]   ;;  %s2992_s7 = inlined_call_operand.hbm [shape: f32[4,8,32], index: 7, kind: input, shape index: {}]   ;;  %s2993_s8 = inlined_call_operand.hbm [shape: f32[2,8,32], index: 8, kind: output, shape index: {0}]   ;;  %s2994_s9 = inlined_call_operand.hbm [shape: f32[2,4,8,16], index: 9, kind: output, shape index: {1}]  }
   0x1   :  { %3001 = sst [smem:[#allocation29_spill]] %s2987_s2 }
   0x2   :  { %3002 = sst [smem:[#allocation30_spill]] %s2989_s4 }
   0x3   :  { %3003 = sst [smem:[#allocation31_spill]] %s2990_s5 }
   0x4   :  { %3004 = sst [smem:[#allocation32_spill]] %s2991_s6 }
   0x5   :  { %3005 = sst [smem:[#allocation33_spill]] %s2992_s7 }
   0x6   :  { %15 = vsyncpa [#allocation3], 0 }
   0x7   :  { %17 = vsyncpa [#allocation3 + $0x1], 0 }
   0x8   :  { %18 = vsyncpa [#allocation6], 0 }
   0x9   :  { %20 = vsyncpa [#allocation6 + $0x1], 0 }
   0xa   :  { %21 = vsyncpa [#allocation9], 0 }
   0xb   :  { %22 = vsyncpa [#allocation12], 0 }
   0xc   :  { %23 = vsyncpa [#allocation4], 0 }
   0xd   :  { %25 = vsyncpa [#allocation4 + $0x1], 0 }
   0xe   :  { %26 = vsyncpa [#allocation16], 0 }
   0xf   :  { %28 = vsyncpa [#allocation16 + $0x1], 0  ;;  %s2459_s30 = smov 0   ;;  %s2461_s10 = smov 0  }
  0x10   :  { %s2463_s11 = smov 0   ;;  %s2465_s12 = smov 0  }
  0x11   :  { %s2467_s13 = smov 0   ;;  %s2469_s14 = smov 0  }
  0x12 LB: > { %3006 = sst [smem:[#allocation24_spill]] %s2372_s30  ;;  %s2490_s15 = sadd.s32 4294967295, %s2392_s14   ;;  %s2392_s14 = sphi %s2469_s14, %s34_s14   ;;  %s2388_s13 = sphi %s2467_s13, %s3032_s13   ;;  %s2384_s12 = sphi %s2465_s12, %s3031_s12   ;;  %s2380_s11 = sphi %s2463_s11, %s3027_s11   ;;  %s2376_s10 = sphi %s2461_s10, %s3030_s10   ;;  %s2372_s30 = sphi %s2459_s30, %s3029_s30  }
  0x13   : > { %3007 = sst [smem:[#allocation25_spill]] %s2380_s11  ;;  %p1826_p0 = scmp.ge.s32.totalorder %s2392_s14, 1 }
  0x14   : > { %p69_p1 = scmp.eq.s32.totalorder %s2490_s15, 0  ;;  %p292_p2 = scmp.lt.s32.totalorder %s2392_s14, 3 }
  0x15   : > { %s3008_s2 = sld [smem:[#allocation29_spill]]  ;;  %s2394_s20 = smov [#allocation7]  }
  0x16   : > { %p2498_p3 = pnand %p1826_p0, %p292_p2  ;;  %s307_s21 = sshll.u32 %s2394_s20, 4  ;;  %s308_s21 = int_to_ptr.vmem [resolvable:$true] %s307_s21 }
  0x17   : > { %p1832_p6 = scmp.ge.s32.totalorder %s2392_s14, 2  ;;  %s3011_s4 = sld [smem:[#allocation30_spill]] }
  0x18   : > { %p1910_p4 = pneg %p2498_p3  ;;  %s2995_s26 = smov 128  }
  0x19   : > { %s2996_s27 = smov 8   ;;  %s2397_s28 = smov [#allocation8]  }
  0x1a   : > { %p2506_p5 = pnand %p1910_p4, %p69_p1  ;;  %s324_s29 = sshll.u32 %s2397_s28, 4  ;;  %s325_s29 = int_to_ptr.vmem [resolvable:$true] %s324_s29 }
  0x1b   : > { %s305_s18 = sshll.u32 %s3008_s2, 4  ;;  %s3012_s6 = sld [smem:[#allocation32_spill]]  ;;  %s306_s18 = int_to_ptr.hbm [resolvable:$true] %s305_s18 }
  0x1c   : > { %1913 = dma.hbm_to_vmem [thread:$0]  (!%p2506_p5), %s306_s18, 512, %s308_s21, [#allocation6], %s2995_s26, %s2995_s26, %s2996_s27  }
  0x1d   : > { %s322_s25 = sshll.u32 %s3011_s4, 4  ;;  %s3013_s5 = sld [smem:[#allocation31_spill]]  ;;  %s323_s25 = int_to_ptr.hbm [resolvable:$true] %s322_s25 }
  0x1e   : > { %1916 = dma.hbm_to_vmem [thread:$0]  (!%p2506_p5), %s323_s25, 512, %s325_s29, [#allocation9], %s2995_s26, %s2995_s26, %s2996_s27  }
  0x1f   : > { %s2398_s18 = smov [#allocation11]   ;;  %s2399_s25 = smov [#allocation10]  }
  0x20   : > { %s352_s21 = sshll.u32 %s2398_s18, 4  ;;  %s338_s28 = sshll.u32 %s2399_s25, 4  ;;  %s353_s21 = int_to_ptr.vmem [resolvable:$true] %s352_s21  ;;  %s339_s28 = int_to_ptr.vmem [resolvable:$true] %s338_s28 }
  0x21   : > { %s350_s20 = sshll.u32 %s3012_s6, 4  ;;  %s3014_s7 = sld [smem:[#allocation33_spill]]  ;;  %s351_s20 = int_to_ptr.hbm [resolvable:$true] %s350_s20 }
  0x22   : > { %1922 = dma.hbm_to_vmem [thread:$0]  (!%p2506_p5), %s351_s20, 512, %s353_s21, [#allocation12], %s2995_s26, %s2995_s26, %s2996_s27  }
  0x23   : > { %s336_s2 = sshll.u32 %s3013_s5, 4  ;;  %s2400_s20 = smov [#allocation13]   ;;  %s337_s2 = int_to_ptr.hbm [resolvable:$true] %s336_s2 }
  0x24   : > { %1919 = dma.hbm_to_vmem [thread:$0]  (!%p2506_p5), %s337_s2, 512, %s339_s28, [#allocation9], %s2995_s26, %s2995_s26, %s2996_s27  }
  0x25   : > { %s366_s23 = sshll.u32 %s2400_s20, 4  ;;  %s1825_s24 = sadd.s32 4294967294, %s2392_s14   ;;  %s367_s23 = int_to_ptr.vmem [resolvable:$true] %s366_s23 }
  0x26   : > { %s46_s18 = sadd.s32 1, %s2388_s13  ;;  %s55_s21 = sadd.s32 1, %s2380_s11 }
  0x27   : > { %s364_s17 = sshll.u32 %s3014_s7, 4  ;;  %p48_p7 = scmp.ge.s32.totalorder %s46_s18, 2  ;;  %s365_s17 = int_to_ptr.hbm [resolvable:$true] %s364_s17 }
  0x28   : > { %1925 = dma.hbm_to_vmem [thread:$0]  (!%p2506_p5), %s365_s17, 512, %s367_s23, [#allocation12], %s2995_s26, %s2995_s26, %s2996_s27  }
  0x29   : > { %p62_p8 = scmp.ne.s32.totalorder %s2380_s11, %s2376_s10  ;;  %p63_p9 = scmp.eq.s32.totalorder %s2392_s14, 0 }
  0x2a   : > { %p68_p10 = scmp.ne.s32.totalorder %s2376_s10, %s2372_s30  ;;  %s3034_s18 = smov (%p48_p7, %s46_s18), 0 }
  0x2b   : > { %3015 = sst [smem:[#allocation26_spill]] %s3034_s18  ;;  %p2558_p11 = por %p63_p9, %p62_p8 }
  0x2c   : > { %p2564_p12 = por %p69_p1, %p68_p10  ;;  %s50_s25 = ssub.s32 %s2388_s13, %s3034_s18 }
  0x2d   : > { %p251_p13 = scmp.eq.s32.totalorder %s2490_s15, 1  ;;  %p53_p0 = scmp.eq.s32.totalorder %s50_s25, 0 }
  0x2e   : > { %p257_p2 = scmp.eq.s32.totalorder %s1825_s24, 1  ;;  %p1945_p5 = scmp.lt.s32.totalorder %s2392_s14, 2 }
  0x2f   : > { %p2571_p4 = por %p251_p13, %p62_p8  ;;  %s380_s17 = sand.u32 1, %s2380_s11  }
  0x30   : > { %s2577_s29 = scalar_select %p53_p0, %s2380_s11, %s55_s21  }
  0x31   : > { %p2579_p7 = por %p257_p2, %p68_p10  ;;  %s1833_s20 = sshll.u32 %s380_s17, 3 }
  0x32   : > { %3019 = sst [smem:[#allocation27_spill]] %s2577_s29  ;;  %s1834_s23 = sshll.u32 %s2388_s13, 3 }
  0x33   : > { %s3020_s16 = scalar_select %p2579_p7, 1, 0 }
  0x34   : > { %s389_s24 = scalar_lea.hbm %s2985_s0, %s1834_s23  ;;  %s384_s25 = scalar_lea.vmem [#allocation2], %s1833_s20 }
  0x35   : > { %3021 = sst [smem:[#allocation28_spill]] %s3020_s16  ;;  %s393_s4 = sshll.u32 %s384_s25, 4  ;;  %s394_s4 = int_to_ptr.vmem [resolvable:$true] %s393_s4 }
  0x36   : > { %s391_s5 = sshll.u32 %s389_s24, 4  ;;  %p1927_p8 = pnand %p1945_p5, %p2558_p11  ;;  %s392_s5 = int_to_ptr.hbm [resolvable:$true] %s391_s5 }
  0x37   : > { %s1835_s21 = sshll.u32 %s380_s17, 4  ;;  %s1880_s6 = sshll.u32 %s2388_s13, 4 }
  0x38   : > { %s381_s7 = scalar_lea.sflag [#allocation3], %s380_s17  ;;  %s404_s18 = scalar_lea.vmem [#allocation5], %s1835_s21 }
  0x39   : > { %1929 = dma.hbm_to_vmem [thread:$0]  (!%p1927_p8), %s392_s5, 128, %s394_s4, %s381_s7  }
  0x3a   : > { %s412_s29 = sshll.u32 %s404_s18, 4  ;;  %s400_s11 = sand.u32 1, %s2392_s14   ;;  %s413_s29 = int_to_ptr.vmem [resolvable:$true] %s412_s29 }
  0x3b   : > { %s409_s26 = scalar_lea.hbm %s2986_s1, %s1880_s6  ;;  %s401_s20 = scalar_lea.sflag [#allocation6], %s400_s11 }
  0x3c   : > { %s410_s27 = sshll.u32 %s409_s26, 4  ;;  %s3022_s23 = smov 8   ;;  %s411_s27 = int_to_ptr.hbm [resolvable:$true] %s410_s27 }
  0x3d   : > { %s3023_s24 = smov 128   ;;  %424 = sbr.rel (%p2498_p3) target bundleno = 1161 (0x489), region = 52 }
  0x3e   : > { %1932 = dma.hbm_to_vmem [thread:$0]  (!%p1927_p8), %s411_s27, 256, %s413_s29, %s401_s20, %s3023_s24, %s3023_s24, %s3022_s23  }
  0x3f   : > { %s2601_s4 = sand.u32 (!%p2498_p3), 1, %s2376_s10  }
  0x40   : > { %s1839_s5 = sshll.u32 (!%p2498_p3), %s2601_s4, 3  ;;  %s427_s7 = scalar_lea.sflag (!%p2498_p3), [#allocation3], %s2601_s4 }
  0x41   : > { %s2607_s6 = scalar_lea.vmem (!%p2498_p3), [#allocation2], %s1839_s5 }
  0x42   : > { %2343 = dma.done.wait (%p2564_p12), %s427_s7, 128  }
  0x43   : > { %2345 = vsyncadd (%p2564_p12), %s427_s7, 4294967168  ;;  %s436_s30 = sand.u32 1, %s2490_s15   ;;  %s1840_s11 = sshll.u32 %s2601_s4, 4 }
  0x44   : > { %s437_s19 = scalar_lea.sflag [#allocation6], %s436_s30  ;;  %s440_s18 = scalar_lea.vmem [#allocation5], %s1840_s11 }
  0x45   : > { %2347 = dma.done.wait (%p2564_p12), %s437_s19, 256  }
  0x46   : > { %2349 = vsyncadd (%p2564_p12), %s437_s19, 4294967040 }
  0x47   : > { %2351 = dma.done.wait (%p69_p1), [#allocation6], 512  }
  0x48   : > { %2353 = vsyncadd (%p69_p1), [#allocation6], 4294966784 }
  0x49   : > { %2355 = dma.done.wait (%p69_p1), [#allocation9], 1024  }
  0x4a   : > { %2357 = vsyncadd (%p69_p1), [#allocation9], 4294966272 }
  0x4b   : > { %2359 = dma.done.wait (%p69_p1), [#allocation12], 1024  }
  0x4c   : > { %2361 = vsyncadd (%p69_p1), [#allocation12], 4294966272  ;;  %v574_v0 = vld [vmem:[#allocation10 + $0x18] sm:$0xff]  ;;  %v573_v1 = vld [vmem:[#allocation10 + $0x10] sm:$0xff]  ;;  %vm513_vm0 = vcmask 261120   ;;  %v2401_v9 = vmov 32.0  }
  0x4d   : > { %v511_v2 = vld [vmem:[%s2607_s6] sm:$0xff]  ;;  %593 = vmatpush.msra.mxu1 %v574_v0  ;;  %v572_v4 = vld [vmem:[#allocation10 + $0x8] sm:$0xff]  ;;  %v571_v6 = vld [vmem:[#allocation10] sm:$0xff]  ;;  %2031 = vrcp.f32 %v2401_v9  ;;  %s2402_s15 = smov 104   ;;  %s2403_s2 = smov 120   ;;  %vm642_vm5 = vcmask 1047556  }
  0x4e   : > { %v512_v3 = vmul.f32 %v511_v2, %v511_v2  ;;  %v2633_v7 = vld [vmem:[%s440_s18] sm:$0xff]  ;;  %v2637_v8 = vld [vmem:[%s440_s18 + $0x8] sm:$0xff]  ;;  %s2404_s16 = smov 112   ;;  %v2405_v36 = vmov 1983009808   ;;  %vm1236_vm6 = vcmask 64512  }
  0x4f   : > { %594 = vmatpush.msra.mxu1 %v573_v1  ;;  %v547_v13 = vld [vmem:[#allocation8 + $0x18] sm:$0xff]  ;;  %v546_v14 = vld [vmem:[#allocation8 + $0x10] sm:$0xff]  ;;  %v545_v16 = vld [vmem:[#allocation8 + $0x8] sm:$0xff]  ;;  %v647_v37 = vunpack.c.l.s4 %v2405_v36  ;;  %v2406_v46 = vmov 1934713408   ;;  %s1847_s17 = sshll.u32 %s2601_s4, 5 }
  0x50   : > { %v514_v5 = vsel %vm513_vm0, %v512_v3, 0.0  ;;  %563 = vmatpush.msra.mxu0 %v547_v13  ;;  %v544_v17 = vld [vmem:[#allocation8] sm:$0xff]  ;;  %v2030_v30 = vld [vmem:[%s2988_s3] ss:$0 sm:$0xff]  ;;  %v671_v47 = vunpack.c.l.s4 %v2406_v46  ;;  %vm1353_vm7 = vcmask 130048   ;;  %s2802_s25 = scalar_lea.vmem [#allocation15], %s1847_s17 }
  0x51   : > { %515 = vadd.xlane.f32.xlu0 %v514_v5  ;;  %595 = vmatpush.msra.mxu1 %v572_v4  ;;  %v2651_v41 = vunpack.c.0.s8 %v647_v37  ;;  %s1631_s21 = sshll.u32 %s2802_s25, 4  ;;  %s1881_s26 = sshll.u32 %s2384_s12, 5  ;;  %s1632_s21 = int_to_ptr.vmem [resolvable:$true] %s1631_s21 }
  0x52   : > { %564 = vmatpush.msra.mxu0 %v546_v14  ;;  %v2657_v51 = vunpack.c.0.s8 %v671_v47  ;;  %s1630_s23 = scalar_lea.hbm %s2994_s9, %s1881_s26  ;;  %s1603_s7 = scalar_lea.sflag [#allocation16], %s2601_s4 }
  0x53   : > { %596 = vmatpush.msra.mxu1 %v571_v6  ;;  %v2032_v10 = vpop.eup %2031  ;;  %s1633_s24 = sshll.u32 %s1630_s23, 4  ;;  %s1634_s24 = int_to_ptr.hbm [resolvable:$true] %s1633_s24 }
  0x54   : > { %1849 = vmatmul.msk.f32.vlgmr.msra.gmra.mxu1 %vm513_vm0, %v2633_v7  ;;  %v518_v11 = vmul.f32 32.0, %v2032_v10  ;;  %565 = vmatpush.msra.mxu0 %v545_v16  ;;  %vm522_vm1 = vweird.f32 %v2032_v10  ;;  %s2276_s30 = sshra.s32 %s1634_s24, 4  ;;  %s2277_s30 = int_to_ptr.hbm [resolvable:$true] %s2276_s30 }
  0x55   : > { %s2278_s11 = scalar_lea.hbm %s2277_s30, 32  ;;  %p2283_p10 = scmp.lt.s32.totalorder %s2277_s30, %s2994_s9 }
  0x56   : > { %v519_v12 = vsub.f32 1.0, %v518_v11  ;;  %566 = vmatpush.msra.mxu0 %v544_v17  ;;  %p2279_p1 = scmp.ne.s32.totalorder %s2277_s30, %s2278_s11 }
  0x58   : > { %v520_v15 = vmul.f32 %v2032_v10, %v519_v12  ;;  %p2280_p3 = pnand %p2279_p1, %p2571_p4 }
  0x5a   : > { %v521_v18 = vadd.f32 %v2032_v10, %v520_v15  ;;  %p2281_p9 = pneg %p2280_p3 }
  0x5c   : > { %1850 = vmatmul.msk.f32.gmra.mxu1 %vm513_vm0, %v2637_v8  ;;  %v523_v19 = vsel %vm522_vm1, %v2032_v10, %v521_v18 }
  0xc4   : > { %v516_v20 = vpop.xlane.xlu0 %515 }
  0xc5   : > { %v524_v21 = vmul.f32 %v523_v19, %v516_v20 }
  0xc7   : > { %v525_v22 = vadd.f32 1e-06, %v524_v21 }
  0xc9   : > { %2033 = vrsqrt.f32 %v525_v22  ;;  %vm532_vm3 = vweird.f32 %v525_v22 }
  0xcf   : > { %v2034_v23 = vpop.eup %2033 }
  0xd0   : > { %v527_v24 = vmul.f32 %v2034_v23, %v525_v22  ;;  %vm533_vm2 = vweird.f32 %v2034_v23 }
  0xd1   : > { %v598_v26 = vpop.f32.mrf.mxu1  ;;  %vm534_vm4 = vmor %vm532_vm3, %vm533_vm2 }
  0xd2   : > { %v528_v25 = vmul.f32 %v2034_v23, %v527_v24  ;;  %766 = vrot.lane.b32.xlu1 %v598_v26, %s2402_s15  ;;  %754 = vrot.lane.b32.xlu2 %v598_v26, %s2403_s2  ;;  %v774_v39 = vrot.slane %v598_v26, 4 }
  0xd4   : > { %v529_v27 = vmul.f32 0.5, %v528_v25 }
  0xd6   : > { %v530_v28 = vsub.f32 1.5, %v529_v27 }
  0xd8   : > { %v531_v29 = vmul.f32 %v2034_v23, %v530_v28 }
  0xd9   : > { %v601_v31 = vpop.f32.mrf.mxu1 }
  0xda   : > { %v535_v32 = vsel %vm534_vm4, %v2034_v23, %v531_v29  ;;  %762 = vrot.lane.b32.xlu1 %v601_v31, %s2404_s16  ;;  %756 = vrot.lane.b32.xlu0 %v601_v31, %s2403_s2  ;;  %v830_v1 = vrot.slane %v601_v31, 4 }
  0xdb   : > { %v536_v33 = vmul.f32 %v535_v32, %v511_v2  ;;  %760 = vrot.lane.b32.xlu2 %v598_v26, %s2404_s16 }
  0xdd   : > { %v541_v34 = vmul.f32 %v2030_v30, %v536_v33 }
  0xdf   : > { %1848 = vmatmul.msk.f32.vlgmr.msra.gmra.mxu0 %vm513_vm0, %v541_v34 }
  0xe2   : > { %768 = vrot.lane.b32.xlu1 %v601_v31, %s2402_s15 }
 0x12c   : > { %v755_v35 = vpop.permute.xlu2 %754 }
 0x12d   : > { %v786_v45 = vrot.slane %v755_v35, 4 }
 0x135   : > { %v761_v38 = vpop.permute.xlu2 %760 }
 0x136   : > { %v772_v40 = vrot.slane %v761_v38, 4  ;;  %v775_v42 = vsel %vm642_vm5, %v761_v38, %v774_v39 }
 0x137   : > { %v783_v44 = vperm.slane %v775_v42, %v2651_v41 }
 0x138   : > { %v773_v43 = vsel %vm642_vm5, %v772_v40, %v598_v26 }
 0x139   : > { %v779_v48 = vperm.slane %v773_v43, %v2651_v41  ;;  %v810_v49 = vrot.slane %v783_v44, 4 }
 0x13b   : > { %v798_v54 = vrot.slane %v779_v48, 4 }
 0x144   : > { %v767_v50 = vpop.permute.xlu1 %766 }
 0x145   : > { %v784_v52 = vrot.slane %v767_v50, 4  ;;  %v787_v53 = vsel %vm642_vm5, %v767_v50, %v786_v45 }
 0x146   : > { %v795_v55 = vperm.slane %v787_v53, %v2651_v41 }
 0x147   : > { %v785_v56 = vsel %vm642_vm5, %v784_v52, %v755_v35 }
 0x148   : > { %v791_v57 = vperm.slane %v785_v56, %v2651_v41  ;;  %v808_v58 = vrot.slane %v795_v55, 4  ;;  %v811_v59 = vsel %vm642_vm5, %v795_v55, %v810_v49 }
 0x149   : > { %v819_v60 = vperm.slane %v811_v59, %v2657_v51 }
 0x14a   : > { %v796_v61 = vrot.slane %v791_v57, 4  ;;  %v799_v62 = vsel %vm642_vm5, %v791_v57, %v798_v54  ;;  %v809_v63 = vsel %vm642_vm5, %v808_v58, %v783_v44 }
 0x14b   : > { %v807_v0 = vperm.slane %v799_v62, %v2657_v51  ;;  %v815_v3 = vperm.slane %v809_v63, %v2657_v51  ;;  %v826_v4 = vrot.slane %v819_v60, 4 }
 0x14c   : > { %v797_v2 = vsel %vm642_vm5, %v796_v61, %v779_v48  ;;  %v763_v5 = vpop.permute.xlu1 %762  ;;  %v757_v11 = vpop.permute.xlu0 %756 }
 0x14d   : > { %v803_v6 = vperm.slane %v797_v2, %v2657_v51  ;;  %v822_v9 = vrot.slane %v807_v0, 4  ;;  %v828_v10 = vrot.slane %v763_v5, 4  ;;  %v831_v12 = vsel %vm642_vm5, %v763_v5, %v830_v1 }
 0x14e   : > { %v824_v13 = vrot.slane %v815_v3, 4  ;;  %v827_v14 = vsel %vm642_vm5, 0.0, %v826_v4  ;;  %v842_v16 = vrot.slane %v757_v11, 4  ;;  %v839_v19 = vperm.slane %v831_v12, %v2651_v41 }
 0x14f   : > { %v829_v15 = vsel %vm642_vm5, %v828_v10, %v601_v31  ;;  %v820_v17 = vrot.slane %v803_v6, 4  ;;  %v823_v18 = vsel %vm642_vm5, 0.0, %v822_v9  ;;  %v900_v20 = vrot.slane %v827_v14, 4 }
 0x150   : > { %v825_v21 = vsel %vm642_vm5, 0.0, %v824_v13  ;;  %v835_v22 = vperm.slane %v829_v15, %v2651_v41  ;;  %v889_v24 = vrot.slane %v823_v18, 4  ;;  %v866_v27 = vrot.slane %v839_v19, 4 }
 0x151   : > { %v821_v29 = vsel %vm642_vm5, 0.0, %v820_v17  ;;  %v901_v30 = vsel %vm642_vm5, %v900_v20, %v825_v21  ;;  %v895_v43 = vsel %vm642_vm5, %v826_v4, %v815_v3  ;;  %v884_v49 = vsel %vm642_vm5, %v822_v9, %v803_v6 }
 0x152   : > { %v854_v32 = vrot.slane %v835_v22, 4  ;;  %v890_v37 = vsel %vm642_vm5, %v889_v24, %v821_v29  ;;  %v905_v42 = vperm.slane %v901_v30, %v2651_v41  ;;  %v899_v58 = vperm.slane %v895_v43, %v2651_v41 }
 0x153   : > { %v894_v50 = vperm.slane %v890_v37, %v2651_v41  ;;  %v888_v10 = vperm.slane %v884_v49, %v2651_v41 }
 0x154   : > { %v769_v23 = vpop.permute.xlu1 %768  ;;  %v918_v59 = vrot.slane %v905_v42, 4  ;;  %v920_v17 = vrot.slane %v899_v58, 4 }
 0x155   : > { %v840_v25 = vrot.slane %v769_v23, 4  ;;  %v843_v26 = vsel %vm642_vm5, %v769_v23, %v842_v16  ;;  %v906_v6 = vrot.slane %v894_v50, 4  ;;  %v908_v24 = vrot.slane %v888_v10, 4 }
 0x156   : > { %v851_v28 = vperm.slane %v843_v26, %v2651_v41  ;;  %v919_v15 = vsel %vm642_vm5, %v918_v59, %v899_v58  ;;  %v921_v30 = vsel %vm642_vm5, %v905_v42, %v920_v17 }
 0x157   : > { %v841_v31 = vsel %vm642_vm5, %v840_v25, %v757_v11  ;;  %v907_v20 = vsel %vm642_vm5, %v906_v6, %v888_v10  ;;  %v929_v37 = vperm.slane %v921_v30, %v2657_v51 }
 0x158   : > { %v847_v33 = vperm.slane %v841_v31, %v2651_v41  ;;  %v864_v34 = vrot.slane %v851_v28, 4  ;;  %v867_v35 = vsel %vm642_vm5, %v851_v28, %v866_v27  ;;  %v913_v29 = vperm.slane %v907_v20, %v2657_v51 }
 0x159   : > { %v875_v36 = vperm.slane %v867_v35, %v2657_v51  ;;  %v909_v35 = vsel %vm642_vm5, %v894_v50, %v908_v24 }
 0x15a   : > { %v852_v38 = vrot.slane %v847_v33, 4  ;;  %v855_v39 = vsel %vm642_vm5, %v847_v33, %v854_v32  ;;  %v865_v40 = vsel %vm642_vm5, %v864_v34, %v839_v19  ;;  %v917_v42 = vperm.slane %v909_v35, %v2657_v51 }
 0x15b   : > { %v863_v44 = vperm.slane %v855_v39, %v2657_v51  ;;  %v871_v45 = vperm.slane %v865_v40, %v2657_v51  ;;  %v882_v46 = vrot.slane %v875_v36, 4  ;;  %v932_v39 = vrot.slane %v913_v29, 4 }
 0x15c   : > { %v2693_v47 = vpop.f32.mrf.mxu0  ;;  %v853_v48 = vsel %vm642_vm5, %v852_v38, %v835_v22  ;;  %v925_v22 = vperm.slane %v919_v15, %v2657_v51  ;;  %v936_v49 = vrot.slane %v917_v42, 4 }
 0x15d   : > { %635 = vrot.lane.b32.xlu1 %v2693_v47, %s2404_s16  ;;  %632 = vrot.lane.b32.xlu2 %v2693_v47, %s2403_s2  ;;  %v859_v52 = vperm.slane %v853_v48, %v2657_v51  ;;  %v878_v53 = vrot.slane %v863_v44, 4  ;;  %v880_v54 = vrot.slane %v871_v45, 4  ;;  %v883_v55 = vsel %vm642_vm5, 0.0, %v882_v46 }
 0x15e   : > { %v949_v56 = vsel %vm642_vm5, %v882_v46, %v871_v45  ;;  %v954_v57 = vrot.slane %v883_v55, 4  ;;  %v930_v34 = vrot.slane %v925_v22, 4  ;;  %v934_v45 = vrot.slane %v929_v37, 4 }
 0x15f   : > { %v876_v60 = vrot.slane %v859_v52, 4  ;;  %v879_v61 = vsel %vm642_vm5, 0.0, %v878_v53  ;;  %v881_v62 = vsel %vm642_vm5, 0.0, %v880_v54  ;;  %v938_v63 = vsel %vm642_vm5, %v878_v53, %v859_v52 }
 0x160   : > { %v943_v0 = vrot.slane %v879_v61, 4  ;;  %v942_v1 = vperm.slane %v938_v63, %v2651_v41  ;;  %v953_v2 = vperm.slane %v949_v56, %v2651_v41  ;;  %v955_v3 = vsel %vm642_vm5, %v954_v57, %v881_v62 }
 0x161   : > { %v877_v4 = vsel %vm642_vm5, 0.0, %v876_v60  ;;  %v959_v5 = vperm.slane %v955_v3, %v2651_v41  ;;  %v931_v43 = vsel %vm642_vm5, %v930_v34, %v913_v29  ;;  %v933_v46 = vsel %vm642_vm5, %v925_v22, %v932_v39 }
 0x162   : > { %v944_v9 = vsel %vm642_vm5, %v943_v0, %v877_v4  ;;  %v962_v11 = vrot.slane %v942_v1, 4  ;;  %v974_v12 = vrot.slane %v953_v2, 4  ;;  %v935_v50 = vsel %vm642_vm5, %v934_v45, %v917_v42  ;;  %v607_v4 = vld [vmem:[#allocation11 + $0x18] sm:$0xff] }
 0x163   : > { %v948_v13 = vperm.slane %v944_v9, %v2651_v41  ;;  %v972_v14 = vrot.slane %v959_v5, 4  ;;  %v937_v52 = vsel %vm642_vm5, %v929_v37, %v936_v49  ;;  %v644_v60 = vrot.slane %v2693_v47, 4  ;;  %620 = vmatpush.msra.mxu2 %v607_v4 }
 0x164   : > { %v975_v16 = vsel %vm642_vm5, %v959_v5, %v974_v12  ;;  %v606_v5 = vld [vmem:[#allocation11 + $0x10] sm:$0xff] }
 0x165   : > { %638 = vrot.lane.b32.xlu2 %v2693_v47, %s2402_s15  ;;  %v960_v18 = vrot.slane %v948_v13, 4  ;;  %v973_v19 = vsel %vm642_vm5, %v972_v14, %v953_v2  ;;  %v963_v23 = vsel %vm642_vm5, %v948_v13, %v962_v11  ;;  %v983_v26 = vperm.slane %v975_v16, %v2657_v51  ;;  %v605_v13 = vld [vmem:[#allocation11 + $0x8] sm:$0xff]  ;;  %621 = vmatpush.msra.mxu2 %v606_v5 }
 0x166   : > { %v979_v21 = vperm.slane %v973_v19, %v2657_v51  ;;  %v971_v31 = vperm.slane %v963_v23, %v2657_v51 }
 0x167   : > { %v961_v25 = vsel %vm642_vm5, %v960_v18, %v942_v1  ;;  %v988_v36 = vrot.slane %v983_v26, 4  ;;  %v604_v18 = vld [vmem:[#allocation11] sm:$0xff]  ;;  %622 = vmatpush.msra.mxu2 %v605_v13 }
 0x168   : > { %v967_v27 = vperm.slane %v961_v25, %v2657_v51  ;;  %v984_v28 = vrot.slane %v979_v21, 4  ;;  %v990_v40 = vrot.slane %v971_v31, 4 }
 0x169   : > { %v989_v44 = vsel %vm642_vm5, %v988_v36, %v971_v31  ;;  %623 = vmatpush.msra.mxu2 %v604_v18 }
 0x16a   : > { %v985_v32 = vsel %vm642_vm5, %v984_v28, %v967_v27  ;;  %v986_v33 = vrot.slane %v967_v27, 4  ;;  %v991_v48 = vsel %vm642_vm5, %v983_v26, %v990_v40  ;;  %1851 = vmatmul.msk.f32.vlgmr.msra.gmra.mxu2 %vm513_vm0, %v2633_v7 }
 0x16b   : > { %1853 = vmatpush.xpose.msk.msra.mxu3 %vm1236_vm6, %v985_v32 }
 0x16c   : > { %v987_v38 = vsel %vm642_vm5, %v979_v21, %v986_v33 }
 0x16d   : > { %1856 = vmatpush.xpose.msk.msrb.mxu0 %vm1236_vm6, %v987_v38 }
 0x16f   : > { %1854 = vmatpush.xpose.msk.msra.mxu3 %vm1236_vm6, %v931_v43 }
 0x171   : > { %1857 = vmatpush.xpose.msk.msrb.mxu0 %vm1236_vm6, %v933_v46 }
 0x172   : > { %1852 = vmatmul.msk.f32.gmra.mxu2 %vm513_vm0, %v2637_v8 }
 0x173   : > { %1859 = vmatpush.xpose.msk.msrb.mxu3 %vm1236_vm6, %v989_v44 }
 0x175   : > { %1862 = vmatpush.xpose.msk.msra.mxu0 %vm1236_vm6, %v991_v48 }
 0x177   : > { %1860 = vmatpush.xpose.msk.msrb.mxu3 %vm1236_vm6, %v935_v50 }
 0x179   : > { %1863 = vmatpush.xpose.msk.msra.mxu0 %vm1236_vm6, %v937_v52 }
 0x1b7   : > { %v633_v53 = vpop.permute.xlu2 %632 }
 0x1b8   : > { %v656_v55 = vrot.slane %v633_v53, 4 }
 0x1bf   : > { %v639_v54 = vpop.permute.xlu2 %638 }
 0x1c0   : > { %v654_v56 = vrot.slane %v639_v54, 4  ;;  %v657_v57 = vsel %vm642_vm5, %v639_v54, %v656_v55 }
 0x1c1   : > { %v665_v59 = vperm.slane %v657_v57, %v2651_v41 }
 0x1c2   : > { %v655_v58 = vsel %vm642_vm5, %v654_v56, %v633_v53 }
 0x1c3   : > { %v661_v61 = vperm.slane %v655_v58, %v2651_v41  ;;  %v678_v1 = vrot.slane %v665_v59, 4 }
 0x1c5   : > { %v666_v6 = vrot.slane %v661_v61, 4 }
 0x1cf   : > { %v636_v62 = vpop.permute.xlu1 %635 }
 0x1d0   : > { %v641_v63 = vrot.slane %v636_v62, 4  ;;  %v645_v0 = vsel %vm642_vm5, %v636_v62, %v644_v60  ;;  %v1233_v60 = vld [vmem:[#allocation7 + $0x8] sm:$0xff] }
 0x1d1   : > { %v653_v2 = vperm.slane %v645_v0, %v2651_v41 }
 0x1d2   : > { %v643_v3 = vsel %vm642_vm5, %v641_v63, %v2693_v47  ;;  %v1232_v63 = vld [vmem:[#allocation7] sm:$0xff] }
 0x1d3   : > { %v649_v9 = vperm.slane %v643_v3, %v2651_v41  ;;  %v679_v10 = vsel %vm642_vm5, %v678_v1, %v653_v2  ;;  %v680_v11 = vrot.slane %v653_v2, 4  ;;  %v1235_v3 = vld [vmem:[#allocation7 + $0x18] sm:$0xff] }
 0x1d4   : > { %v685_v12 = vperm.slane %v679_v10, %v2657_v51 }
 0x1d5   : > { %v667_v14 = vsel %vm642_vm5, %v666_v6, %v649_v9  ;;  %v668_v15 = vrot.slane %v649_v9, 4  ;;  %v681_v16 = vsel %vm642_vm5, %v665_v59, %v680_v11  ;;  %v1234_v9 = vld [vmem:[#allocation7 + $0x10] sm:$0xff] }
 0x1d6   : > { %v673_v47 = vperm.slane %v667_v14, %v2657_v51  ;;  %v689_v17 = vperm.slane %v681_v16, %v2657_v51  ;;  %v694_v21 = vrot.slane %v685_v12, 4 }
 0x1d7   : > { %v669_v19 = vsel %vm642_vm5, %v661_v61, %v668_v15 }
 0x1d8   : > { %v677_v20 = vperm.slane %v669_v19, %v2657_v51  ;;  %v696_v22 = vrot.slane %v689_v17, 4  ;;  %v690_v23 = vrot.slane %v673_v47, 4  ;;  %v695_v29 = vsel %vm642_vm5, 0.0, %v694_v21 }
 0x1da   : > { %v692_v24 = vrot.slane %v677_v20, 4  ;;  %v697_v25 = vsel %vm642_vm5, 0.0, %v696_v22  ;;  %v709_v26 = vsel %vm642_vm5, %v696_v22, %v685_v12  ;;  %v691_v34 = vsel %vm642_vm5, 0.0, %v690_v23 }
 0x1db   : > { %v714_v27 = vrot.slane %v697_v25, 4  ;;  %v713_v31 = vperm.slane %v709_v26, %v2651_v41 }
 0x1dc   : > { %v693_v28 = vsel %vm642_vm5, 0.0, %v692_v24  ;;  %v698_v30 = vsel %vm642_vm5, %v692_v24, %v673_v47 }
 0x1dd   : > { %v703_v32 = vrot.slane %v693_v28, 4  ;;  %v715_v33 = vsel %vm642_vm5, %v714_v27, %v695_v29  ;;  %v702_v36 = vperm.slane %v698_v30, %v2651_v41  ;;  %v734_v39 = vrot.slane %v713_v31, 4 }
 0x1de   : > { %v719_v35 = vperm.slane %v715_v33, %v2651_v41 }
 0x1df   : > { %v704_v7 = vsel %vm642_vm5, %v703_v32, %v691_v34  ;;  %v722_v43 = vrot.slane %v702_v36, 4 }
 0x1e0   : > { %v708_v37 = vperm.slane %v704_v7, %v2651_v41  ;;  %v732_v38 = vrot.slane %v719_v35, 4  ;;  %v735_v46 = vsel %vm642_vm5, %v719_v35, %v734_v39 }
 0x1e1   : > { %v743_v54 = vperm.slane %v735_v46, %v2657_v51 }
 0x1e2   : > { %v720_v40 = vrot.slane %v708_v37, 4  ;;  %v733_v42 = vsel %vm642_vm5, %v732_v38, %v713_v31  ;;  %v723_v50 = vsel %vm642_vm5, %v708_v37, %v722_v43 }
 0x1e3   : > { %v739_v44 = vperm.slane %v733_v42, %v2657_v51  ;;  %v731_v55 = vperm.slane %v723_v50, %v2657_v51  ;;  %v748_v56 = vrot.slane %v743_v54, 4 }
 0x1e4   : > { %v721_v45 = vsel %vm642_vm5, %v720_v40, %v702_v36 }
 0x1e5   : > { %v727_v48 = vperm.slane %v721_v45, %v2657_v51  ;;  %v744_v49 = vrot.slane %v739_v44, 4  ;;  %v750_v57 = vrot.slane %v731_v55, 4  ;;  %v749_v58 = vsel %vm642_vm5, %v748_v56, %v731_v55 }
 0x1e7   : > { %v745_v52 = vsel %vm642_vm5, %v744_v49, %v727_v48  ;;  %v746_v53 = vrot.slane %v727_v48, 4  ;;  %v751_v59 = vsel %vm642_vm5, %v743_v54, %v750_v57 }
 0x1e8   : > { %1855 = vmatmul.msk.f32.vlgmr.msra.gmra.mxu3 %vm1236_vm6, %v745_v52 }
 0x1e9   : > { %v747_v8 = vsel %vm642_vm5, %v739_v44, %v746_v53 }
 0x1ea   : > { %1858 = vmatmul.msk.f32.vlgmr.msrb.gmra.mxu0 %vm1236_vm6, %v747_v8 }
 0x1ed   : > { %v625_v13 = vpop.f32.mrf.mxu2 }
 0x1ee   : > { %v1014_v37 = vrot.slane %v625_v13, 4 }
 0x1f0   : > { %1861 = vmatmul.msk.f32.vlgmr.msrb.gmra.mxu3 %vm1236_vm6, %v749_v58 }
 0x1f2   : > { %1864 = vmatmul.msk.f32.vlgmr.msra.gmra.mxu0 %vm1236_vm6, %v751_v59 }
 0x1f5   : > { %v628_v15 = vpop.f32.mrf.mxu2 }
 0x1f6   : > { %v2015_v16 = vpack.i.bf16 %v625_v13, %v628_v15  ;;  %v1070_v40 = vrot.slane %v628_v15, 4 }
 0x267   : > { %v1292_v61 = vpop.f32.mrf.mxu0 }
 0x268   : > { %v1293_v62 = vadd.f32 %v1292_v61, %v1233_v60 }
 0x26a   : > { %1355 = vst.msk [vmem:[%s2802_s25 + $0x8] sm:$0xff] %vm1353_vm7, %v1293_v62  ;;  %v1361_v0 = vsel %vm1353_vm7, %v1293_v62, -inf }
 0x26b   : > { %1362 = vmax.xlane.f32.xlu2 %v1361_v0  ;;  %v1263_v1 = vpop.f32.mrf.mxu3 }
 0x26c   : > { %v1264_v2 = vadd.f32 %v1263_v1, %v1232_v63 }
 0x26e   : > { %1354 = vst.msk [vmem:[%s2802_s25] sm:$0xff] %vm1353_vm7, %v1264_v2  ;;  %v1358_v4 = vsel %vm1353_vm7, %v1264_v2, -inf }
 0x26f   : > { %v1350_v5 = vpop.f32.mrf.mxu0  ;;  %1359 = vmax.xlane.f32.xlu1 %v1358_v4 }
 0x270   : > { %v1351_v6 = vadd.f32 %v1350_v5, %v1235_v3 }
 0x272   : > { %1357 = vst.msk [vmem:[%s2802_s25 + $0x18] sm:$0xff] %vm1353_vm7, %v1351_v6  ;;  %v1367_v10 = vsel %vm1353_vm7, %v1351_v6, -inf }
 0x273   : > { %1368 = vmax.xlane.f32.xlu0 %v1367_v10  ;;  %v1321_v11 = vpop.f32.mrf.mxu3 }
 0x274   : > { %v1322_v12 = vadd.f32 %v1321_v11, %v1234_v9 }
 0x276   : > { %1356 = vst.msk [vmem:[%s2802_s25 + $0x10] sm:$0xff] %vm1353_vm7, %v1322_v12  ;;  %v1364_v14 = vsel %vm1353_vm7, %v1322_v12, -inf }
 0x27b   : > { %1365 = vmax.xlane.f32.xlu0 %v1364_v14 }
 0x283   : > { %2016 = vrot.lane.b32.xlu2 %v2015_v16, %s2403_s2 }
 0x288   : > { %2021 = vrot.lane.b32.xlu1 %v2015_v16, %s2404_s16 }
 0x28f   : > { %2026 = vrot.lane.b32.xlu0 %v2015_v16, %s2402_s15  ;;  %s2282_s15 = scalar_lea.hbm %s2994_s9, 64 }
 0x290   : > { %p2284_p11 = scmp.lt.s32.totalorder %s2282_s15, %s2278_s11 }
 0x292   : > { %p2285_p12 = por %p2284_p11, %p2283_p10 }
 0x294   : > { %p2286_p13 = pnand %p2285_p12, %p2281_p9 }
 0x2de   : > { %v1363_v47 = vpop.xlane.xlu2 %1362 }
 0x2df   : > { %v1371_v17 = vsub.f32 %v1293_v62, %v1363_v47 }
 0x2e1   : > { %v1376_v18 = vmul.f32 1.442695, %v1371_v17 }
 0x2e2   : > { %v1360_v19 = vpop.xlane.xlu1 %1359 }
 0x2e3   : > { %2035 = vpow2.f32 %v1376_v18  ;;  %v1370_v20 = vsub.f32 %v1264_v2, %v1360_v19 }
 0x2e5   : > { %v1374_v21 = vmul.f32 1.442695, %v1370_v20 }
 0x2e6   : > { %v1369_v22 = vpop.xlane.xlu0 %1368  ;;  %v2017_v33 = vpop.permute.xlu2 %2016 }
 0x2e7   : > { %2037 = vpow2.f32 %v1374_v21  ;;  %v1373_v29 = vsub.f32 %v1351_v6, %v1369_v22  ;;  %v2019_v38 = vunpack.i.h.bf16 %v2017_v33  ;;  %v2018_v39 = vunpack.i.l.bf16 %v2017_v33 }
 0x2e9   : > { %v2819_v23 = vpop.eup %2035  ;;  %v1380_v31 = vmul.f32 1.442695, %v1373_v29  ;;  %v1026_v50 = vrot.slane %v2019_v38, 4  ;;  %v1082_v52 = vrot.slane %v2018_v39, 4 }
 0x2ea   : > { %v1385_v24 = vsel %vm1353_vm7, %v2819_v23, 0.0 }
 0x2eb   : > { %1386 = vadd.xlane.f32.xlu1 %v1385_v24 }
 0x2ed   : > { %v2823_v25 = vpop.eup %2037 }
 0x2ee   : > { %v1366_v26 = vpop.xlane.xlu0 %1365  ;;  %v1382_v27 = vsel %vm1353_vm7, %v2823_v25, 0.0 }
 0x2ef   : > { %v1372_v28 = vsub.f32 %v1322_v12, %v1366_v26  ;;  %1383 = vadd.xlane.f32.xlu0 %v1382_v27 }
 0x2f1   : > { %v1378_v30 = vmul.f32 1.442695, %v1372_v28 }
 0x2f3   : > { %2039 = vpow2.f32 %v1378_v30 }
 0x2f4   : > { %2041 = vpow2.f32 %v1380_v31 }
 0x2f9   : > { %v2827_v32 = vpop.eup %2039 }
 0x2fa   : > { %v2022_v34 = vpop.permute.xlu1 %2021  ;;  %v1388_v35 = vsel %vm1353_vm7, %v2827_v32, 0.0  ;;  %v2831_v44 = vpop.eup %2041 }
 0x2fb   : > { %v2024_v36 = vunpack.i.h.bf16 %v2022_v34  ;;  %v2023_v7 = vunpack.i.l.bf16 %v2022_v34  ;;  %1389 = vadd.xlane.f32.xlu2 %v1388_v35  ;;  %v1391_v8 = vsel %vm1353_vm7, %v2831_v44, 0.0 }
 0x2fd   : > { %v1012_v42 = vrot.slane %v2024_v36, 4  ;;  %v1068_v43 = vrot.slane %v2023_v7, 4  ;;  %v1015_v45 = vsel %vm642_vm5, %v2024_v36, %v1014_v37  ;;  %v1071_v48 = vsel %vm642_vm5, %v2023_v7, %v1070_v40 }
 0x2fe   : > { %v1023_v53 = vperm.slane %v1015_v45, %v2651_v41  ;;  %v1079_v56 = vperm.slane %v1071_v48, %v2651_v41 }
 0x2ff   : > { %v1013_v46 = vsel %vm642_vm5, %v1012_v42, %v625_v13  ;;  %v1069_v49 = vsel %vm642_vm5, %v1068_v43, %v628_v15 }
 0x300   : > { %v1019_v55 = vperm.slane %v1013_v46, %v2651_v41  ;;  %v1075_v59 = vperm.slane %v1069_v49, %v2651_v41  ;;  %v1050_v0 = vrot.slane %v1023_v53, 4  ;;  %v1106_v4 = vrot.slane %v1079_v56, 4 }
 0x301   : > { %v2027_v54 = vpop.permute.xlu0 %2026 }
 0x302   : > { %v2029_v57 = vunpack.i.h.bf16 %v2027_v54  ;;  %v2028_v58 = vunpack.i.l.bf16 %v2027_v54  ;;  %v1038_v3 = vrot.slane %v1019_v55, 4  ;;  %v1094_v13 = vrot.slane %v1075_v59, 4 }
 0x303   : > { %1392 = vadd.xlane.f32.xlu2 %v1391_v8 }
 0x304   : > { %v1024_v60 = vrot.slane %v2029_v57, 4  ;;  %v1027_v61 = vsel %vm642_vm5, %v2029_v57, %v1026_v50  ;;  %v1080_v62 = vrot.slane %v2028_v58, 4  ;;  %v1083_v63 = vsel %vm642_vm5, %v2028_v58, %v1082_v52 }
 0x305   : > { %v1035_v1 = vperm.slane %v1027_v61, %v2651_v41  ;;  %v1091_v2 = vperm.slane %v1083_v63, %v2651_v41 }
 0x306   : > { %v1025_v5 = vsel %vm642_vm5, %v1024_v60, %v2019_v38  ;;  %v1081_v6 = vsel %vm642_vm5, %v1080_v62, %v2018_v39 }
 0x307   : > { %v1031_v9 = vperm.slane %v1025_v5, %v2651_v41  ;;  %v1048_v10 = vrot.slane %v1035_v1, 4  ;;  %v1051_v11 = vsel %vm642_vm5, %v1035_v1, %v1050_v0  ;;  %v1087_v12 = vperm.slane %v1081_v6, %v2651_v41 }
 0x308   : > { %v1059_v14 = vperm.slane %v1051_v11, %v2657_v51  ;;  %v1104_v15 = vrot.slane %v1091_v2, 4  ;;  %v1107_v16 = vsel %vm642_vm5, %v1091_v2, %v1106_v4 }
 0x309   : > { %v1036_v47 = vrot.slane %v1031_v9, 4  ;;  %v1039_v17 = vsel %vm642_vm5, %v1031_v9, %v1038_v3  ;;  %v1049_v18 = vsel %vm642_vm5, %v1048_v10, %v1023_v53  ;;  %v1092_v19 = vrot.slane %v1087_v12, 4 }
 0x30a   : > { %v1047_v20 = vperm.slane %v1039_v17, %v2657_v51  ;;  %v1055_v21 = vperm.slane %v1049_v18, %v2657_v51  ;;  %v1066_v22 = vrot.slane %v1059_v14, 4  ;;  %v1095_v24 = vsel %vm642_vm5, %v1087_v12, %v1094_v13 }
 0x30b   : > { %v1037_v26 = vsel %vm642_vm5, %v1036_v47, %v1019_v55  ;;  %v1093_v27 = vsel %vm642_vm5, %v1092_v19, %v1075_v59  ;;  %v1103_v28 = vperm.slane %v1095_v24, %v2657_v51  ;;  %v1105_v29 = vsel %vm642_vm5, %v1104_v15, %v1079_v56 }
 0x30c   : > { %v1043_v30 = vperm.slane %v1037_v26, %v2657_v51  ;;  %v1062_v31 = vrot.slane %v1047_v20, 4  ;;  %v1064_v33 = vrot.slane %v1055_v21, 4  ;;  %v1067_v34 = vsel %vm642_vm5, 0.0, %v1066_v22 }
 0x30d   : > { %v1099_v35 = vperm.slane %v1093_v27, %v2657_v51  ;;  %v1111_v36 = vperm.slane %v1105_v29, %v2657_v51  ;;  %v1115_v7 = vperm.slane %v1107_v16, %v2657_v51  ;;  %v1118_v37 = vrot.slane %v1103_v28, 4 }
 0x30e   : > { %v1063_v38 = vsel %vm642_vm5, 0.0, %v1062_v31  ;;  %v1140_v39 = vrot.slane %v1067_v34, 4  ;;  %v1060_v40 = vrot.slane %v1043_v30, 4  ;;  %v1065_v42 = vsel %vm642_vm5, 0.0, %v1064_v33 }
 0x30f   : > { %v1119_v43 = vsel %vm642_vm5, 0.0, %v1118_v37  ;;  %v1120_v45 = vrot.slane %v1111_v36, 4  ;;  %v1122_v46 = vrot.slane %v1115_v7, 4  ;;  %v1116_v48 = vrot.slane %v1099_v35, 4 }
 0x310   : > { %v1183_v49 = vrot.slane %v1119_v43, 4  ;;  %v1178_v50 = vsel %vm642_vm5, %v1118_v37, %v1099_v35  ;;  %v1061_v52 = vsel %vm642_vm5, 0.0, %v1060_v40  ;;  %v1124_v53 = vsel %vm642_vm5, %v1062_v31, %v1043_v30 }
 0x311   : > { %v1123_v54 = vsel %vm642_vm5, 0.0, %v1122_v46  ;;  %v1189_v8 = vsel %vm642_vm5, %v1122_v46, %v1111_v36  ;;  %v1117_v55 = vsel %vm642_vm5, 0.0, %v1116_v48  ;;  %v1121_v56 = vsel %vm642_vm5, 0.0, %v1120_v45 }
 0x312   : > { %v1194_v57 = vrot.slane %v1123_v54, 4  ;;  %v1182_v58 = vperm.slane %v1178_v50, %v2651_v41  ;;  %v1184_v59 = vsel %vm642_vm5, %v1183_v49, %v1117_v55  ;;  %v1193_v60 = vperm.slane %v1189_v8, %v2651_v41 }
 0x313   : > { %v1188_v61 = vperm.slane %v1184_v59, %v2651_v41  ;;  %v1128_v62 = vperm.slane %v1124_v53, %v2651_v41  ;;  %v1129_v63 = vrot.slane %v1063_v38, 4  ;;  %v1135_v0 = vsel %vm642_vm5, %v1066_v22, %v1055_v21 }
 0x314   : > { %v1195_v1 = vsel %vm642_vm5, %v1194_v57, %v1121_v56  ;;  %v1202_v2 = vrot.slane %v1182_v58, 4  ;;  %v1214_v3 = vrot.slane %v1193_v60, 4  ;;  %v1139_v4 = vperm.slane %v1135_v0, %v2651_v41  ;;  %v1544_v0 = vld [vmem:[#allocation13 + $0x10] sm:$0xff] }
 0x315   : > { %v1199_v5 = vperm.slane %v1195_v1, %v2651_v41  ;;  %v1200_v6 = vrot.slane %v1188_v61, 4  ;;  %v1130_v9 = vsel %vm642_vm5, %v1129_v63, %v1061_v52  ;;  %v1141_v10 = vsel %vm642_vm5, %v1140_v39, %v1065_v42  ;;  %v1570_v1 = vld [vmem:[#allocation13 + $0x18] sm:$0xff] }
 0x316   : > { %v1203_v11 = vsel %vm642_vm5, %v1188_v61, %v1202_v2  ;;  %v1134_v12 = vperm.slane %v1130_v9, %v2651_v41  ;;  %v1145_v13 = vperm.slane %v1141_v10, %v2651_v41  ;;  %v1148_v14 = vrot.slane %v1128_v62, 4 }
 0x317   : > { %v1211_v15 = vperm.slane %v1203_v11, %v2657_v51  ;;  %v1215_v16 = vsel %vm642_vm5, %v1199_v5, %v1214_v3  ;;  %v1201_v47 = vsel %vm642_vm5, %v1200_v6, %v1182_v58  ;;  %v1212_v17 = vrot.slane %v1199_v5, 4 }
 0x318   : > { %v1223_v18 = vperm.slane %v1215_v16, %v2657_v51  ;;  %v1207_v19 = vperm.slane %v1201_v47, %v2657_v51  ;;  %v1149_v20 = vsel %vm642_vm5, %v1134_v12, %v1148_v14  ;;  %v1160_v21 = vrot.slane %v1139_v4, 4 }
 0x319   : > { %v1213_v22 = vsel %vm642_vm5, %v1212_v17, %v1193_v60  ;;  %v1157_v24 = vperm.slane %v1149_v20, %v2657_v51  ;;  %v1230_v41 = vrot.slane %v1211_v15, 4  ;;  %v1146_v26 = vrot.slane %v1134_v12, 4 }
 0x31a   : > { %v1228_v27 = vrot.slane %v1223_v18, 4  ;;  %v1219_v28 = vperm.slane %v1213_v22, %v2657_v51  ;;  %v1161_v29 = vsel %vm642_vm5, %v1145_v13, %v1160_v21  ;;  %v1158_v30 = vrot.slane %v1145_v13, 4 }
 0x31b   : > { %v1169_v31 = vperm.slane %v1161_v29, %v2657_v51  ;;  %v1231_v33 = vsel %vm642_vm5, %v1223_v18, %v1230_v41  ;;  %v1147_v34 = vsel %vm642_vm5, %v1146_v26, %v1128_v62  ;;  %v1226_v35 = vrot.slane %v1207_v19, 4 }
 0x31c   : > { %v1229_v36 = vsel %vm642_vm5, %v1228_v27, %v1211_v15  ;;  %v1224_v7 = vrot.slane %v1219_v28, 4  ;;  %1488 = vmatpush.msrb.mxu0 %v1231_v33  ;;  %v1153_v37 = vperm.slane %v1147_v34, %v2657_v51  ;;  %v1159_v38 = vsel %vm642_vm5, %v1158_v30, %v1139_v4 }
 0x31d   : > { %1465 = vmatpush.msra.mxu3 %v1229_v36  ;;  %v1174_v39 = vrot.slane %v1169_v31, 4  ;;  %v1165_v40 = vperm.slane %v1159_v38, %v2657_v51  ;;  %v1227_v42 = vsel %vm642_vm5, %v1219_v28, %v1226_v35  ;;  %v1176_v43 = vrot.slane %v1157_v24, 4 }
 0x31e   : > { %v1225_v45 = vsel %vm642_vm5, %v1224_v7, %v1207_v19  ;;  %1442 = vmatpush.msrb.mxu2 %v1227_v42  ;;  %v1172_v46 = vrot.slane %v1153_v37, 4 }
 0x31f   : > { %1419 = vmatpush.msrb.mxu1 %v1225_v45  ;;  %v1175_v48 = vsel %vm642_vm5, %v1174_v39, %v1157_v24  ;;  %v1170_v49 = vrot.slane %v1165_v40, 4  ;;  %v1177_v50 = vsel %vm642_vm5, %v1169_v31, %v1176_v43 }
 0x320   : > { %1466 = vmatpush.msra.mxu3 %v1175_v48  ;;  %1489 = vmatpush.msrb.mxu0 %v1177_v50  ;;  %v1173_v52 = vsel %vm642_vm5, %v1165_v40, %v1172_v46 }
 0x321   : > { %v1171_v53 = vsel %vm642_vm5, %v1170_v49, %v1153_v37  ;;  %1443 = vmatpush.msrb.mxu2 %v1173_v52 }
 0x322   : > { %1420 = vmatpush.msrb.mxu1 %v1171_v53  ;;  %1563 = vmatpush.msrb.mxu3 %v1544_v0 }
 0x323   : > { %1589 = vmatpush.msra.mxu0 %v1570_v1 }
 0x35e   : > { %v1387_v51 = vpop.xlane.xlu1 %1386 }
 0x35f   : > { %2043 = vrcp.f32 %v1387_v51 }
 0x362   : > { %v1384_v54 = vpop.xlane.xlu0 %1383 }
 0x363   : > { %2045 = vrcp.f32 %v1384_v54 }
 0x365   : > { %v2044_v8 = vpop.eup %2043 }
 0x366   : > { %v1399_v55 = vmul.f32 %v2044_v8, %v2819_v23  ;;  %v1494_v23 = vld [vmem:[#allocation13] sm:$0xff] }
 0x367   : > { %1538 = vmatpush.msra.mxu2 %v1494_v23 }
 0x368   : > { %1866 = vmatmul.msk.f32.vlgmr.msrb.gmra.mxu2 %vm1353_vm7, %v1399_v55 }
 0x369   : > { %v2046_v56 = vpop.eup %2045 }
 0x36a   : > { %v1398_v57 = vmul.f32 %v2046_v56, %v2823_v25  ;;  %v1496_v25 = vld [vmem:[#allocation13 + $0x8] sm:$0xff] }
 0x36b   : > { %1515 = vmatpush.msra.mxu1 %v1496_v25 }
 0x36c   : > { %1865 = vmatmul.msk.f32.vlgmr.msrb.gmra.mxu1 %vm1353_vm7, %v1398_v57 }
 0x36e   : > { %v1390_v58 = vpop.xlane.xlu2 %1389 }
 0x36f   : > { %2047 = vrcp.f32 %v1390_v58 }
 0x375   : > { %v2048_v59 = vpop.eup %2047 }
 0x376   : > { %v1400_v60 = vmul.f32 %v2048_v59, %v2827_v32  ;;  %v1393_v61 = vpop.xlane.xlu2 %1392 }
 0x377   : > { %2049 = vrcp.f32 %v1393_v61 }
 0x378   : > { %1867 = vmatmul.msk.f32.vlgmr.msra.gmra.mxu3 %vm1353_vm7, %v1400_v60 }
 0x37d   : > { %v2050_v62 = vpop.eup %2049 }
 0x37e   : > { %v1401_v63 = vmul.f32 %v2050_v62, %v2831_v44 }
 0x380   : > { %1868 = vmatmul.msk.f32.vlgmr.msrb.gmra.mxu0 %vm1353_vm7, %v1401_v63 }
 0x3e9   : > { %v1422_v32 = vpop.f32.mrf.mxu1 }
 0x3ea   : > { %1870 = vmatmul.msk.f32.vlgmr.msra.gmra.mxu2 %vm1236_vm6, %v1422_v32 }
 0x3eb   : > { %v1445_v2 = vpop.f32.mrf.mxu2 }
 0x3ec   : > { %1869 = vmatmul.msk.f32.vlgmr.msra.gmra.mxu1 %vm1236_vm6, %v1445_v2 }
 0x3fb   : > { %v1468_v44 = vpop.f32.mrf.mxu3 }
 0x3fc   : > { %1871 = vmatmul.msk.f32.vlgmr.msrb.gmra.mxu3 %vm1236_vm6, %v1468_v44 }
 0x3fd   : > { %v1491_v3 = vpop.f32.mrf.mxu0 }
 0x3fe   : > { %1872 = vmatmul.msk.f32.vlgmr.msra.gmra.mxu0 %vm1236_vm6, %v1491_v3 }
 0x3ff   : > { %2289 = shalt.err (!%p2286_p13)
}
 0x400   : > { %s2407_s29 = smov 128   ;;  %s2408_s16 = smov 8   ;;  %v2051_v13 = vld [vmem:[%s2607_s6] sm:$0xff] }
 0x401   : > { %1907 = dma.vmem_to_hbm [thread:$0]  (%p2571_p4), %s1632_s21, 512, %s1634_s24, %s1603_s7, %s2407_s29, %s2407_s29, %s2408_s16  }
 0x402   : > { %s1875_s17 = sshll.u32 %s2384_s12, 3  ;;  %s503_s20 = scalar_lea.vmem [#allocation14], %s1839_s5 }
 0x403   : > { %s1614_s27 = scalar_lea.hbm %s2993_s8, %s1875_s17  ;;  %s1616_s23 = sshll.u32 %s503_s20, 4  ;;  %s1617_s23 = int_to_ptr.vmem [resolvable:$true] %s1616_s23 }
 0x404   : > { %s1618_s30 = sshll.u32 %s1614_s27, 4  ;;  %s1598_s12 = scalar_lea.sflag [#allocation4], %s2601_s4  ;;  %s1619_s30 = int_to_ptr.hbm [resolvable:$true] %s1618_s30 }
 0x405   : > { %s2304_s21 = sshra.s32 %s1619_s30, 4  ;;  %s2310_s5 = scalar_lea.hbm %s2993_s8, 16  ;;  %s2305_s21 = int_to_ptr.hbm [resolvable:$true] %s2304_s21 }
 0x406   : > { %s2306_s24 = scalar_lea.hbm %s2305_s21, 8  ;;  %p2311_p8 = scmp.lt.s32.totalorder %s2305_s21, %s2993_s8 }
 0x407   : > { %p2307_p0 = scmp.ne.s32.totalorder %s2305_s21, %s2306_s24  ;;  %p2312_p1 = scmp.lt.s32.totalorder %s2310_s5, %s2306_s24 }
 0x409   : > { %p2308_p2 = pnand %p2307_p0, %p2571_p4  ;;  %p2313_p3 = por %p2312_p1, %p2311_p8 }
 0x40b   : > { %p2309_p5 = pneg %p2308_p2 }
 0x40d   : > { %p2314_p9 = pnand %p2313_p3, %p2309_p5 }
 0x469   : > { %v1517_v5 = vpop.f32.mrf.mxu1 }
 0x46d   : > { %v1540_v4 = vpop.f32.mrf.mxu2 }
 0x46e   : > { %v1541_v6 = vadd.f32 %v1540_v4, %v1517_v5 }
 0x47b   : > { %v1591_v11 = vpop.f32.mrf.mxu0 }
 0x47f   : > { %v1565_v9 = vpop.f32.mrf.mxu3 }
 0x480   : > { %v1568_v10 = vadd.f32 %v1565_v9, %v1541_v6 }
 0x482   : > { %v1594_v12 = vadd.f32 %v1591_v11, %v1568_v10 }
 0x484   : > { %v1595_v14 = vadd.f32 %v2051_v13, %v1594_v12 }
 0x486   : > { %1596 = vst.msk [vmem:[%s503_s20] sm:$0xff] %vm513_vm0, %v1595_v14 }
 0x487   : > { %2317 = shalt.err (!%p2314_p9)
}
 0x488   : > { %1906 = dma.vmem_to_hbm [thread:$0]  (%p2571_p4), %s1617_s23, 128, %s1619_s30, %s1598_s12  }
 0x489 PF: > { %s3024_s4 = sld [smem:[#allocation24_spill]]  ;;  %p1934_p10 = pnand %p1832_p6, %p2579_p7 }
 0x48b   : > { %p1935_p11 = pneg %p1934_p10 }
 0x48f   : > { %s1648_s15 = sand.u32 1, %s3024_s4  }
 0x490   : > { %s1649_s2 = scalar_lea.sflag [#allocation4], %s1648_s15 }
 0x491   : > { %2363 = dma.done.wait (%p1935_p11), %s1649_s2, 128  }
 0x492   : > { %2365 = vsyncadd (%p1935_p11), %s1649_s2, 4294967168  ;;  %s1659_s22 = scalar_lea.sflag [#allocation16], %s1648_s15 }
 0x493   : > { %2367 = dma.done.wait (%p1935_p11), %s1659_s22, 512  }
 0x494   : > { %2369 = vsyncadd (%p1935_p11), %s1659_s22, 4294966784  ;;  %s34_s14 = sadd.s32 1, %s2392_s14   ;;  %s3026_s28 = sld [smem:[#allocation25_spill]] }
 0x495   : > { %p31_p12 = scmp.ge.s32.totalorder %s34_s14, 4   ;;  %s3027_s11 = sld [smem:[#allocation27_spill]] }
 0x496   : > { %s3028_s29 = sld [smem:[#allocation26_spill]]  ;;  %s3029_s30 = smov %s2376_s10 }
 0x497   : > { %s3031_s12 = smov %s2388_s13 }
 0x498   :  { %33 = sbr.rel (!%p31_p12) target bundleno = 18 (0x12), region = 151 }
 0x49a   : > { %s3030_s10 = smov %s3026_s28 }
 0x49c   : > { %s3032_s13 = smov %s3028_s29 }
 0x49d   :  { %1665 = vsyncpa [#allocation3], 1 }
 0x49e   :  { %1667 = vsyncpa [#allocation3 + $0x1], 1 }
 0x49f   :  { %1668 = vsyncpa [#allocation6], 1 }
 0x4a0   :  { %1670 = vsyncpa [#allocation6 + $0x1], 1 }
 0x4a1   :  { %1671 = vsyncpa [#allocation9], 1 }
 0x4a2   :  { %1672 = vsyncpa [#allocation12], 1 }
 0x4a3   :  { %1673 = vsyncpa [#allocation4], 1 }
 0x4a4   :  { %1675 = vsyncpa [#allocation4 + $0x1], 1 }
 0x4a5   :  { %1676 = vsyncpa [#allocation16], 1 }
 0x4a6   :  { %1678 = vsyncpa [#allocation16 + $0x1], 1 }

// kernel: tpu_custom_call.1
= control target key start
LH: loop header
LB: loop body
LE: loop exit
PB: predicated region body
PF: predicated region fallthrough
CT: control target
= control target key end

     0   :  { %s2201_s0 = inlined_call_operand.hbm [shape: f32[2,8,32], index: 0, kind: input, shape index: {}]   ;;  %s2202_s1 = inlined_call_operand.hbm [shape: f32[2,16,32], index: 1, kind: input, shape index: {}]   ;;  %s2203_s2 = inlined_call_operand.hbm [shape: f32[1,4,8,16], index: 2, kind: input, shape index: {}]   ;;  %s2204_s3 = inlined_call_operand.vmem [shape: f32[1,32], index: 3, kind: input, shape index: {}]   ;;  %s2205_s4 = inlined_call_operand.hbm [shape: f32[32,32], index: 4, kind: input, shape index: {}]   ;;  %s2206_s5 = inlined_call_operand.hbm [shape: f32[32,32], index: 5, kind: input, shape index: {}]   ;;  %s2207_s6 = inlined_call_operand.hbm [shape: f32[32,32], index: 6, kind: input, shape index: {}]   ;;  %s2208_s7 = inlined_call_operand.hbm [shape: f32[4,8,32], index: 7, kind: input, shape index: {}]   ;;  %s2209_s8 = inlined_call_operand.hbm [shape: f32[2,8,32], index: 8, kind: output, shape index: {0}]   ;;  %s2210_s9 = inlined_call_operand.hbm [shape: f32[2,4,8,16], index: 9, kind: output, shape index: {1}]  }
   0x1   :  { %2217 = sst [smem:[#allocation29_spill]] %s2203_s2 }
   0x2   :  { %2218 = sst [smem:[#allocation30_spill]] %s2205_s4 }
   0x3   :  { %2219 = sst [smem:[#allocation31_spill]] %s2206_s5 }
   0x4   :  { %2220 = sst [smem:[#allocation32_spill]] %s2207_s6 }
   0x5   :  { %2221 = sst [smem:[#allocation33_spill]] %s2208_s7 }
   0x6   :  { %15 = vsyncpa [#allocation3], 0 }
   0x7   :  { %17 = vsyncpa [#allocation3 + $0x1], 0 }
   0x8   :  { %18 = vsyncpa [#allocation6], 0 }
   0x9   :  { %20 = vsyncpa [#allocation6 + $0x1], 0 }
   0xa   :  { %21 = vsyncpa [#allocation9], 0 }
   0xb   :  { %22 = vsyncpa [#allocation12], 0 }
   0xc   :  { %23 = vsyncpa [#allocation4], 0 }
   0xd   :  { %25 = vsyncpa [#allocation4 + $0x1], 0 }
   0xe   :  { %26 = vsyncpa [#allocation16], 0 }
   0xf   :  { %28 = vsyncpa [#allocation16 + $0x1], 0  ;;  %s1891_s30 = smov 0   ;;  %s1893_s10 = smov 0  }
  0x10   :  { %s1895_s11 = smov 0   ;;  %s1897_s12 = smov 0  }
  0x11   :  { %s1899_s13 = smov 0   ;;  %s1901_s14 = smov 0  }
  0x12 LB: > { %2222 = sst [smem:[#allocation24_spill]] %s1806_s30  ;;  %s1922_s15 = sadd.s32 4294967295, %s1826_s14   ;;  %s1826_s14 = sphi %s1901_s14, %s34_s14   ;;  %s1822_s13 = sphi %s1899_s13, %s2248_s13   ;;  %s1818_s12 = sphi %s1897_s12, %s2247_s12   ;;  %s1814_s11 = sphi %s1895_s11, %s2243_s11   ;;  %s1810_s10 = sphi %s1893_s10, %s2246_s10   ;;  %s1806_s30 = sphi %s1891_s30, %s2245_s30  }
  0x13   : > { %2223 = sst [smem:[#allocation25_spill]] %s1814_s11  ;;  %p1260_p0 = scmp.ge.s32.totalorder %s1826_s14, 1 }
  0x14   : > { %p69_p1 = scmp.eq.s32.totalorder %s1922_s15, 0  ;;  %p292_p2 = scmp.lt.s32.totalorder %s1826_s14, 3 }
  0x15   : > { %s2224_s2 = sld [smem:[#allocation29_spill]]  ;;  %s1828_s20 = smov [#allocation7]  }
  0x16   : > { %p1930_p3 = pnand %p1260_p0, %p292_p2  ;;  %s307_s21 = sshll.u32 %s1828_s20, 4  ;;  %s308_s21 = int_to_ptr.vmem [resolvable:$true] %s307_s21 }
  0x17   : > { %p1266_p6 = scmp.ge.s32.totalorder %s1826_s14, 2  ;;  %s2227_s4 = sld [smem:[#allocation30_spill]] }
  0x18   : > { %p1347_p4 = pneg %p1930_p3  ;;  %s2211_s26 = smov 128  }
  0x19   : > { %s2212_s27 = smov 8   ;;  %s1831_s28 = smov [#allocation8]  }
  0x1a   : > { %p1938_p5 = pnand %p1347_p4, %p69_p1  ;;  %s324_s29 = sshll.u32 %s1831_s28, 4  ;;  %s325_s29 = int_to_ptr.vmem [resolvable:$true] %s324_s29 }
  0x1b   : > { %s305_s18 = sshll.u32 %s2224_s2, 4  ;;  %s2228_s6 = sld [smem:[#allocation32_spill]]  ;;  %s306_s18 = int_to_ptr.hbm [resolvable:$true] %s305_s18 }
  0x1c   : > { %1350 = dma.hbm_to_vmem [thread:$0]  (!%p1938_p5), %s306_s18, 512, %s308_s21, [#allocation6], %s2211_s26, %s2211_s26, %s2212_s27  }
  0x1d   : > { %s322_s25 = sshll.u32 %s2227_s4, 4  ;;  %s2229_s5 = sld [smem:[#allocation31_spill]]  ;;  %s323_s25 = int_to_ptr.hbm [resolvable:$true] %s322_s25 }
  0x1e   : > { %1353 = dma.hbm_to_vmem [thread:$0]  (!%p1938_p5), %s323_s25, 512, %s325_s29, [#allocation9], %s2211_s26, %s2211_s26, %s2212_s27  }
  0x1f   : > { %s1832_s18 = smov [#allocation11]   ;;  %s1833_s25 = smov [#allocation10]  }
  0x20   : > { %s352_s21 = sshll.u32 %s1832_s18, 4  ;;  %s338_s28 = sshll.u32 %s1833_s25, 4  ;;  %s353_s21 = int_to_ptr.vmem [resolvable:$true] %s352_s21  ;;  %s339_s28 = int_to_ptr.vmem [resolvable:$true] %s338_s28 }
  0x21   : > { %s350_s20 = sshll.u32 %s2228_s6, 4  ;;  %s2230_s7 = sld [smem:[#allocation33_spill]]  ;;  %s351_s20 = int_to_ptr.hbm [resolvable:$true] %s350_s20 }
  0x22   : > { %1359 = dma.hbm_to_vmem [thread:$0]  (!%p1938_p5), %s351_s20, 512, %s353_s21, [#allocation12], %s2211_s26, %s2211_s26, %s2212_s27  }
  0x23   : > { %s336_s2 = sshll.u32 %s2229_s5, 4  ;;  %s1834_s20 = smov [#allocation13]   ;;  %s337_s2 = int_to_ptr.hbm [resolvable:$true] %s336_s2 }
  0x24   : > { %1356 = dma.hbm_to_vmem [thread:$0]  (!%p1938_p5), %s337_s2, 512, %s339_s28, [#allocation9], %s2211_s26, %s2211_s26, %s2212_s27  }
  0x25   : > { %s366_s23 = sshll.u32 %s1834_s20, 4  ;;  %s1259_s24 = sadd.s32 4294967294, %s1826_s14   ;;  %s367_s23 = int_to_ptr.vmem [resolvable:$true] %s366_s23 }
  0x26   : > { %s46_s18 = sadd.s32 1, %s1822_s13  ;;  %s55_s21 = sadd.s32 1, %s1814_s11 }
  0x27   : > { %s364_s17 = sshll.u32 %s2230_s7, 4  ;;  %p48_p7 = scmp.ge.s32.totalorder %s46_s18, 2  ;;  %s365_s17 = int_to_ptr.hbm [resolvable:$true] %s364_s17 }
  0x28   : > { %1362 = dma.hbm_to_vmem [thread:$0]  (!%p1938_p5), %s365_s17, 512, %s367_s23, [#allocation12], %s2211_s26, %s2211_s26, %s2212_s27  }
  0x29   : > { %p62_p8 = scmp.ne.s32.totalorder %s1814_s11, %s1810_s10  ;;  %p63_p9 = scmp.eq.s32.totalorder %s1826_s14, 0 }
  0x2a   : > { %p68_p10 = scmp.ne.s32.totalorder %s1810_s10, %s1806_s30  ;;  %s2250_s18 = smov (%p48_p7, %s46_s18), 0 }
  0x2b   : > { %2231 = sst [smem:[#allocation26_spill]] %s2250_s18  ;;  %p1990_p11 = por %p63_p9, %p62_p8 }
  0x2c   : > { %p1996_p12 = por %p69_p1, %p68_p10  ;;  %s50_s25 = ssub.s32 %s1822_s13, %s2250_s18 }
  0x2d   : > { %p251_p13 = scmp.eq.s32.totalorder %s1922_s15, 1  ;;  %p53_p0 = scmp.eq.s32.totalorder %s50_s25, 0 }
  0x2e   : > { %p257_p2 = scmp.eq.s32.totalorder %s1259_s24, 1  ;;  %p1382_p5 = scmp.lt.s32.totalorder %s1826_s14, 2 }
  0x2f   : > { %p2003_p4 = por %p251_p13, %p62_p8  ;;  %s380_s17 = sand.u32 1, %s1814_s11  }
  0x30   : > { %s2009_s29 = scalar_select %p53_p0, %s1814_s11, %s55_s21  }
  0x31   : > { %p2011_p7 = por %p257_p2, %p68_p10  ;;  %s1267_s20 = sshll.u32 %s380_s17, 3 }
  0x32   : > { %2235 = sst [smem:[#allocation27_spill]] %s2009_s29  ;;  %s1268_s23 = sshll.u32 %s1822_s13, 3 }
  0x33   : > { %s2236_s16 = scalar_select %p2011_p7, 1, 0 }
  0x34   : > { %s389_s24 = scalar_lea.hbm %s2201_s0, %s1268_s23  ;;  %s384_s25 = scalar_lea.vmem [#allocation2], %s1267_s20 }
  0x35   : > { %2237 = sst [smem:[#allocation28_spill]] %s2236_s16  ;;  %s393_s4 = sshll.u32 %s384_s25, 4  ;;  %s394_s4 = int_to_ptr.vmem [resolvable:$true] %s393_s4 }
  0x36   : > { %s391_s5 = sshll.u32 %s389_s24, 4  ;;  %p1364_p8 = pnand %p1382_p5, %p1990_p11  ;;  %s392_s5 = int_to_ptr.hbm [resolvable:$true] %s391_s5 }
  0x37   : > { %s1269_s21 = sshll.u32 %s380_s17, 4  ;;  %s1317_s6 = sshll.u32 %s1822_s13, 4 }
  0x38   : > { %s381_s7 = scalar_lea.sflag [#allocation3], %s380_s17  ;;  %s404_s18 = scalar_lea.vmem [#allocation5], %s1269_s21 }
  0x39   : > { %1366 = dma.hbm_to_vmem [thread:$0]  (!%p1364_p8), %s392_s5, 128, %s394_s4, %s381_s7  }
  0x3a   : > { %s412_s29 = sshll.u32 %s404_s18, 4  ;;  %s400_s11 = sand.u32 1, %s1826_s14   ;;  %s413_s29 = int_to_ptr.vmem [resolvable:$true] %s412_s29 }
  0x3b   : > { %s409_s26 = scalar_lea.hbm %s2202_s1, %s1317_s6  ;;  %s401_s20 = scalar_lea.sflag [#allocation6], %s400_s11 }
  0x3c   : > { %s410_s27 = sshll.u32 %s409_s26, 4  ;;  %s2238_s23 = smov 8   ;;  %s411_s27 = int_to_ptr.hbm [resolvable:$true] %s410_s27 }
  0x3d   : > { %s2239_s24 = smov 128   ;;  %424 = sbr.rel (%p1930_p3) target bundleno = 1543 (0x607), region = 52 }
  0x3e   : > { %1369 = dma.hbm_to_vmem [thread:$0]  (!%p1364_p8), %s411_s27, 256, %s413_s29, %s401_s20, %s2239_s24, %s2239_s24, %s2238_s23  }
  0x3f   : > { %s2033_s4 = sand.u32 (!%p1930_p3), 1, %s1810_s10  }
  0x40   : > { %s1273_s5 = sshll.u32 (!%p1930_p3), %s2033_s4, 3  ;;  %s427_s7 = scalar_lea.sflag (!%p1930_p3), [#allocation3], %s2033_s4 }
  0x41   : > { %s430_s6 = scalar_lea.vmem (!%p1930_p3), [#allocation2], %s1273_s5 }
  0x42   : > { %1777 = dma.done.wait (%p1996_p12), %s427_s7, 128  }
  0x43   : > { %1779 = vsyncadd (%p1996_p12), %s427_s7, 4294967168  ;;  %s436_s30 = sand.u32 1, %s1922_s15   ;;  %s1274_s11 = sshll.u32 %s2033_s4, 4 }
  0x44   : > { %s437_s19 = scalar_lea.sflag [#allocation6], %s436_s30  ;;  %s440_s18 = scalar_lea.vmem [#allocation5], %s1274_s11 }
  0x45   : > { %1781 = dma.done.wait (%p1996_p12), %s437_s19, 256  }
  0x46   : > { %1783 = vsyncadd (%p1996_p12), %s437_s19, 4294967040 }
  0x47   : > { %1785 = dma.done.wait (%p69_p1), [#allocation6], 512  }
  0x48   : > { %1787 = vsyncadd (%p69_p1), [#allocation6], 4294966784 }
  0x49   : > { %1789 = dma.done.wait (%p69_p1), [#allocation9], 1024  }
  0x4a   : > { %1791 = vsyncadd (%p69_p1), [#allocation9], 4294966272 }
  0x4b   : > { %1793 = dma.done.wait (%p69_p1), [#allocation12], 1024  }
  0x4c   : > { %1795 = vsyncadd (%p69_p1), [#allocation12], 4294966272  ;;  %v2061_v0 = vld [vmem:[%s430_s6] sm:$0xff]  ;;  %vm513_vm0 = vcmask 261120   ;;  %v572_v4 = vld [vmem:[#allocation10 + $0x8] sm:$0xff]  ;;  %v1835_v9 = vmov 32.0  }
  0x4d   : > { %v574_v1 = vld [vmem:[#allocation10 + $0x18] sm:$0xff]  ;;  %v573_v2 = vld [vmem:[#allocation10 + $0x10] sm:$0xff]  ;;  %v512_v3 = vmul.f32 %v2061_v0, %v2061_v0  ;;  %v571_v6 = vld [vmem:[#allocation10] sm:$0xff]  ;;  %1466 = vrcp.f32 %v1835_v9  ;;  %s1836_s15 = smov 120   ;;  %vm632_vm4 = vcmask 64512   ;;  %s1837_s29 = smov 104  }
  0x4e   : > { %593 = vmatpush.msra.mxu1 %v574_v1  ;;  %v2066_v7 = vld [vmem:[%s440_s18] sm:$0xff]  ;;  %v2070_v8 = vld [vmem:[%s440_s18 + $0x8] sm:$0xff]  ;;  %s1838_s16 = smov 112   ;;  %s1281_s17 = sshll.u32 %s2033_s4, 5  ;;  %vm662_vm6 = vcmask 130048  }
  0x4f   : > { %v514_v5 = vsel %vm513_vm0, %v512_v3, 0.0  ;;  %v547_v13 = vld [vmem:[#allocation8 + $0x18] sm:$0xff]  ;;  %v546_v14 = vld [vmem:[#allocation8 + $0x10] sm:$0xff]  ;;  %v545_v15 = vld [vmem:[#allocation8 + $0x8] sm:$0xff]  ;;  %s2099_s25 = scalar_lea.vmem [#allocation15], %s1281_s17  ;;  %s1318_s26 = sshll.u32 %s1818_s12, 5 }
  0x50   : > { %594 = vmatpush.msra.mxu1 %v573_v2  ;;  %515 = vadd.xlane.f32.xlu0 %v514_v5  ;;  %v544_v17 = vld [vmem:[#allocation8] sm:$0xff]  ;;  %v1465_v30 = vld [vmem:[%s2204_s3] ss:$0 sm:$0xff]  ;;  %v607_v36 = vld [vmem:[#allocation11 + $0x18] sm:$0xff]  ;;  %s1065_s21 = sshll.u32 %s2099_s25, 4  ;;  %s1064_s23 = scalar_lea.hbm %s2210_s9, %s1318_s26  ;;  %s1066_s21 = int_to_ptr.vmem [resolvable:$true] %s1065_s21 }
  0x51   : > { %563 = vmatpush.msra.mxu0 %v547_v13  ;;  %v606_v37 = vld [vmem:[#allocation11 + $0x10] sm:$0xff]  ;;  %620 = vmatpush.msra.mxu2 %v607_v36  ;;  %v605_v38 = vld [vmem:[#allocation11 + $0x8] sm:$0xff]  ;;  %v604_v39 = vld [vmem:[#allocation11] sm:$0xff]  ;;  %s1067_s24 = sshll.u32 %s1064_s23, 4  ;;  %s1037_s7 = scalar_lea.sflag [#allocation16], %s2033_s4  ;;  %s1068_s24 = int_to_ptr.hbm [resolvable:$true] %s1067_s24 }
  0x52   : > { %595 = vmatpush.msra.mxu1 %v572_v4  ;;  %v698_v40 = vld [vmem:[#allocation13] sm:$0xff]  ;;  %v700_v2 = vld [vmem:[#allocation7 + $0x8] sm:$0xff]  ;;  %s1710_s6 = sshra.s32 %s1068_s24, 4  ;;  %s1716_s18 = scalar_lea.hbm %s2210_s9, 64  ;;  %s1711_s6 = int_to_ptr.hbm [resolvable:$true] %s1710_s6 }
  0x53   : > { %v1467_v10 = vpop.eup %1466  ;;  %564 = vmatpush.msra.mxu0 %v546_v14  ;;  %621 = vmatpush.msra.mxu2 %v606_v37  ;;  %v631_v45 = vld [vmem:[#allocation7] sm:$0xff]  ;;  %s1712_s30 = scalar_lea.hbm %s1711_s6, 32  ;;  %p1717_p10 = scmp.lt.s32.totalorder %s1711_s6, %s2210_s9 }
  0x54   : > { %596 = vmatpush.msra.mxu1 %v571_v6  ;;  %v518_v11 = vmul.f32 32.0, %v1467_v10  ;;  %vm522_vm1 = vweird.f32 %v1467_v10  ;;  %v826_v6 = vld [vmem:[#allocation7 + $0x10] sm:$0xff]  ;;  %p1713_p1 = scmp.ne.s32.totalorder %s1711_s6, %s1712_s30  ;;  %p1718_p11 = scmp.lt.s32.totalorder %s1716_s18, %s1712_s30 }
  0x55   : > { %1283 = vmatmul.msk.f32.vlgmr.msra.gmra.mxu1 %vm513_vm0, %v2066_v7  ;;  %565 = vmatpush.msra.mxu0 %v545_v15 }
  0x56   : > { %v519_v12 = vsub.f32 1.0, %v518_v11  ;;  %622 = vmatpush.msra.mxu2 %v605_v38  ;;  %p1714_p3 = pnand %p1713_p1, %p2003_p4  ;;  %p1719_p12 = por %p1718_p11, %p1717_p10 }
  0x57   : > { %566 = vmatpush.msra.mxu0 %v544_v17 }
  0x58   : > { %v520_v16 = vmul.f32 %v1467_v10, %v519_v12  ;;  %623 = vmatpush.msra.mxu2 %v604_v39  ;;  %v928_v12 = vld [vmem:[#allocation7 + $0x18] sm:$0xff]  ;;  %p1715_p9 = pneg %p1714_p3 }
  0x59   : > { %1285 = vmatmul.msk.f32.vlgmr.msra.gmra.mxu2 %vm513_vm0, %v2066_v7 }
  0x5a   : > { %v521_v18 = vadd.f32 %v1467_v10, %v520_v16  ;;  %820 = vmatpush.msrb.mxu2 %v698_v40  ;;  %p1720_p13 = pnand %p1719_p12, %p1715_p9 }
  0x5c   : > { %v523_v19 = vsel %vm522_vm1, %v1467_v10, %v521_v18 }
  0x5d   : > { %1284 = vmatmul.msk.f32.gmra.mxu1 %vm513_vm0, %v2070_v8 }
  0x61   : > { %1286 = vmatmul.msk.f32.gmra.mxu2 %vm513_vm0, %v2070_v8 }
  0xc3   : > { %v516_v20 = vpop.xlane.xlu0 %515 }
  0xc4   : > { %v524_v21 = vmul.f32 %v523_v19, %v516_v20 }
  0xc6   : > { %v525_v22 = vadd.f32 1e-06, %v524_v21 }
  0xc8   : > { %1468 = vrsqrt.f32 %v525_v22  ;;  %vm532_vm3 = vweird.f32 %v525_v22 }
  0xce   : > { %v1469_v23 = vpop.eup %1468 }
  0xcf   : > { %v527_v24 = vmul.f32 %v1469_v23, %v525_v22  ;;  %vm533_vm2 = vweird.f32 %v1469_v23 }
  0xd0   : > { %vm534_vm5 = vmor %vm532_vm3, %vm533_vm2 }
  0xd1   : > { %v528_v25 = vmul.f32 %v1469_v23, %v527_v24 }
  0xd2   : > { %v2074_v26 = vpop.f32.mrf.mxu1 }
  0xd3   : > { %703 = vrot.lane.b32.xlu2 %v2074_v26, %s1836_s15  ;;  %v529_v27 = vmul.f32 0.5, %v528_v25 }
  0xd5   : > { %v530_v28 = vsub.f32 1.5, %v529_v27 }
  0xd7   : > { %v531_v29 = vmul.f32 %v1469_v23, %v530_v28 }
  0xd9   : > { %v535_v31 = vsel %vm534_vm5, %v1469_v23, %v531_v29 }
  0xda   : > { %v601_v32 = vpop.f32.mrf.mxu1  ;;  %v536_v33 = vmul.f32 %v535_v31, %v2061_v0 }
  0xdb   : > { %933 = vrot.lane.b32.xlu2 %v601_v32, %s1837_s29  ;;  %1287 = vmatpush.xpose.msk.msra.mxu3 %vm632_vm4, %v601_v32 }
  0xdc   : > { %v541_v34 = vmul.f32 %v1465_v30, %v536_v33  ;;  %v625_v54 = vpop.f32.mrf.mxu2 }
  0xde   : > { %1282 = vmatmul.msk.f32.vlgmr.msra.gmra.mxu0 %vm513_vm0, %v541_v34 }
  0xdf   : > { %1288 = vmatpush.xpose.msk.msra.mxu3 %vm632_vm4, %v2074_v26 }
  0xe3   : > { %831 = vrot.lane.b32.xlu2 %v601_v32, %s1838_s16 }
  0xe4   : > { %v628_v55 = vpop.f32.mrf.mxu2 }
  0xe5   : > { %692 = vmatpush.msrb.mxu0 %v628_v55  ;;  %v1450_v10 = vpack.i.bf16 %v625_v54, %v628_v55 }
  0xe7   : > { %693 = vmatpush.msrb.mxu0 %v625_v54 }
  0xeb   : > { %931 = vrot.lane.b32.xlu2 %v2074_v26, %s1837_s29 }
 0x12d   : > { %v704_v35 = vpop.permute.xlu2 %703 }
 0x135   : > { %v934_v41 = vpop.permute.xlu2 %933 }
 0x136   : > { %1304 = vmatpush.xpose.msk.msra.mxu2 %vm632_vm4, %v934_v41 }
 0x13d   : > { %v832_v42 = vpop.permute.xlu2 %831 }
 0x145   : > { %v932_v43 = vpop.permute.xlu2 %931 }
 0x146   : > { %1305 = vmatpush.xpose.msk.msra.mxu2 %vm632_vm4, %v932_v43  ;;  %v778_v43 = vld [vmem:[#allocation13 + $0x8] sm:$0xff] }
 0x147   : > { %797 = vmatpush.msrb.mxu1 %v778_v43 }
 0x15b   : > { %v568_v44 = vpop.f32.mrf.mxu0 }
 0x15c   : > { %929 = vrot.lane.b32.xlu2 %v568_v44, %s1837_s29  ;;  %1289 = vmatmul.msk.f32.vlgmr.msra.gmra.mxu3 %vm632_vm4, %v568_v44 }
 0x1b6   : > { %v930_v1 = vpop.permute.xlu2 %929 }
 0x1df   : > { %v659_v46 = vpop.f32.mrf.mxu3 }
 0x1e0   : > { %v660_v47 = vadd.f32 %v659_v46, %v631_v45 }
 0x1e2   : > { %663 = vst.msk [vmem:[%s2099_s25] sm:$0xff] %vm662_vm6, %v660_v47  ;;  %v664_v48 = vsel %vm662_vm6, %v660_v47, -inf }
 0x1e3   : > { %665 = vmax.xlane.f32.xlu0 %v664_v48 }
 0x1f7   : > { %701 = vrot.lane.b32.xlu0 %v568_v44, %s1836_s15 }
 0x1ff   : > { %827 = vrot.lane.b32.xlu0 %v568_v44, %s1838_s16  ;;  %v902_v44 = vld [vmem:[#allocation13 + $0x10] sm:$0xff] }
 0x200   : > { %921 = vmatpush.msra.mxu1 %v902_v44 }
 0x256   : > { %v666_v49 = vpop.xlane.xlu0 %665 }
 0x257   : > { %v667_v50 = vsub.f32 %v660_v47, %v666_v49 }
 0x259   : > { %v668_v51 = vmul.f32 1.442695, %v667_v50 }
 0x25b   : > { %1470 = vpow2.f32 %v668_v51 }
 0x261   : > { %v1471_v52 = vpop.eup %1470 }
 0x262   : > { %v670_v53 = vsel %vm662_vm6, %v1471_v52, 0.0 }
 0x263   : > { %671 = vadd.xlane.f32.xlu1 %v670_v53  ;;  %v1004_v53 = vld [vmem:[#allocation13 + $0x18] sm:$0xff] }
 0x269   : > { %v702_v60 = vpop.permute.xlu0 %701 }
 0x271   : > { %v828_v62 = vpop.permute.xlu0 %827 }
 0x27c   : > { %705 = vrot.lane.b32.xlu1 %v601_v32, %s1836_s15 }
 0x284   : > { %829 = vrot.lane.b32.xlu1 %v2074_v26, %s1838_s16 }
 0x2d6   : > { %v672_v56 = vpop.xlane.xlu1 %671 }
 0x2d7   : > { %1472 = vrcp.f32 %v672_v56 }
 0x2dd   : > { %v1473_v57 = vpop.eup %1472 }
 0x2de   : > { %v674_v58 = vmul.f32 %v1473_v57, %v1471_v52 }
 0x2e0   : > { %1290 = vmatmul.msk.f32.vlgmr.msrb.gmra.mxu0 %vm662_vm6, %v674_v58 }
 0x2ee   : > { %v706_v59 = vpop.permute.xlu1 %705 }
 0x2ef   : > { %1291 = vmatpush.xpose.msk.msrb.mxu3 %vm632_vm4, %v706_v59 }
 0x2f3   : > { %1292 = vmatpush.xpose.msk.msrb.mxu3 %vm632_vm4, %v704_v35 }
 0x2f6   : > { %v830_v61 = vpop.permute.xlu1 %829  ;;  %1293 = vmatmul.msk.f32.vlgmr.msrb.gmra.mxu3 %vm632_vm4, %v702_v60 }
 0x2f7   : > { %1298 = vmatpush.xpose.msk.msra.mxu3 %vm632_vm4, %v832_v42 }
 0x2fb   : > { %1299 = vmatpush.xpose.msk.msra.mxu3 %vm632_vm4, %v830_v61 }
 0x2fe   : > { %1300 = vmatmul.msk.f32.vlgmr.msra.gmra.mxu3 %vm632_vm4, %v828_v62 }
 0x35d   : > { %v695_v63 = vpop.f32.mrf.mxu0 }
 0x35e   : > { %1297 = vmatmul.msk.f32.vlgmr.msrb.gmra.mxu2 %vm632_vm4, %v695_v63 }
 0x366   : > { %1306 = vmatmul.msk.f32.vlgmr.msra.gmra.mxu2 %vm632_vm4, %v930_v1 }
 0x379   : > { %v730_v3 = vpop.f32.mrf.mxu3 }
 0x37a   : > { %v731_v4 = vadd.f32 %v730_v3, %v700_v2 }
 0x37c   : > { %1294 = vst.msk [vmem:[%s2099_s25 + $0x8] sm:$0xff] %vm662_vm6, %v731_v4  ;;  %v735_v5 = vsel %vm662_vm6, %v731_v4, -inf }
 0x37d   : > { %736 = vmax.xlane.f32.xlu2 %v735_v5 }
 0x381   : > { %v856_v7 = vpop.f32.mrf.mxu3 }
 0x382   : > { %v857_v8 = vadd.f32 %v856_v7, %v826_v6 }
 0x384   : > { %1301 = vst.msk [vmem:[%s2099_s25 + $0x10] sm:$0xff] %vm662_vm6, %v857_v8  ;;  %v861_v9 = vsel %vm662_vm6, %v857_v8, -inf }
 0x385   : > { %862 = vmax.xlane.f32.xlu0 %v861_v9 }
 0x399   : > { %1451 = vrot.lane.b32.xlu0 %v1450_v10, %s1836_s15 }
 0x3e1   : > { %v2126_v11 = vpop.f32.mrf.mxu2 }
 0x3e9   : > { %v958_v13 = vpop.f32.mrf.mxu2 }
 0x3ea   : > { %v959_v14 = vadd.f32 %v958_v13, %v928_v12 }
 0x3ec   : > { %1307 = vst.msk [vmem:[%s2099_s25 + $0x18] sm:$0xff] %vm662_vm6, %v959_v14  ;;  %v963_v15 = vsel %vm662_vm6, %v959_v14, -inf }
 0x3ed   : > { %964 = vmax.xlane.f32.xlu1 %v963_v15 }
 0x3f0   : > { %v737_v16 = vpop.xlane.xlu2 %736 }
 0x3f1   : > { %v738_v17 = vsub.f32 %v731_v4, %v737_v16 }
 0x3f3   : > { %v739_v18 = vmul.f32 1.442695, %v738_v17 }
 0x3f5   : > { %1474 = vpow2.f32 %v739_v18 }
 0x3f8   : > { %v863_v19 = vpop.xlane.xlu0 %862 }
 0x3f9   : > { %v864_v20 = vsub.f32 %v857_v8, %v863_v19 }
 0x3fb   : > { %v1475_v21 = vpop.eup %1474  ;;  %v865_v22 = vmul.f32 1.442695, %v864_v20 }
 0x3fc   : > { %v741_v23 = vsel %vm662_vm6, %v1475_v21, 0.0 }
 0x3fd   : > { %1476 = vpow2.f32 %v865_v22  ;;  %742 = vadd.xlane.f32.xlu2 %v741_v23 }
 0x403   : > { %v1477_v24 = vpop.eup %1476 }
 0x404   : > { %v867_v25 = vsel %vm662_vm6, %v1477_v24, 0.0 }
 0x405   : > { %868 = vadd.xlane.f32.xlu2 %v867_v25 }
 0x40b   : > { %v1452_v26 = vpop.permute.xlu0 %1451 }
 0x40c   : > { %v1453_v27 = vunpack.i.l.bf16 %v1452_v26  ;;  %v1454_v28 = vunpack.i.h.bf16 %v1452_v26 }
 0x40e   : > { %771 = vmatpush.msra.mxu0 %v1453_v27 }
 0x410   : > { %772 = vmatpush.msra.mxu0 %v1454_v28 }
 0x41d   : > { %1461 = vrot.lane.b32.xlu2 %v1450_v10, %s1838_s16 }
 0x460   : > { %v965_v29 = vpop.xlane.xlu1 %964 }
 0x461   : > { %v966_v30 = vsub.f32 %v959_v14, %v965_v29 }
 0x463   : > { %v967_v31 = vmul.f32 1.442695, %v966_v30 }
 0x465   : > { %1478 = vpow2.f32 %v967_v31 }
 0x46b   : > { %v1479_v32 = vpop.eup %1478 }
 0x46c   : > { %v969_v33 = vsel %vm662_vm6, %v1479_v32, 0.0 }
 0x46d   : > { %970 = vadd.xlane.f32.xlu1 %v969_v33 }
 0x470   : > { %v743_v34 = vpop.xlane.xlu2 %742 }
 0x471   : > { %1480 = vrcp.f32 %v743_v34 }
 0x477   : > { %v1481_v35 = vpop.eup %1480 }
 0x478   : > { %v745_v36 = vmul.f32 %v1481_v35, %v1475_v21  ;;  %v869_v37 = vpop.xlane.xlu2 %868 }
 0x479   : > { %1482 = vrcp.f32 %v869_v37 }
 0x47a   : > { %1295 = vmatmul.msk.f32.vlgmr.msra.gmra.mxu0 %vm662_vm6, %v745_v36 }
 0x47f   : > { %v1483_v39 = vpop.eup %1482 }
 0x480   : > { %v1462_v38 = vpop.permute.xlu2 %1461  ;;  %v871_v42 = vmul.f32 %v1483_v39, %v1477_v24 }
 0x481   : > { %v1463_v40 = vunpack.i.l.bf16 %v1462_v38  ;;  %v1464_v41 = vunpack.i.h.bf16 %v1462_v38 }
 0x483   : > { %895 = vmatpush.msrb.mxu0 %v1463_v40 }
 0x485   : > { %896 = vmatpush.msrb.mxu0 %v1464_v41 }
 0x486   : > { %1456 = vrot.lane.b32.xlu1 %v1450_v10, %s1837_s29  ;;  %1302 = vmatmul.msk.f32.vlgmr.msrb.gmra.mxu0 %vm662_vm6, %v871_v42 }
 0x487   : > { %1023 = vmatpush.msra.mxu0 %v1004_v53 }
 0x4e0   : > { %v971_v45 = vpop.xlane.xlu1 %970 }
 0x4e1   : > { %1484 = vrcp.f32 %v971_v45 }
 0x4e7   : > { %v1485_v48 = vpop.eup %1484 }
 0x4e8   : > { %v973_v51 = vmul.f32 %v1485_v48, %v1479_v32 }
 0x4f7   : > { %v774_v46 = vpop.f32.mrf.mxu0 }
 0x4f8   : > { %v1457_v47 = vpop.permute.xlu1 %1456  ;;  %1296 = vmatmul.msk.f32.vlgmr.msrb.gmra.mxu1 %vm632_vm4, %v774_v46 }
 0x4f9   : > { %v1458_v49 = vunpack.i.l.bf16 %v1457_v47  ;;  %v1459_v50 = vunpack.i.h.bf16 %v1457_v47 }
 0x4fb   : > { %997 = vmatpush.msrb.mxu3 %v1458_v49 }
 0x4fd   : > { %998 = vmatpush.msrb.mxu3 %v1459_v50 }
 0x4fe   : > { %1308 = vmatmul.msk.f32.vlgmr.msrb.gmra.mxu3 %vm662_vm6, %v973_v51 }
 0x503   : > { %v898_v52 = vpop.f32.mrf.mxu0 }
 0x504   : > { %1303 = vmatmul.msk.f32.vlgmr.msra.gmra.mxu1 %vm632_vm4, %v898_v52 }
 0x581   : > { %v1000_v54 = vpop.f32.mrf.mxu3 }
 0x582   : > { %1309 = vmatmul.msk.f32.vlgmr.msra.gmra.mxu0 %vm632_vm4, %v1000_v54 }
 0x583   : > { %1723 = shalt.err (!%p1720_p13)
}
 0x584   : > { %s1839_s22 = smov 128   ;;  %s1840_s29 = smov 8   ;;  %v799_v55 = vpop.f32.mrf.mxu1 }
 0x585   : > { %1344 = dma.vmem_to_hbm [thread:$0]  (%p2003_p4), %s1066_s21, 512, %s1068_s24, %s1037_s7, %s1839_s22, %s1839_s22, %s1840_s29   ;;  %v823_v57 = vadd.f32 %v2126_v11, %v799_v55 }
 0x586   : > { %s1312_s16 = sshll.u32 %s1818_s12, 3  ;;  %s503_s27 = scalar_lea.vmem [#allocation14], %s1273_s5 }
 0x587   : > { %s1048_s26 = scalar_lea.hbm %s2209_s8, %s1312_s16  ;;  %s1050_s20 = sshll.u32 %s503_s27, 4  ;;  %s1051_s20 = int_to_ptr.vmem [resolvable:$true] %s1050_s20 }
 0x588   : > { %s1052_s23 = sshll.u32 %s1048_s26, 4  ;;  %s1032_s12 = scalar_lea.sflag [#allocation4], %s2033_s4  ;;  %s1053_s23 = int_to_ptr.hbm [resolvable:$true] %s1052_s23 }
 0x589   : > { %s1738_s21 = sshra.s32 %s1053_s23, 4  ;;  %s1744_s5 = scalar_lea.hbm %s2209_s8, 16  ;;  %s1739_s21 = int_to_ptr.hbm [resolvable:$true] %s1738_s21 }
 0x58a   : > { %s1740_s24 = scalar_lea.hbm %s1739_s21, 8  ;;  %p1745_p8 = scmp.lt.s32.totalorder %s1739_s21, %s2209_s8 }
 0x58b   : > { %p1741_p0 = scmp.ne.s32.totalorder %s1739_s21, %s1740_s24  ;;  %p1746_p1 = scmp.lt.s32.totalorder %s1744_s5, %s1740_s24 }
 0x58c   : > { %v923_v56 = vpop.f32.mrf.mxu1 }
 0x58d   : > { %v926_v58 = vadd.f32 %v923_v56, %v823_v57  ;;  %p1742_p2 = pnand %p1741_p0, %p2003_p4  ;;  %p1747_p3 = por %p1746_p1, %p1745_p8 }
 0x58f   : > { %p1743_p5 = pneg %p1742_p2 }
 0x591   : > { %p1748_p9 = pnand %p1747_p3, %p1743_p5 }
 0x5ff   : > { %v1025_v59 = vpop.f32.mrf.mxu0 }
 0x600   : > { %v1028_v60 = vadd.f32 %v1025_v59, %v926_v58 }
 0x602   : > { %v1029_v61 = vadd.f32 %v1028_v60, %v2061_v0 }
 0x604   : > { %1030 = vst.msk [vmem:[%s503_s27] sm:$0xff] %vm513_vm0, %v1029_v61 }
 0x605   : > { %1751 = shalt.err (!%p1748_p9)
}
 0x606   : > { %1343 = dma.vmem_to_hbm [thread:$0]  (%p2003_p4), %s1051_s20, 128, %s1053_s23, %s1032_s12  }
 0x607 PF: > { %s2240_s4 = sld [smem:[#allocation24_spill]]  ;;  %p1371_p10 = pnand %p1266_p6, %p2011_p7 }
 0x609   : > { %p1372_p11 = pneg %p1371_p10 }
 0x60d   : > { %s1082_s18 = sand.u32 1, %s2240_s4  }
 0x60e   : > { %s1083_s15 = scalar_lea.sflag [#allocation4], %s1082_s18 }
 0x60f   : > { %1797 = dma.done.wait (%p1372_p11), %s1083_s15, 128  }
 0x610   : > { %1799 = vsyncadd (%p1372_p11), %s1083_s15, 4294967168  ;;  %s1093_s2 = scalar_lea.sflag [#allocation16], %s1082_s18 }
 0x611   : > { %1801 = dma.done.wait (%p1372_p11), %s1093_s2, 512  }
 0x612   : > { %1803 = vsyncadd (%p1372_p11), %s1093_s2, 4294966784  ;;  %s34_s14 = sadd.s32 1, %s1826_s14   ;;  %s2242_s28 = sld [smem:[#allocation25_spill]] }
 0x613   : > { %p31_p12 = scmp.ge.s32.totalorder %s34_s14, 4   ;;  %s2243_s11 = sld [smem:[#allocation27_spill]] }
 0x614   : > { %s2244_s22 = sld [smem:[#allocation26_spill]]  ;;  %s2245_s30 = smov %s1810_s10 }
 0x615   : > { %s2247_s12 = smov %s1822_s13 }
 0x616   :  { %33 = sbr.rel (!%p31_p12) target bundleno = 18 (0x12), region = 157 }
 0x618   : > { %s2246_s10 = smov %s2242_s28 }
 0x61a   : > { %s2248_s13 = smov %s2244_s22 }
 0x61b   :  { %1099 = vsyncpa [#allocation3], 1 }
 0x61c   :  { %1101 = vsyncpa [#allocation3 + $0x1], 1 }
 0x61d   :  { %1102 = vsyncpa [#allocation6], 1 }
 0x61e   :  { %1104 = vsyncpa [#allocation6 + $0x1], 1 }
 0x61f   :  { %1105 = vsyncpa [#allocation9], 1 }
 0x620   :  { %1106 = vsyncpa [#allocation12], 1 }
 0x621   :  { %1107 = vsyncpa [#allocation4], 1 }
 0x622   :  { %1109 = vsyncpa [#allocation4 + $0x1], 1 }
 0x623   :  { %1110 = vsyncpa [#allocation16], 1 }
 0x624   :  { %1112 = vsyncpa [#allocation16 + $0x1], 1 }

</bundles_post_ra>
